<compile_context>
chip_gen: v7x
topology: tpu7x:2x2x1
jax: 0.10.0
libtpu: 0.0.40
codegen_flags: <defaults>
</compile_context>

<pallas_src>
import jax
import jax.numpy as jnp
from jax.experimental import pallas as pl
from jax.experimental.pallas import tpu as pltpu


def _nt_dot(x, w):
    """x @ w.T with f32 accumulation (w stored (out, in) like torch.nn.Linear)."""
    return jax.lax.dot_general(
        x, w, (((x.ndim - 1,), (w.ndim - 1,)), ((), ())),
        preferred_element_type=jnp.float32)


# ---------------------------------------------------------------------------
# Projection kernel: all three modalities in one launch.
#   Linear(d_in -> 256) + LayerNorm(256) + ReLU, rows = (B * n_modality)
# ---------------------------------------------------------------------------
def _projection_kernel(face_ref, body_ref, voice_ref,
                       w_f_ref, b_f_ref, g_f_ref, bt_f_ref,
                       w_b_ref, b_b_ref, g_b_ref, bt_b_ref,
                       w_v_ref, b_v_ref, g_v_ref, bt_v_ref,
                       o_f_ref, o_b_ref, o_v_ref):
    def _proj(x_ref, w_ref, b_ref, g_ref, bt_ref, o_ref):
        x = x_ref[...].astype(jnp.bfloat16)               # bf16 MXU operand
        h = _nt_dot(x, w_ref[...]) + b_ref[...]           # weights already bf16
        mu = jnp.mean(h, axis=-1, keepdims=True)
        var = jnp.mean((h - mu) ** 2, axis=-1, keepdims=True)
        hn = (h - mu) * jax.lax.rsqrt(var + 1e-5) * g_ref[...] + bt_ref[...]
        o_ref[...] = jnp.maximum(hn, 0.0)

    _proj(face_ref, w_f_ref, b_f_ref, g_f_ref, bt_f_ref, o_f_ref)
    _proj(body_ref, w_b_ref, b_b_ref, g_b_ref, bt_b_ref, o_b_ref)
    _proj(voice_ref, w_v_ref, b_v_ref, g_v_ref, bt_v_ref, o_v_ref)


def project_all(face2d, body2d, voice2d, pf, pb, pv):
    """One pallas_call projecting face/body/voice row-stacked 2-D inputs.

    Row counts are tiny (B * n_modality); grid=(1,) is fine.  Give this a row
    grid if B*n ever becomes large (review #10).
    """
    d_out = pf[0].shape[0]

    def _full(shape):
        nd = len(shape)
        return pl.BlockSpec(shape, lambda i, _nd=nd: (0,) * _nd)

    args = [face2d, body2d, voice2d]
    in_specs = [_full(face2d.shape), _full(body2d.shape), _full(voice2d.shape)]
    for (w, b, g, bt) in (pf, pb, pv):
        args += [w, b, g, bt]                              # w pre-cast to bf16
        in_specs += [_full(w.shape), _full(b.shape), _full(g.shape), _full(bt.shape)]

    out_shape = tuple(jax.ShapeDtypeStruct((x.shape[0], d_out), jnp.float32)
                      for x in (face2d, body2d, voice2d))
    out_specs = tuple(_full((x.shape[0], d_out)) for x in (face2d, body2d, voice2d))

    return pl.pallas_call(
        _projection_kernel,
        out_shape=out_shape,
        grid=(1,),
        in_specs=in_specs,
        out_specs=out_specs,
        compiler_params=pltpu.CompilerParams(dimension_semantics=("arbitrary",)),
    )(*args)


# ---------------------------------------------------------------------------
# Fused multi-generation kernel: grid = (batch, generation)
#   MultiModal_FeatureSimilarity -> F2DAgg -> DistributionSimilarity -> D2FAgg
# State (feature_node / distribution_node) lives in VMEM scratch; all weight
# tables are VMEM-resident full-G blocks indexed by the generation id.
# ---------------------------------------------------------------------------
def _make_gen_kernel(N, NF):
    NN = N * N

    def kernel(feat0_ref, dist0_ref, assoc_ref, sm_ref, rmask_ref, psel_ref,
               wa_ref, wp_ref, w1_ref, v2_ref, sc_ref,
               wr_ref, wf_ref, row_ref, bbr_ref,
               nsim_ref, dsim_ref,
               feat_ref, dist_ref):
        g = pl.program_id(1)

        # First generation for this batch element: load projected features and
        # the initial distribution node into the VMEM-resident scratch state.
        @pl.when(g == 0)
        def _():
            feat_ref[...] = feat0_ref[0]
            dist_ref[...] = dist0_ref[0]

        feat = feat_ref[...]          # (N, NF)  carried across generations
        dist = dist_ref[...]          # (N, N)
        assoc = assoc_ref[0]          # (N, N)
        same_modal = sm_ref[...]      # (N, N)  block-diagonal modality mask

        row_ids = jax.lax.broadcasted_iota(jnp.int32, (N, N), 0)
        col_ids = jax.lax.broadcasted_iota(jnp.int32, (N, N), 1)
        eye = (row_ids == col_ids).astype(jnp.float32)

        # ===== MultiModal FeatureSimilarity (block-diagonal cosine similarity) =====
        # f32 operands (not bf16) so relu(cos - 1e-4) keeps torch-level fidelity.
        nrm = jnp.sqrt(jnp.sum(feat * feat, axis=-1, keepdims=True))
        featn = feat / jnp.maximum(nrm, 1e-12)
        cos = _nt_dot(featn, featn)                         # (N, N)
        node_sim = same_modal * jnp.maximum(cos - 1e-4, 0.0)
        nsim_ref[0, 0] = node_sim

        # ===== F2DAgg =====
        fe = node_sim
        ae = jnp.where(assoc > 0, 1.0, assoc)               # torch: assoc[assoc > 0] = 1
        d_r = jnp.sum(fe, axis=-1, keepdims=True)           # (N, 1)
        d_c = jnp.sum(fe, axis=0, keepdims=True)            # (1, N) (fe symmetric)
        S = (fe * jax.lax.rsqrt(jnp.maximum(d_r, 1e-12))
                * jax.lax.rsqrt(jnp.maximum(d_c, 1e-12)))   # D^-1/2 fe D^-1/2
        SA = jnp.dot(S, ae, preferred_element_type=jnp.float32)
        C = _nt_dot(SA, S)                                  # S @ ae @ S.T
        alpha = jax.nn.sigmoid(_nt_dot(fe, wa_ref[g, 0]) + _nt_dot(C, wa_ref[g, 1])
                               + sc_ref[g, 0])
        fe2 = alpha * C + (1.0 - alpha) * fe
        # p2d Linear(2N -> N) done as two half-weight matmuls (no lane concat).
        h = _nt_dot(fe2, wp_ref[g, 0]) + _nt_dot(dist, wp_ref[g, 1]) + wa_ref[g, 2]
        new_dist = jnp.where(h >= 0.0, h, 0.01 * h)         # LeakyReLU(0.01)
        dist_ref[...] = new_dist

        # ===== DistributionSimilarity: pairwise |dn_i - dn_j| MLP, loop-free =====
        rep_sel = psel_ref[0]         # (NN, N): [r, i] = 1  iff  r // N == i
        tile_sel = psel_ref[1]        # (NN, N): [r, j] = 1  iff  r %  N == j
        a_rows = jnp.dot(rep_sel, new_dist, preferred_element_type=jnp.float32)
        b_rows = jnp.dot(tile_sel, new_dist, preferred_element_type=jnp.float32)
        vd = jnp.abs(a_rows - b_rows)                       # row i*N+j = |dn_i - dn_j|
        h1 = _nt_dot(vd, w1_ref[g]) + v2_ref[g, 0]          # (NN, 2N)
        h1 = jnp.where(h1 >= 0.0, h1, sc_ref[g, 2] * h1)    # PReLU
        logit_col = _nt_dot(h1, v2_ref[g, 1])               # (NN, 1)
        # Fold (NN, 1) -> (N, N): exact permutation via one selector matmul.
        fi = jax.lax.broadcasted_iota(jnp.int32, (N, NN), 0)
        fr = jax.lax.broadcasted_iota(jnp.int32, (N, NN), 1)
        lo = fi * N
        fold_sel = ((fr >= lo) & (fr < lo + N)).astype(jnp.float32)   # (N, NN)
        logit_mat = jnp.dot(fold_sel, logit_col * tile_sel,
                            preferred_element_type=jnp.float32) + sc_ref[g, 1]
        ed = jax.nn.sigmoid(logit_mat)                      # ed[i, j] = sim(i, j)
        dsim_ref[0, 0] = ed
        de = ed * (1.0 - eye) + eye + 1e-6                  # torch adds eye + 1e-6 to all
        de = de / jnp.sum(de, axis=-1, keepdims=True)

        # ===== D2FAgg (all three modalities fused) =====
        edge = de * same_modal * (1.0 - eye)
        l1 = jnp.sum(jnp.abs(edge), axis=-1, keepdims=True)
        edge = edge / jnp.maximum(l1, 1e-12)                # F.normalize p=1
        r0, r1, r2 = rmask_ref[0], rmask_ref[1], rmask_ref[2]          # (N, 1)
        # feat_i finished before the aggr matmul (shorter live ranges, review #7)
        feat_all = _nt_dot(feat.astype(jnp.bfloat16), wf_ref[g])       # (N, 3*NF)
        feat_i = (r0 * feat_all[:, :NF] + r1 * feat_all[:, NF:2 * NF]
                  + r2 * feat_all[:, 2 * NF:]) + row_ref[g, 0]
        aggr_in = jnp.dot(edge, feat, preferred_element_type=jnp.float32)   # (N, NF)
        aggr_all = _nt_dot(aggr_in.astype(jnp.bfloat16), wr_ref[g])    # (N, 3*NF)
        aggr = (r0 * aggr_all[:, :NF] + r1 * aggr_all[:, NF:2 * NF]
                + r2 * aggr_all[:, 2 * NF:]) + row_ref[g, 1]
        # beta Linear(3*NF -> 1) without the lane concat:
        # logit = f.(wb_f+wb_d) + a.(wb_a-wb_d) + bb (weights gathered per row).
        logit = jnp.sum(feat_i * row_ref[g, 2] + aggr * row_ref[g, 3],
                        axis=-1, keepdims=True) + bbr_ref[g]
        beta = jax.nn.sigmoid(logit)
        mix = feat_i * beta + aggr * (1.0 - beta)
        mu = jnp.mean(mix, axis=-1, keepdims=True)
        var = jnp.mean((mix - mu) ** 2, axis=-1, keepdims=True)
        ln = (mix - mu) * jax.lax.rsqrt(var + 1e-5) * row_ref[g, 4] + row_ref[g, 5]
        feat_ref[...] = jnp.maximum(ln, 0.0)

    return kernel


def run_generations(feat, dist, assoc, same_modal, rmask, pair_sel, kp):
    B, N, NF = feat.shape
    G = kp['w1'].shape[0]
    NN = N * N
    kernel = _make_gen_kernel(N, NF)

    def const_spec(shape):
        nd = len(shape)
        return pl.BlockSpec(shape, lambda b, g, _nd=nd: (0,) * _nd)

    in_specs = [
        pl.BlockSpec((1, N, NF), lambda b, g: (b, 0, 0)),   # feature_node (init)
        pl.BlockSpec((1, N, N), lambda b, g: (b, 0, 0)),    # distribution_node (init)
        pl.BlockSpec((1, N, N), lambda b, g: (b, 0, 0)),    # associated_matrix
        const_spec((N, N)),                                 # same-modality mask
        const_spec((3, N, 1)),                              # per-modality row masks
        const_spec((2, NN, N)),                             # pairwise selectors
        # --- per-generation weights: full-G blocks, constant index map,
        #     DMA'd once and VMEM-resident for the whole kernel (review #1) ---
        const_spec((G, 3, 1, N)),                           # [wa_f, wa_c, b_p2d]
        const_spec((G, 2, N, N)),                           # [wp_f, wp_d]
        const_spec((G, 2 * N, N)),                          # w1
        const_spec((G, 2, 1, 2 * N)),                       # [b1, w2]
        const_spec((G, 3, 1, 1)),                           # [b_alpha, b2, prelu]
        const_spec((G, 3 * NF, NF)),                        # wr stacked (bf16)
        const_spec((G, 3 * NF, NF)),                        # wf stacked (bf16)
        const_spec((G, 6, N, NF)),                          # per-row param tables
        const_spec((G, N, 1)),                              # bb per row
    ]
    out_specs = (
        pl.BlockSpec((1, 1, N, N), lambda b, g: (b, g, 0, 0)),   # node_similarity
        pl.BlockSpec((1, 1, N, N), lambda b, g: (b, g, 0, 0)),   # distribution_similarity
    )
    out_shape = (
        jax.ShapeDtypeStruct((B, G, N, N), jnp.float32),
        jax.ShapeDtypeStruct((B, G, N, N), jnp.float32),
    )
    # VMEM budget: resident weights ~= G * 0.9 MiB (+ double-buffer headroom),
    # state + selectors < 0.1 MiB -> well under default limits for small G.
    node_sims, dist_sims = pl.pallas_call(
        kernel,
        out_shape=out_shape,
        grid=(B, G),
        in_specs=in_specs,
        out_specs=out_specs,
        scratch_shapes=[pltpu.VMEM((N, NF), jnp.float32),   # feature_node state
                        pltpu.VMEM((N, N), jnp.float32)],   # distribution_node state
        compiler_params=pltpu.CompilerParams(
            dimension_semantics=("parallel", "arbitrary")),
    )(feat, dist, assoc, same_modal, rmask, pair_sel,
      kp['wa_tbl'], kp['wp_tbl'], kp['w1'], kp['v2_tbl'], kp['sc_tbl'],
      kp['wr_st'], kp['wf_st'], kp['row_tbl'], kp['bb_row'])
    return node_sims, dist_sims


# ---------------------------------------------------------------------------
# Wrapper-side parameter packing (stack over generations, split concat weights,
# gather per-row modality parameters; big weights already bf16).
# ---------------------------------------------------------------------------
def prepare_gen_params(gens, mid, N, NF):
    wa_tbl, wp_tbl, w1s, v2_tbl, sc_tbl = [], [], [], [], []
    wr_st, wf_st, row_tbl, bb_row = [], [], [], []
    for gp in gens:
        wa_tbl.append(jnp.stack([gp['w_alpha'][:, :N], gp['w_alpha'][:, N:], gp['b_p2d']]))
        wp_tbl.append(jnp.stack([gp['w_p2d'][:, :N], gp['w_p2d'][:, N:]]))
        w1s.append(gp['w1'])
        v2_tbl.append(jnp.stack([gp['b1'], gp['w2']]))
        sc_tbl.append(jnp.stack([gp['b_alpha'], gp['b2'], gp['prelu']]))
        wr_st.append(gp['wr'].reshape(3 * NF, NF))           # bf16 from init
        wf_st.append(gp['wf'].reshape(3 * NF, NF))           # bf16 from init
        wb = gp['wb'].reshape(3, 3 * NF)
        wb_f, wb_a, wb_d = wb[:, :NF], wb[:, NF:2 * NF], wb[:, 2 * NF:]
        row_tbl.append(jnp.stack([
            gp['bf'][mid], gp['br'][mid],
            (wb_f + wb_d)[mid], (wb_a - wb_d)[mid],
            gp['gln'][mid], gp['bln'][mid]]))                # (6, N, NF)
        bb_row.append(gp['bb'][mid])                         # (N, 1)
    return dict(
        wa_tbl=jnp.stack(wa_tbl), wp_tbl=jnp.stack(wp_tbl), w1=jnp.stack(w1s),
        v2_tbl=jnp.stack(v2_tbl), sc_tbl=jnp.stack(sc_tbl),
        wr_st=jnp.stack(wr_st), wf_st=jnp.stack(wf_st),
        row_tbl=jnp.stack(row_tbl), bb_row=jnp.stack(bb_row))


# ---------------------------------------------------------------------------
# Parameter construction (deterministic, synthetic, torch-like layout)
# ---------------------------------------------------------------------------
def init_params(key, N, num_generations):
    keys = iter(jax.random.split(key, 64))

    def lin(out_c, in_c, scale=0.05):
        kw, kb = jax.random.split(next(keys))
        return (scale * jax.random.normal(kw, (out_c, in_c), jnp.float32),
                scale * jax.random.normal(kb, (1, out_c), jnp.float32))

    params = {}
    for name, din in (('face_proj', 512), ('body_proj', 512), ('voice_proj', 1024)):
        w, b = lin(256, din)
        params[name] = (w.astype(jnp.bfloat16), b,               # bf16 once, at prep
                        jnp.ones((1, 256), jnp.float32),
                        jnp.zeros((1, 256), jnp.float32))

    gens = []
    for _ in range(num_generations):
        gp = {}
        w, b = lin(1, 2 * N); gp['w_alpha'] = w; gp['b_alpha'] = b.reshape(1, 1)
        w, b = lin(N, 2 * N); gp['w_p2d'] = w; gp['b_p2d'] = b
        w, b = lin(2 * N, N); gp['w1'] = w; gp['b1'] = b
        gp['prelu'] = jnp.full((1, 1), 0.25, jnp.float32)   # nn.PReLU default
        w, b = lin(1, 2 * N); gp['w2'] = w; gp['b2'] = b.reshape(1, 1)
        wr, br, wf, bf, wb, bb = [], [], [], [], [], []
        for _i in range(3):
            w, b = lin(256, 256); wr.append(w); br.append(b[0])
            w, b = lin(256, 256); wf.append(w); bf.append(b[0])
            w, b = lin(1, 3 * 256); wb.append(w); bb.append(b[0])
        gp['wr'] = jnp.stack(wr).astype(jnp.bfloat16)
        gp['br'] = jnp.stack(br)
        gp['wf'] = jnp.stack(wf).astype(jnp.bfloat16)
        gp['bf'] = jnp.stack(bf)
        gp['wb'] = jnp.stack(wb); gp['bb'] = jnp.stack(bb)
        gp['gln'] = jnp.ones((3, 256), jnp.float32)
        gp['bln'] = jnp.zeros((3, 256), jnp.float32)
        gens.append(gp)
    params['gen'] = gens
    return params


# ---------------------------------------------------------------------------
# Full MAGNET forward
# ---------------------------------------------------------------------------
def magnet_forward(params, face, body, voice, distribution_node, modal_id,
                   associated_matrix, num_generations, loss_indicator):
    B, nf, _ = face.shape
    _, nb, _ = body.shape
    _, nv, _ = voice.shape
    NF = 256
    N = nf + nb + nv

    face_p, body_p, voice_p = project_all(
        face.reshape(B * nf, -1), body.reshape(B * nb, -1), voice.reshape(B * nv, -1),
        params['face_proj'], params['body_proj'], params['voice_proj'])
    feature_node = jnp.concatenate(
        [face_p.reshape(B, nf, NF), body_p.reshape(B, nb, NF),
         voice_p.reshape(B, nv, NF)], axis=1)

    # Modality masks / per-row parameter tables from modal_id[0] (as in torch).
    mid = modal_id[0]
    same_modal = (mid[:, None] == mid[None, :]).astype(jnp.float32)          # (N, N)
    rmask = jnp.stack([(mid == i).astype(jnp.float32)[:, None]
                       for i in range(3)])                                   # (3, N, 1)
    # Pairwise selectors for DistributionSimilarity (built once, VMEM-resident).
    ridx = jnp.arange(N * N)
    cidx = jnp.arange(N)
    rep_sel = (ridx[:, None] // N == cidx[None, :]).astype(jnp.float32)
    tile_sel = (ridx[:, None] % N == cidx[None, :]).astype(jnp.float32)
    pair_sel = jnp.stack([rep_sel, tile_sel])                                # (2, N*N, N)

    kp = prepare_gen_params(params['gen'], mid, N, NF)

    node_sims, dist_sims = run_generations(
        feature_node, distribution_node, associated_matrix, same_modal, rmask,
        pair_sel, kp)

    feature_similarities = [node_sims[:, l] * loss_indicator[0]
                            for l in range(num_generations)]
    distribution_similarities = [dist_sims[:, l] * loss_indicator[1]
                                 for l in range(num_generations)]
    return feature_similarities, distribution_similarities


if __name__ == "__main__":
    key = jax.random.PRNGKey(0)
    B, num_face, num_body, num_voice = 2, 4, 4, 8
    N = num_face + num_body + num_voice          # num_sample == total nodes
    num_generations = 2
    loss_indicator = (1.0, 1.0)

    kf, kb, kv, kd, ka, kprm = jax.random.split(key, 6)
    face = jax.random.normal(kf, (B, num_face, 512), jnp.float32)
    body = jax.random.normal(kb, (B, num_body, 512), jnp.float32)
    voice = jax.random.normal(kv, (B, num_voice, 1024), jnp.float32)
    distribution_node = jax.random.uniform(kd, (B, N, N), jnp.float32)
    associated_matrix = (jax.random.uniform(ka, (B, N, N)) > 0.5).astype(jnp.float32)
    modal_id = jnp.concatenate(
        [jnp.zeros((B, num_face), jnp.int32),
         jnp.ones((B, num_body), jnp.int32),
         jnp.full((B, num_voice), 2, jnp.int32)], axis=1)

    params = init_params(kprm, N, num_generations)

    fwd = jax.jit(magnet_forward, static_argnums=(7, 8))
    feature_sims, dist_sims = fwd(
        params, face, body, voice, distribution_node, modal_id,
        associated_matrix, num_generations, loss_indicator)
    jax.block_until_ready((feature_sims, dist_sims))

    assert len(feature_sims) == num_generations and len(dist_sims) == num_generations
    assert all(f.shape == (B, N, N) for f in feature_sims)
    assert all(d.shape == (B, N, N) for d in dist_sims)
    assert all(bool(jnp.isfinite(t).all()) for t in feature_sims + dist_sims)
    print("KERNEL_OK")
</pallas_src>

<mosaic_0001>
module attributes {stable_mosaic.version = 11 : i64} {
  func.func @_projection_kernel(%arg0: i32, %arg1: memref<8x512xf32, #tpu.memory_space<vmem>>, %arg2: memref<8x512xf32, #tpu.memory_space<vmem>>, %arg3: memref<16x1024xf32, #tpu.memory_space<vmem>>, %arg4: memref<256x512xbf16, #tpu.memory_space<vmem>>, %arg5: memref<1x256xf32, #tpu.memory_space<vmem>>, %arg6: memref<1x256xf32, #tpu.memory_space<vmem>>, %arg7: memref<1x256xf32, #tpu.memory_space<vmem>>, %arg8: memref<256x512xbf16, #tpu.memory_space<vmem>>, %arg9: memref<1x256xf32, #tpu.memory_space<vmem>>, %arg10: memref<1x256xf32, #tpu.memory_space<vmem>>, %arg11: memref<1x256xf32, #tpu.memory_space<vmem>>, %arg12: memref<256x1024xbf16, #tpu.memory_space<vmem>>, %arg13: memref<1x256xf32, #tpu.memory_space<vmem>>, %arg14: memref<1x256xf32, #tpu.memory_space<vmem>>, %arg15: memref<1x256xf32, #tpu.memory_space<vmem>>, %arg16: memref<8x256xf32, #tpu.memory_space<vmem>>, %arg17: memref<8x256xf32, #tpu.memory_space<vmem>>, %arg18: memref<16x256xf32, #tpu.memory_space<vmem>>) attributes {dimension_semantics = [#tpu.dimension_semantics<arbitrary>], iteration_bounds = array<i64: 1>, scalar_prefetch = 0 : i64, scratch_operands = 0 : i64, tpu.core_type = #tpu.core_type<tc>, window_params = [{pipeline_mode = #tpu.pipeline_mode<synchronous>, transform_indices = @transform_0, window_bounds = array<i64: 8, 512>}, {pipeline_mode = #tpu.pipeline_mode<synchronous>, transform_indices = @transform_1, window_bounds = array<i64: 8, 512>}, {pipeline_mode = #tpu.pipeline_mode<synchronous>, transform_indices = @transform_2, window_bounds = array<i64: 16, 1024>}, {pipeline_mode = #tpu.pipeline_mode<synchronous>, transform_indices = @transform_3, window_bounds = array<i64: 256, 512>}, {pipeline_mode = #tpu.pipeline_mode<synchronous>, transform_indices = @transform_4, window_bounds = array<i64: 1, 256>}, {pipeline_mode = #tpu.pipeline_mode<synchronous>, transform_indices = @transform_5, window_bounds = array<i64: 1, 256>}, {pipeline_mode = #tpu.pipeline_mode<synchronous>, transform_indices = @transform_6, window_bounds = array<i64: 1, 256>}, {pipeline_mode = #tpu.pipeline_mode<synchronous>, transform_indices = @transform_7, window_bounds = array<i64: 256, 512>}, {pipeline_mode = #tpu.pipeline_mode<synchronous>, transform_indices = @transform_8, window_bounds = array<i64: 1, 256>}, {pipeline_mode = #tpu.pipeline_mode<synchronous>, transform_indices = @transform_9, window_bounds = array<i64: 1, 256>}, {pipeline_mode = #tpu.pipeline_mode<synchronous>, transform_indices = @transform_10, window_bounds = array<i64: 1, 256>}, {pipeline_mode = #tpu.pipeline_mode<synchronous>, transform_indices = @transform_11, window_bounds = array<i64: 256, 1024>}, {pipeline_mode = #tpu.pipeline_mode<synchronous>, transform_indices = @transform_12, window_bounds = array<i64: 1, 256>}, {pipeline_mode = #tpu.pipeline_mode<synchronous>, transform_indices = @transform_13, window_bounds = array<i64: 1, 256>}, {pipeline_mode = #tpu.pipeline_mode<synchronous>, transform_indices = @transform_14, window_bounds = array<i64: 1, 256>}, {pipeline_mode = #tpu.pipeline_mode<synchronous>, transform_indices = @transform_15, window_bounds = array<i64: 8, 256>}, {pipeline_mode = #tpu.pipeline_mode<synchronous>, transform_indices = @transform_16, window_bounds = array<i64: 8, 256>}, {pipeline_mode = #tpu.pipeline_mode<synchronous>, transform_indices = @transform_17, window_bounds = array<i64: 16, 256>}]} {
    %c0 = arith.constant 0 : index
    %c0_0 = arith.constant 0 : index
    %0 = vector.load %arg1[%c0, %c0_0] : memref<8x512xf32, #tpu.memory_space<vmem>>, vector<8x512xf32>
    %1 = arith.truncf %0 : vector<8x512xf32> to vector<8x512xbf16>
    %c0_1 = arith.constant 0 : index
    %c0_2 = arith.constant 0 : index
    %2 = vector.load %arg4[%c0_1, %c0_2] : memref<256x512xbf16, #tpu.memory_space<vmem>>, vector<256x512xbf16>
    %cst = arith.constant dense<0.000000e+00> : vector<8x256xf32>
    %3 = tpu.matmul %1, %2, %cst {dimension_numbers = #tpu.dot_dimension_numbers<[1], [1], [0], [0], [0, 0, 1, 0], [], []>} : vector<8x512xbf16>, vector<256x512xbf16>, vector<8x256xf32> -> vector<8x256xf32>
    %c0_3 = arith.constant 0 : index
    %c0_4 = arith.constant 0 : index
    %4 = vector.load %arg5[%c0_3, %c0_4] : memref<1x256xf32, #tpu.memory_space<vmem>>, vector<1x256xf32>
    %5 = vector.broadcast %4 : vector<1x256xf32> to vector<8x256xf32>
    %6 = arith.addf %3, %5 : vector<8x256xf32>
    %cst_5 = arith.constant dense<0.000000e+00> : vector<8xf32>
    %7 = vector.multi_reduction <add>, %6, %cst_5 [1] : vector<8x256xf32> to vector<8xf32>
    %8 = vector.shape_cast %7 : vector<8xf32> to vector<8x1xf32>
    %cst_6 = arith.constant 2.560000e+02 : f32
    %9 = vector.broadcast %cst_6 : f32 to vector<8x1xf32>
    %10 = arith.divf %8, %9 : vector<8x1xf32>
    %11 = vector.broadcast %10 : vector<8x1xf32> to vector<8x256xf32>
    %12 = arith.subf %6, %11 : vector<8x256xf32>
    %13 = arith.mulf %12, %12 : vector<8x256xf32>
    %cst_7 = arith.constant dense<0.000000e+00> : vector<8xf32>
    %14 = vector.multi_reduction <add>, %13, %cst_7 [1] : vector<8x256xf32> to vector<8xf32>
    %15 = vector.shape_cast %14 : vector<8xf32> to vector<8x1xf32>
    %cst_8 = arith.constant 2.560000e+02 : f32
    %16 = vector.broadcast %cst_8 : f32 to vector<8x1xf32>
    %17 = arith.divf %15, %16 : vector<8x1xf32>
    %18 = vector.broadcast %10 : vector<8x1xf32> to vector<8x256xf32>
    %19 = arith.subf %6, %18 : vector<8x256xf32>
    %cst_9 = arith.constant 9.99999974E-6 : f32
    %20 = vector.broadcast %cst_9 : f32 to vector<8x1xf32>
    %21 = arith.addf %17, %20 : vector<8x1xf32>
    %22 = math.rsqrt %21 : vector<8x1xf32>
    %23 = vector.broadcast %22 : vector<8x1xf32> to vector<8x256xf32>
    %24 = arith.mulf %19, %23 : vector<8x256xf32>
    %c0_10 = arith.constant 0 : index
    %c0_11 = arith.constant 0 : index
    %25 = vector.load %arg6[%c0_10, %c0_11] : memref<1x256xf32, #tpu.memory_space<vmem>>, vector<1x256xf32>
    %26 = vector.broadcast %25 : vector<1x256xf32> to vector<8x256xf32>
    %27 = arith.mulf %24, %26 : vector<8x256xf32>
    %c0_12 = arith.constant 0 : index
    %c0_13 = arith.constant 0 : index
    %28 = vector.load %arg7[%c0_12, %c0_13] : memref<1x256xf32, #tpu.memory_space<vmem>>, vector<1x256xf32>
    %29 = vector.broadcast %28 : vector<1x256xf32> to vector<8x256xf32>
    %30 = arith.addf %27, %29 : vector<8x256xf32>
    %cst_14 = arith.constant 0.000000e+00 : f32
    %31 = vector.broadcast %cst_14 : f32 to vector<8x256xf32>
    %32 = arith.maximumf %30, %31 : vector<8x256xf32>
    %c0_15 = arith.constant 0 : index
    %c0_16 = arith.constant 0 : index
    %33 = vector.load %arg16[%c0_15, %c0_16] : memref<8x256xf32, #tpu.memory_space<vmem>>, vector<8x256xf32>
    tpu.vector_store %arg16[%c0_15, %c0_16], %32 {strides = array<i32>} : memref<8x256xf32, #tpu.memory_space<vmem>>, vector<8x256xf32>,
    %c0_17 = arith.constant 0 : index
    %c0_18 = arith.constant 0 : index
    %34 = vector.load %arg2[%c0_17, %c0_18] : memref<8x512xf32, #tpu.memory_space<vmem>>, vector<8x512xf32>
    %35 = arith.truncf %34 : vector<8x512xf32> to vector<8x512xbf16>
    %c0_19 = arith.constant 0 : index
    %c0_20 = arith.constant 0 : index
    %36 = vector.load %arg8[%c0_19, %c0_20] : memref<256x512xbf16, #tpu.memory_space<vmem>>, vector<256x512xbf16>
    %cst_21 = arith.constant dense<0.000000e+00> : vector<8x256xf32>
    %37 = tpu.matmul %35, %36, %cst_21 {dimension_numbers = #tpu.dot_dimension_numbers<[1], [1], [0], [0], [0, 0, 1, 0], [], []>} : vector<8x512xbf16>, vector<256x512xbf16>, vector<8x256xf32> -> vector<8x256xf32>
    %c0_22 = arith.constant 0 : index
    %c0_23 = arith.constant 0 : index
    %38 = vector.load %arg9[%c0_22, %c0_23] : memref<1x256xf32, #tpu.memory_space<vmem>>, vector<1x256xf32>
    %39 = vector.broadcast %38 : vector<1x256xf32> to vector<8x256xf32>
    %40 = arith.addf %37, %39 : vector<8x256xf32>
    %cst_24 = arith.constant dense<0.000000e+00> : vector<8xf32>
    %41 = vector.multi_reduction <add>, %40, %cst_24 [1] : vector<8x256xf32> to vector<8xf32>
    %42 = vector.shape_cast %41 : vector<8xf32> to vector<8x1xf32>
    %cst_25 = arith.constant 2.560000e+02 : f32
    %43 = vector.broadcast %cst_25 : f32 to vector<8x1xf32>
    %44 = arith.divf %42, %43 : vector<8x1xf32>
    %45 = vector.broadcast %44 : vector<8x1xf32> to vector<8x256xf32>
    %46 = arith.subf %40, %45 : vector<8x256xf32>
    %47 = arith.mulf %46, %46 : vector<8x256xf32>
    %cst_26 = arith.constant dense<0.000000e+00> : vector<8xf32>
    %48 = vector.multi_reduction <add>, %47, %cst_26 [1] : vector<8x256xf32> to vector<8xf32>
    %49 = vector.shape_cast %48 : vector<8xf32> to vector<8x1xf32>
    %cst_27 = arith.constant 2.560000e+02 : f32
    %50 = vector.broadcast %cst_27 : f32 to vector<8x1xf32>
    %51 = arith.divf %49, %50 : vector<8x1xf32>
    %52 = vector.broadcast %44 : vector<8x1xf32> to vector<8x256xf32>
    %53 = arith.subf %40, %52 : vector<8x256xf32>
    %cst_28 = arith.constant 9.99999974E-6 : f32
    %54 = vector.broadcast %cst_28 : f32 to vector<8x1xf32>
    %55 = arith.addf %51, %54 : vector<8x1xf32>
    %56 = math.rsqrt %55 : vector<8x1xf32>
    %57 = vector.broadcast %56 : vector<8x1xf32> to vector<8x256xf32>
    %58 = arith.mulf %53, %57 : vector<8x256xf32>
    %c0_29 = arith.constant 0 : index
    %c0_30 = arith.constant 0 : index
    %59 = vector.load %arg10[%c0_29, %c0_30] : memref<1x256xf32, #tpu.memory_space<vmem>>, vector<1x256xf32>
    %60 = vector.broadcast %59 : vector<1x256xf32> to vector<8x256xf32>
    %61 = arith.mulf %58, %60 : vector<8x256xf32>
    %c0_31 = arith.constant 0 : index
    %c0_32 = arith.constant 0 : index
    %62 = vector.load %arg11[%c0_31, %c0_32] : memref<1x256xf32, #tpu.memory_space<vmem>>, vector<1x256xf32>
    %63 = vector.broadcast %62 : vector<1x256xf32> to vector<8x256xf32>
    %64 = arith.addf %61, %63 : vector<8x256xf32>
    %cst_33 = arith.constant 0.000000e+00 : f32
    %65 = vector.broadcast %cst_33 : f32 to vector<8x256xf32>
    %66 = arith.maximumf %64, %65 : vector<8x256xf32>
    %c0_34 = arith.constant 0 : index
    %c0_35 = arith.constant 0 : index
    %67 = vector.load %arg17[%c0_34, %c0_35] : memref<8x256xf32, #tpu.memory_space<vmem>>, vector<8x256xf32>
    tpu.vector_store %arg17[%c0_34, %c0_35], %66 {strides = array<i32>} : memref<8x256xf32, #tpu.memory_space<vmem>>, vector<8x256xf32>,
    %c0_36 = arith.constant 0 : index
    %c0_37 = arith.constant 0 : index
    %68 = vector.load %arg3[%c0_36, %c0_37] : memref<16x1024xf32, #tpu.memory_space<vmem>>, vector<16x1024xf32>
    %69 = arith.truncf %68 : vector<16x1024xf32> to vector<16x1024xbf16>
    %c0_38 = arith.constant 0 : index
    %c0_39 = arith.constant 0 : index
    %70 = vector.load %arg12[%c0_38, %c0_39] : memref<256x1024xbf16, #tpu.memory_space<vmem>>, vector<256x1024xbf16>
    %cst_40 = arith.constant dense<0.000000e+00> : vector<16x256xf32>
    %71 = tpu.matmul %69, %70, %cst_40 {dimension_numbers = #tpu.dot_dimension_numbers<[1], [1], [0], [0], [0, 0, 1, 0], [], []>} : vector<16x1024xbf16>, vector<256x1024xbf16>, vector<16x256xf32> -> vector<16x256xf32>
    %c0_41 = arith.constant 0 : index
    %c0_42 = arith.constant 0 : index
    %72 = vector.load %arg13[%c0_41, %c0_42] : memref<1x256xf32, #tpu.memory_space<vmem>>, vector<1x256xf32>
    %73 = vector.broadcast %72 : vector<1x256xf32> to vector<16x256xf32>
    %74 = arith.addf %71, %73 : vector<16x256xf32>
    %cst_43 = arith.constant dense<0.000000e+00> : vector<16xf32>
    %75 = vector.multi_reduction <add>, %74, %cst_43 [1] : vector<16x256xf32> to vector<16xf32>
    %76 = vector.shape_cast %75 : vector<16xf32> to vector<16x1xf32>
    %cst_44 = arith.constant 2.560000e+02 : f32
    %77 = vector.broadcast %cst_44 : f32 to vector<16x1xf32>
    %78 = arith.divf %76, %77 : vector<16x1xf32>
    %79 = vector.broadcast %78 : vector<16x1xf32> to vector<16x256xf32>
    %80 = arith.subf %74, %79 : vector<16x256xf32>
    %81 = arith.mulf %80, %80 : vector<16x256xf32>
    %cst_45 = arith.constant dense<0.000000e+00> : vector<16xf32>
    %82 = vector.multi_reduction <add>, %81, %cst_45 [1] : vector<16x256xf32> to vector<16xf32>
    %83 = vector.shape_cast %82 : vector<16xf32> to vector<16x1xf32>
    %cst_46 = arith.constant 2.560000e+02 : f32
    %84 = vector.broadcast %cst_46 : f32 to vector<16x1xf32>
    %85 = arith.divf %83, %84 : vector<16x1xf32>
    %86 = vector.broadcast %78 : vector<16x1xf32> to vector<16x256xf32>
    %87 = arith.subf %74, %86 : vector<16x256xf32>
    %cst_47 = arith.constant 9.99999974E-6 : f32
    %88 = vector.broadcast %cst_47 : f32 to vector<16x1xf32>
    %89 = arith.addf %85, %88 : vector<16x1xf32>
    %90 = math.rsqrt %89 : vector<16x1xf32>
    %91 = vector.broadcast %90 : vector<16x1xf32> to vector<16x256xf32>
    %92 = arith.mulf %87, %91 : vector<16x256xf32>
    %c0_48 = arith.constant 0 : index
    %c0_49 = arith.constant 0 : index
    %93 = vector.load %arg14[%c0_48, %c0_49] : memref<1x256xf32, #tpu.memory_space<vmem>>, vector<1x256xf32>
    %94 = vector.broadcast %93 : vector<1x256xf32> to vector<16x256xf32>
    %95 = arith.mulf %92, %94 : vector<16x256xf32>
    %c0_50 = arith.constant 0 : index
    %c0_51 = arith.constant 0 : index
    %96 = vector.load %arg15[%c0_50, %c0_51] : memref<1x256xf32, #tpu.memory_space<vmem>>, vector<1x256xf32>
    %97 = vector.broadcast %96 : vector<1x256xf32> to vector<16x256xf32>
    %98 = arith.addf %95, %97 : vector<16x256xf32>
    %cst_52 = arith.constant 0.000000e+00 : f32
    %99 = vector.broadcast %cst_52 : f32 to vector<16x256xf32>
    %100 = arith.maximumf %98, %99 : vector<16x256xf32>
    %c0_53 = arith.constant 0 : index
    %c0_54 = arith.constant 0 : index
    %101 = vector.load %arg18[%c0_53, %c0_54] : memref<16x256xf32, #tpu.memory_space<vmem>>, vector<16x256xf32>
    tpu.vector_store %arg18[%c0_53, %c0_54], %100 {strides = array<i32>} : memref<16x256xf32, #tpu.memory_space<vmem>>, vector<16x256xf32>,
    return
  }
  func.func @transform_0(%arg0: i32) -> (i32, i32) {
    %c0_i32 = arith.constant 0 : i32
    %c0_i32_0 = arith.constant 0 : i32
    %c0_i32_1 = arith.constant 0 : i32
    return %c0_i32, %c0_i32_0 : i32, i32
  }
  func.func @transform_1(%arg0: i32) -> (i32, i32) {
    %c0_i32 = arith.constant 0 : i32
    %c0_i32_0 = arith.constant 0 : i32
    %c0_i32_1 = arith.constant 0 : i32
    return %c0_i32, %c0_i32_0 : i32, i32
  }
  func.func @transform_2(%arg0: i32) -> (i32, i32) {
    %c0_i32 = arith.constant 0 : i32
    %c0_i32_0 = arith.constant 0 : i32
    %c0_i32_1 = arith.constant 0 : i32
    return %c0_i32, %c0_i32_0 : i32, i32
  }
  func.func @transform_3(%arg0: i32) -> (i32, i32) {
    %c0_i32 = arith.constant 0 : i32
    %c0_i32_0 = arith.constant 0 : i32
    %c0_i32_1 = arith.constant 0 : i32
    return %c0_i32, %c0_i32_0 : i32, i32
  }
  func.func @transform_4(%arg0: i32) -> (i32, i32) {
    %c0_i32 = arith.constant 0 : i32
    %c0_i32_0 = arith.constant 0 : i32
    %c0_i32_1 = arith.constant 0 : i32
    return %c0_i32, %c0_i32_0 : i32, i32
  }
  func.func @transform_5(%arg0: i32) -> (i32, i32) {
    %c0_i32 = arith.constant 0 : i32
    %c0_i32_0 = arith.constant 0 : i32
    %c0_i32_1 = arith.constant 0 : i32
    return %c0_i32, %c0_i32_0 : i32, i32
  }
  func.func @transform_6(%arg0: i32) -> (i32, i32) {
    %c0_i32 = arith.constant 0 : i32
    %c0_i32_0 = arith.constant 0 : i32
    %c0_i32_1 = arith.constant 0 : i32
    return %c0_i32, %c0_i32_0 : i32, i32
  }
  func.func @transform_7(%arg0: i32) -> (i32, i32) {
    %c0_i32 = arith.constant 0 : i32
    %c0_i32_0 = arith.constant 0 : i32
    %c0_i32_1 = arith.constant 0 : i32
    return %c0_i32, %c0_i32_0 : i32, i32
  }
  func.func @transform_8(%arg0: i32) -> (i32, i32) {
    %c0_i32 = arith.constant 0 : i32
    %c0_i32_0 = arith.constant 0 : i32
    %c0_i32_1 = arith.constant 0 : i32
    return %c0_i32, %c0_i32_0 : i32, i32
  }
  func.func @transform_9(%arg0: i32) -> (i32, i32) {
    %c0_i32 = arith.constant 0 : i32
    %c0_i32_0 = arith.constant 0 : i32
    %c0_i32_1 = arith.constant 0 : i32
    return %c0_i32, %c0_i32_0 : i32, i32
  }
  func.func @transform_10(%arg0: i32) -> (i32, i32) {
    %c0_i32 = arith.constant 0 : i32
    %c0_i32_0 = arith.constant 0 : i32
    %c0_i32_1 = arith.constant 0 : i32
    return %c0_i32, %c0_i32_0 : i32, i32
  }
  func.func @transform_11(%arg0: i32) -> (i32, i32) {
    %c0_i32 = arith.constant 0 : i32
    %c0_i32_0 = arith.constant 0 : i32
    %c0_i32_1 = arith.constant 0 : i32
    return %c0_i32, %c0_i32_0 : i32, i32
  }
  func.func @transform_12(%arg0: i32) -> (i32, i32) {
    %c0_i32 = arith.constant 0 : i32
    %c0_i32_0 = arith.constant 0 : i32
    %c0_i32_1 = arith.constant 0 : i32
    return %c0_i32, %c0_i32_0 : i32, i32
  }
  func.func @transform_13(%arg0: i32) -> (i32, i32) {
    %c0_i32 = arith.constant 0 : i32
    %c0_i32_0 = arith.constant 0 : i32
    %c0_i32_1 = arith.constant 0 : i32
    return %c0_i32, %c0_i32_0 : i32, i32
  }
  func.func @transform_14(%arg0: i32) -> (i32, i32) {
    %c0_i32 = arith.constant 0 : i32
    %c0_i32_0 = arith.constant 0 : i32
    %c0_i32_1 = arith.constant 0 : i32
    return %c0_i32, %c0_i32_0 : i32, i32
  }
  func.func @transform_15(%arg0: i32) -> (i32, i32) {
    %c0_i32 = arith.constant 0 : i32
    %c0_i32_0 = arith.constant 0 : i32
    %c0_i32_1 = arith.constant 0 : i32
    return %c0_i32, %c0_i32_0 : i32, i32
  }
  func.func @transform_16(%arg0: i32) -> (i32, i32) {
    %c0_i32 = arith.constant 0 : i32
    %c0_i32_0 = arith.constant 0 : i32
    %c0_i32_1 = arith.constant 0 : i32
    return %c0_i32, %c0_i32_0 : i32, i32
  }
  func.func @transform_17(%arg0: i32) -> (i32, i32) {
    %c0_i32 = arith.constant 0 : i32
    %c0_i32_0 = arith.constant 0 : i32
    %c0_i32_1 = arith.constant 0 : i32
    return %c0_i32, %c0_i32_0 : i32, i32
  }
}

module attributes {stable_mosaic.version = 11 : i64} {
  func.func @kernel(%arg0: i32, %arg1: i32, %arg2: memref<1x16x256xf32, #tpu.memory_space<vmem>>, %arg3: memref<1x16x16xf32, #tpu.memory_space<vmem>>, %arg4: memref<1x16x16xf32, #tpu.memory_space<vmem>>, %arg5: memref<16x16xf32, #tpu.memory_space<vmem>>, %arg6: memref<3x16x1xf32, #tpu.memory_space<vmem>>, %arg7: memref<2x256x16xf32, #tpu.memory_space<vmem>>, %arg8: memref<2x3x1x16xf32, #tpu.memory_space<vmem>>, %arg9: memref<2x2x16x16xf32, #tpu.memory_space<vmem>>, %arg10: memref<2x32x16xf32, #tpu.memory_space<vmem>>, %arg11: memref<2x2x1x32xf32, #tpu.memory_space<vmem>>, %arg12: memref<2x3x1x1xf32, #tpu.memory_space<vmem>>, %arg13: memref<2x768x256xbf16, #tpu.memory_space<vmem>>, %arg14: memref<2x768x256xbf16, #tpu.memory_space<vmem>>, %arg15: memref<2x6x16x256xf32, #tpu.memory_space<vmem>>, %arg16: memref<2x16x1xf32, #tpu.memory_space<vmem>>, %arg17: memref<1x1x16x16xf32, #tpu.memory_space<vmem>>, %arg18: memref<1x1x16x16xf32, #tpu.memory_space<vmem>>, %arg19: memref<16x256xf32, #tpu.memory_space<vmem>>, %arg20: memref<16x16xf32, #tpu.memory_space<vmem>>) attributes {dimension_semantics = [#tpu.dimension_semantics<parallel>, #tpu.dimension_semantics<arbitrary>], iteration_bounds = array<i64: 2, 2>, scalar_prefetch = 0 : i64, scratch_operands = 2 : i64, tpu.core_type = #tpu.core_type<tc>, window_params = [{transform_indices = @transform_0, window_bounds = array<i64: 1, 16, 256>}, {transform_indices = @transform_1, window_bounds = array<i64: 1, 16, 16>}, {transform_indices = @transform_2, window_bounds = array<i64: 1, 16, 16>}, {pipeline_mode = #tpu.pipeline_mode<synchronous>, transform_indices = @transform_3, window_bounds = array<i64: 16, 16>}, {pipeline_mode = #tpu.pipeline_mode<synchronous>, transform_indices = @transform_4, window_bounds = array<i64: 3, 16, 1>}, {pipeline_mode = #tpu.pipeline_mode<synchronous>, transform_indices = @transform_5, window_bounds = array<i64: 2, 256, 16>}, {pipeline_mode = #tpu.pipeline_mode<synchronous>, transform_indices = @transform_6, window_bounds = array<i64: 2, 3, 1, 16>}, {pipeline_mode = #tpu.pipeline_mode<synchronous>, transform_indices = @transform_7, window_bounds = array<i64: 2, 2, 16, 16>}, {pipeline_mode = #tpu.pipeline_mode<synchronous>, transform_indices = @transform_8, window_bounds = array<i64: 2, 32, 16>}, {pipeline_mode = #tpu.pipeline_mode<synchronous>, transform_indices = @transform_9, window_bounds = array<i64: 2, 2, 1, 32>}, {pipeline_mode = #tpu.pipeline_mode<synchronous>, transform_indices = @transform_10, window_bounds = array<i64: 2, 3, 1, 1>}, {pipeline_mode = #tpu.pipeline_mode<synchronous>, transform_indices = @transform_11, window_bounds = array<i64: 2, 768, 256>}, {pipeline_mode = #tpu.pipeline_mode<synchronous>, transform_indices = @transform_12, window_bounds = array<i64: 2, 768, 256>}, {pipeline_mode = #tpu.pipeline_mode<synchronous>, transform_indices = @transform_13, window_bounds = array<i64: 2, 6, 16, 256>}, {pipeline_mode = #tpu.pipeline_mode<synchronous>, transform_indices = @transform_14, window_bounds = array<i64: 2, 16, 1>}, {transform_indices = @transform_15, window_bounds = array<i64: 1, 1, 16, 16>}, {transform_indices = @transform_16, window_bounds = array<i64: 1, 1, 16, 16>}]} {
    %c0_i32 = arith.constant 0 : i32
    %0 = arith.cmpi eq, %arg1, %c0_i32 : i32
    %1 = arith.extui %0 : i1 to i32
    %c0_i32_0 = arith.constant 0 : i32
    %2 = arith.cmpi ne, %1, %c0_i32_0 : i32
    scf.if %2 {
      %c0_133 = arith.constant 0 : index
      %c0_134 = arith.constant 0 : index
      %c0_135 = arith.constant 0 : index
      %276 = vector.load %arg2[%c0_133, %c0_134, %c0_135] : memref<1x16x256xf32, #tpu.memory_space<vmem>>, vector<1x16x256xf32>
      %277 = vector.shape_cast %276 : vector<1x16x256xf32> to vector<16x256xf32>
      %c0_136 = arith.constant 0 : index
      %c0_137 = arith.constant 0 : index
      %278 = vector.load %arg19[%c0_136, %c0_137] : memref<16x256xf32, #tpu.memory_space<vmem>>, vector<16x256xf32>
      tpu.vector_store %arg19[%c0_136, %c0_137], %277 {strides = array<i32>} : memref<16x256xf32, #tpu.memory_space<vmem>>, vector<16x256xf32>,
      %c0_138 = arith.constant 0 : index
      %c0_139 = arith.constant 0 : index
      %c0_140 = arith.constant 0 : index
      %279 = vector.load %arg3[%c0_138, %c0_139, %c0_140] : memref<1x16x16xf32, #tpu.memory_space<vmem>>, vector<1x16x16xf32>
      %280 = vector.shape_cast %279 : vector<1x16x16xf32> to vector<16x16xf32>
      %c0_141 = arith.constant 0 : index
      %c0_142 = arith.constant 0 : index
      %281 = vector.load %arg20[%c0_141, %c0_142] : memref<16x16xf32, #tpu.memory_space<vmem>>, vector<16x16xf32>
      tpu.vector_store %arg20[%c0_141, %c0_142], %280 {strides = array<i32>} : memref<16x16xf32, #tpu.memory_space<vmem>>, vector<16x16xf32>,
    } else {
    }
    %c0 = arith.constant 0 : index
    %c0_1 = arith.constant 0 : index
    %3 = vector.load %arg19[%c0, %c0_1] : memref<16x256xf32, #tpu.memory_space<vmem>>, vector<16x256xf32>
    %c0_2 = arith.constant 0 : index
    %c0_3 = arith.constant 0 : index
    %4 = vector.load %arg20[%c0_2, %c0_3] : memref<16x16xf32, #tpu.memory_space<vmem>>, vector<16x16xf32>
    %c0_4 = arith.constant 0 : index
    %c0_5 = arith.constant 0 : index
    %c0_6 = arith.constant 0 : index
    %5 = vector.load %arg4[%c0_4, %c0_5, %c0_6] : memref<1x16x16xf32, #tpu.memory_space<vmem>>, vector<1x16x16xf32>
    %6 = vector.shape_cast %5 : vector<1x16x16xf32> to vector<16x16xf32>
    %c0_7 = arith.constant 0 : index
    %c0_8 = arith.constant 0 : index
    %7 = vector.load %arg5[%c0_7, %c0_8] : memref<16x16xf32, #tpu.memory_space<vmem>>, vector<16x16xf32>
    %8 = tpu.iota {dimensions = array<i32: 0>} : vector<16x16xi32>
    %9 = tpu.iota {dimensions = array<i32: 1>} : vector<16x16xi32>
    %10 = arith.cmpi eq, %8, %9 : vector<16x16xi32>
    %11 = arith.extui %10 : vector<16x16xi1> to vector<16x16xi32>
    %12 = arith.sitofp %11 : vector<16x16xi32> to vector<16x16xf32>
    %13 = arith.mulf %3, %3 : vector<16x256xf32>
    %cst = arith.constant dense<0.000000e+00> : vector<16xf32>
    %14 = vector.multi_reduction <add>, %13, %cst [1] : vector<16x256xf32> to vector<16xf32>
    %15 = vector.shape_cast %14 : vector<16xf32> to vector<16x1xf32>
    %16 = math.sqrt %15 : vector<16x1xf32>
    %cst_9 = arith.constant 9.99999996E-13 : f32
    %17 = vector.broadcast %cst_9 : f32 to vector<16x1xf32>
    %18 = arith.maximumf %16, %17 : vector<16x1xf32>
    %19 = vector.broadcast %18 : vector<16x1xf32> to vector<16x256xf32>
    %20 = arith.divf %3, %19 : vector<16x256xf32>
    %cst_10 = arith.constant dense<0.000000e+00> : vector<16x16xf32>
    %21 = tpu.matmul %20, %20, %cst_10 {dimension_numbers = #tpu.dot_dimension_numbers<[1], [1], [0], [0], [0, 0, 1, 0], [], []>} : vector<16x256xf32>, vector<16x256xf32>, vector<16x16xf32> -> vector<16x16xf32>
    %cst_11 = arith.constant 9.99999974E-5 : f32
    %22 = vector.broadcast %cst_11 : f32 to vector<16x16xf32>
    %23 = arith.subf %21, %22 : vector<16x16xf32>
    %cst_12 = arith.constant 0.000000e+00 : f32
    %24 = vector.broadcast %cst_12 : f32 to vector<16x16xf32>
    %25 = arith.maximumf %23, %24 : vector<16x16xf32>
    %26 = arith.mulf %7, %25 : vector<16x16xf32>
    %c0_13 = arith.constant 0 : index
    %c0_14 = arith.constant 0 : index
    %c0_15 = arith.constant 0 : index
    %c0_16 = arith.constant 0 : index
    %27 = vector.load %arg17[%c0_13, %c0_14, %c0_15, %c0_16] : memref<1x1x16x16xf32, #tpu.memory_space<vmem>>, vector<1x1x16x16xf32>
    %28 = vector.shape_cast %27 : vector<1x1x16x16xf32> to vector<16x16xf32>
    %29 = vector.shape_cast %26 : vector<16x16xf32> to vector<1x1x16x16xf32>
    tpu.vector_store %arg17[%c0_13, %c0_14, %c0_15, %c0_16], %29 {strides = array<i32>} : memref<1x1x16x16xf32, #tpu.memory_space<vmem>>, vector<1x1x16x16xf32>,
    %cst_17 = arith.constant 0.000000e+00 : f32
    %30 = vector.broadcast %cst_17 : f32 to vector<16x16xf32>
    %31 = arith.cmpf ogt, %6, %30 : vector<16x16xf32>
    %cst_18 = arith.constant 1.000000e+00 : f32
    %32 = vector.broadcast %cst_18 : f32 to vector<16x16xf32>
    %33 = arith.select %31, %32, %6 : vector<16x16xi1>, vector<16x16xf32>
    %cst_19 = arith.constant dense<0.000000e+00> : vector<16xf32>
    %34 = vector.multi_reduction <add>, %26, %cst_19 [1] : vector<16x16xf32> to vector<16xf32>
    %35 = vector.shape_cast %34 : vector<16xf32> to vector<16x1xf32>
    %cst_20 = arith.constant dense<0.000000e+00> : vector<16xf32>
    %36 = vector.multi_reduction <add>, %26, %cst_20 [0] : vector<16x16xf32> to vector<16xf32>
    %37 = vector.shape_cast %36 : vector<16xf32> to vector<1x16xf32>
    %cst_21 = arith.constant 9.99999996E-13 : f32
    %38 = vector.broadcast %cst_21 : f32 to vector<16x1xf32>
    %39 = arith.maximumf %35, %38 : vector<16x1xf32>
    %40 = math.rsqrt %39 : vector<16x1xf32>
    %41 = vector.broadcast %40 : vector<16x1xf32> to vector<16x16xf32>
    %42 = arith.mulf %26, %41 : vector<16x16xf32>
    %cst_22 = arith.constant 9.99999996E-13 : f32
    %43 = vector.broadcast %cst_22 : f32 to vector<1x16xf32>
    %44 = arith.maximumf %37, %43 : vector<1x16xf32>
    %45 = math.rsqrt %44 : vector<1x16xf32>
    %46 = vector.broadcast %45 : vector<1x16xf32> to vector<16x16xf32>
    %47 = arith.mulf %42, %46 : vector<16x16xf32>
    %cst_23 = arith.constant dense<0.000000e+00> : vector<16x16xf32>
    %48 = tpu.matmul %47, %33, %cst_23 {dimension_numbers = #tpu.dot_dimension_numbers<[1], [0], [0], [1], [0, 0, 1, 1], [], []>} : vector<16x16xf32>, vector<16x16xf32>, vector<16x16xf32> -> vector<16x16xf32>
    %cst_24 = arith.constant dense<0.000000e+00> : vector<16x16xf32>
    %49 = tpu.matmul %48, %47, %cst_24 {dimension_numbers = #tpu.dot_dimension_numbers<[1], [1], [0], [0], [0, 0, 1, 0], [], []>} : vector<16x16xf32>, vector<16x16xf32>, vector<16x16xf32> -> vector<16x16xf32>
    %50 = arith.index_cast %arg1 : i32 to index
    %c0_25 = arith.constant 0 : index
    %c0_26 = arith.constant 0 : index
    %c0_27 = arith.constant 0 : index
    %51 = vector.load %arg8[%50, %c0_25, %c0_26, %c0_27] : memref<2x3x1x16xf32, #tpu.memory_space<vmem>>, vector<1x1x1x16xf32>
    %52 = vector.shape_cast %51 : vector<1x1x1x16xf32> to vector<1x16xf32>
    %cst_28 = arith.constant dense<0.000000e+00> : vector<16x1xf32>
    %53 = tpu.matmul %26, %52, %cst_28 {dimension_numbers = #tpu.dot_dimension_numbers<[1], [1], [0], [0], [0, 0, 1, 0], [], []>} : vector<16x16xf32>, vector<1x16xf32>, vector<16x1xf32> -> vector<16x1xf32>
    %54 = arith.index_cast %arg1 : i32 to index
    %c1 = arith.constant 1 : index
    %c0_29 = arith.constant 0 : index
    %c0_30 = arith.constant 0 : index
    %55 = vector.load %arg8[%54, %c1, %c0_29, %c0_30] : memref<2x3x1x16xf32, #tpu.memory_space<vmem>>, vector<1x1x1x16xf32>
    %56 = vector.shape_cast %55 : vector<1x1x1x16xf32> to vector<1x16xf32>
    %cst_31 = arith.constant dense<0.000000e+00> : vector<16x1xf32>
    %57 = tpu.matmul %49, %56, %cst_31 {dimension_numbers = #tpu.dot_dimension_numbers<[1], [1], [0], [0], [0, 0, 1, 0], [], []>} : vector<16x16xf32>, vector<1x16xf32>, vector<16x1xf32> -> vector<16x1xf32>
    %58 = arith.addf %53, %57 : vector<16x1xf32>
    %59 = arith.index_cast %arg1 : i32 to index
    %c0_32 = arith.constant 0 : index
    %c0_33 = arith.constant 0 : index
    %c0_34 = arith.constant 0 : index
    %60 = vector.load %arg12[%59, %c0_32, %c0_33, %c0_34] : memref<2x3x1x1xf32, #tpu.memory_space<vmem>>, vector<1x1x1x1xf32>
    %61 = vector.shape_cast %60 : vector<1x1x1x1xf32> to vector<1x1xf32>
    %62 = vector.broadcast %61 : vector<1x1xf32> to vector<16x1xf32>
    %63 = arith.addf %58, %62 : vector<16x1xf32>
    %64 = arith.negf %63 : vector<16x1xf32>
    %65 = math.exp %64 : vector<16x1xf32>
    %cst_35 = arith.constant 1.000000e+00 : f32
    %66 = vector.broadcast %cst_35 : f32 to vector<16x1xf32>
    %67 = arith.addf %66, %65 : vector<16x1xf32>
    %68 = arith.divf %66, %67 : vector<16x1xf32>
    %69 = vector.broadcast %68 : vector<16x1xf32> to vector<16x16xf32>
    %70 = arith.mulf %69, %49 : vector<16x16xf32>
    %cst_36 = arith.constant 1.000000e+00 : f32
    %71 = vector.broadcast %cst_36 : f32 to vector<16x1xf32>
    %72 = arith.subf %71, %68 : vector<16x1xf32>
    %73 = vector.broadcast %72 : vector<16x1xf32> to vector<16x16xf32>
    %74 = arith.mulf %73, %26 : vector<16x16xf32>
    %75 = arith.addf %70, %74 : vector<16x16xf32>
    %76 = arith.index_cast %arg1 : i32 to index
    %c0_37 = arith.constant 0 : index
    %c0_38 = arith.constant 0 : index
    %c0_39 = arith.constant 0 : index
    %77 = vector.load %arg9[%76, %c0_37, %c0_38, %c0_39] : memref<2x2x16x16xf32, #tpu.memory_space<vmem>>, vector<1x1x16x16xf32>
    %78 = vector.shape_cast %77 : vector<1x1x16x16xf32> to vector<16x16xf32>
    %cst_40 = arith.constant dense<0.000000e+00> : vector<16x16xf32>
    %79 = tpu.matmul %75, %78, %cst_40 {dimension_numbers = #tpu.dot_dimension_numbers<[1], [1], [0], [0], [0, 0, 1, 0], [], []>} : vector<16x16xf32>, vector<16x16xf32>, vector<16x16xf32> -> vector<16x16xf32>
    %80 = arith.index_cast %arg1 : i32 to index
    %c1_41 = arith.constant 1 : index
    %c0_42 = arith.constant 0 : index
    %c0_43 = arith.constant 0 : index
    %81 = vector.load %arg9[%80, %c1_41, %c0_42, %c0_43] : memref<2x2x16x16xf32, #tpu.memory_space<vmem>>, vector<1x1x16x16xf32>
    %82 = vector.shape_cast %81 : vector<1x1x16x16xf32> to vector<16x16xf32>
    %cst_44 = arith.constant dense<0.000000e+00> : vector<16x16xf32>
    %83 = tpu.matmul %4, %82, %cst_44 {dimension_numbers = #tpu.dot_dimension_numbers<[1], [1], [0], [0], [0, 0, 1, 0], [], []>} : vector<16x16xf32>, vector<16x16xf32>, vector<16x16xf32> -> vector<16x16xf32>
    %84 = arith.addf %79, %83 : vector<16x16xf32>
    %85 = arith.index_cast %arg1 : i32 to index
    %c2 = arith.constant 2 : index
    %c0_45 = arith.constant 0 : index
    %c0_46 = arith.constant 0 : index
    %86 = vector.load %arg8[%85, %c2, %c0_45, %c0_46] : memref<2x3x1x16xf32, #tpu.memory_space<vmem>>, vector<1x1x1x16xf32>
    %87 = vector.shape_cast %86 : vector<1x1x1x16xf32> to vector<1x16xf32>
    %88 = vector.broadcast %87 : vector<1x16xf32> to vector<16x16xf32>
    %89 = arith.addf %84, %88 : vector<16x16xf32>
    %cst_47 = arith.constant 0.000000e+00 : f32
    %90 = vector.broadcast %cst_47 : f32 to vector<16x16xf32>
    %91 = arith.cmpf oge, %89, %90 : vector<16x16xf32>
    %cst_48 = arith.constant 0.00999999977 : f32
    %92 = vector.broadcast %cst_48 : f32 to vector<16x16xf32>
    %93 = arith.mulf %92, %89 : vector<16x16xf32>
    %94 = arith.select %91, %89, %93 : vector<16x16xi1>, vector<16x16xf32>
    %c0_49 = arith.constant 0 : index
    %c0_50 = arith.constant 0 : index
    %95 = vector.load %arg20[%c0_49, %c0_50] : memref<16x16xf32, #tpu.memory_space<vmem>>, vector<16x16xf32>
    tpu.vector_store %arg20[%c0_49, %c0_50], %94 {strides = array<i32>} : memref<16x16xf32, #tpu.memory_space<vmem>>, vector<16x16xf32>,
    %c0_51 = arith.constant 0 : index
    %c0_52 = arith.constant 0 : index
    %c0_53 = arith.constant 0 : index
    %96 = vector.load %arg7[%c0_51, %c0_52, %c0_53] : memref<2x256x16xf32, #tpu.memory_space<vmem>>, vector<1x256x16xf32>
    %97 = vector.shape_cast %96 : vector<1x256x16xf32> to vector<256x16xf32>
    %c1_54 = arith.constant 1 : index
    %c0_55 = arith.constant 0 : index
    %c0_56 = arith.constant 0 : index
    %98 = vector.load %arg7[%c1_54, %c0_55, %c0_56] : memref<2x256x16xf32, #tpu.memory_space<vmem>>, vector<1x256x16xf32>
    %99 = vector.shape_cast %98 : vector<1x256x16xf32> to vector<256x16xf32>
    %cst_57 = arith.constant dense<0.000000e+00> : vector<256x16xf32>
    %100 = tpu.matmul %97, %94, %cst_57 {dimension_numbers = #tpu.dot_dimension_numbers<[1], [0], [0], [1], [0, 0, 1, 1], [], []>} : vector<256x16xf32>, vector<16x16xf32>, vector<256x16xf32> -> vector<256x16xf32>
    %cst_58 = arith.constant dense<0.000000e+00> : vector<256x16xf32>
    %101 = tpu.matmul %99, %94, %cst_58 {dimension_numbers = #tpu.dot_dimension_numbers<[1], [0], [0], [1], [0, 0, 1, 1], [], []>} : vector<256x16xf32>, vector<16x16xf32>, vector<256x16xf32> -> vector<256x16xf32>
    %102 = arith.subf %100, %101 : vector<256x16xf32>
    %103 = math.absf %102 : vector<256x16xf32>
    %104 = arith.index_cast %arg1 : i32 to index
    %c0_59 = arith.constant 0 : index
    %c0_60 = arith.constant 0 : index
    %105 = vector.load %arg10[%104, %c0_59, %c0_60] : memref<2x32x16xf32, #tpu.memory_space<vmem>>, vector<1x32x16xf32>
    %106 = vector.shape_cast %105 : vector<1x32x16xf32> to vector<32x16xf32>
    %cst_61 = arith.constant dense<0.000000e+00> : vector<256x32xf32>
    %107 = tpu.matmul %103, %106, %cst_61 {dimension_numbers = #tpu.dot_dimension_numbers<[1], [1], [0], [0], [0, 0, 1, 0], [], []>} : vector<256x16xf32>, vector<32x16xf32>, vector<256x32xf32> -> vector<256x32xf32>
    %108 = arith.index_cast %arg1 : i32 to index
    %c0_62 = arith.constant 0 : index
    %c0_63 = arith.constant 0 : index
    %c0_64 = arith.constant 0 : index
    %109 = vector.load %arg11[%108, %c0_62, %c0_63, %c0_64] : memref<2x2x1x32xf32, #tpu.memory_space<vmem>>, vector<1x1x1x32xf32>
    %110 = vector.shape_cast %109 : vector<1x1x1x32xf32> to vector<1x32xf32>
    %111 = vector.broadcast %110 : vector<1x32xf32> to vector<256x32xf32>
    %112 = arith.addf %107, %111 : vector<256x32xf32>
    %cst_65 = arith.constant 0.000000e+00 : f32
    %113 = vector.broadcast %cst_65 : f32 to vector<256x32xf32>
    %114 = arith.cmpf oge, %112, %113 : vector<256x32xf32>
    %115 = arith.index_cast %arg1 : i32 to index
    %c2_66 = arith.constant 2 : index
    %c0_67 = arith.constant 0 : index
    %c0_68 = arith.constant 0 : index
    %116 = vector.load %arg12[%115, %c2_66, %c0_67, %c0_68] : memref<2x3x1x1xf32, #tpu.memory_space<vmem>>, vector<1x1x1x1xf32>
    %117 = vector.shape_cast %116 : vector<1x1x1x1xf32> to vector<1x1xf32>
    %118 = vector.broadcast %117 : vector<1x1xf32> to vector<256x32xf32>
    %119 = arith.mulf %118, %112 : vector<256x32xf32>
    %120 = arith.select %114, %112, %119 : vector<256x32xi1>, vector<256x32xf32>
    %121 = arith.index_cast %arg1 : i32 to index
    %c1_69 = arith.constant 1 : index
    %c0_70 = arith.constant 0 : index
    %c0_71 = arith.constant 0 : index
    %122 = vector.load %arg11[%121, %c1_69, %c0_70, %c0_71] : memref<2x2x1x32xf32, #tpu.memory_space<vmem>>, vector<1x1x1x32xf32>
    %123 = vector.shape_cast %122 : vector<1x1x1x32xf32> to vector<1x32xf32>
    %cst_72 = arith.constant dense<0.000000e+00> : vector<256x1xf32>
    %124 = tpu.matmul %120, %123, %cst_72 {dimension_numbers = #tpu.dot_dimension_numbers<[1], [1], [0], [0], [0, 0, 1, 0], [], []>} : vector<256x32xf32>, vector<1x32xf32>, vector<256x1xf32> -> vector<256x1xf32>
    %125 = tpu.iota {dimensions = array<i32: 0>} : vector<16x256xi32>
    %126 = tpu.iota {dimensions = array<i32: 1>} : vector<16x256xi32>
    %c16_i32 = arith.constant 16 : i32
    %127 = vector.broadcast %c16_i32 : i32 to vector<16x256xi32>
    %128 = arith.muli %125, %127 : vector<16x256xi32>
    %129 = arith.cmpi sge, %126, %128 : vector<16x256xi32>
    %c16_i32_73 = arith.constant 16 : i32
    %130 = vector.broadcast %c16_i32_73 : i32 to vector<16x256xi32>
    %131 = arith.addi %128, %130 : vector<16x256xi32>
    %132 = arith.cmpi slt, %126, %131 : vector<16x256xi32>
    %133 = arith.andi %129, %132 : vector<16x256xi1>
    %134 = arith.extui %133 : vector<16x256xi1> to vector<16x256xi32>
    %135 = arith.sitofp %134 : vector<16x256xi32> to vector<16x256xf32>
    %136 = vector.broadcast %124 : vector<256x1xf32> to vector<256x16xf32>
    %137 = arith.mulf %136, %99 : vector<256x16xf32>
    %cst_74 = arith.constant dense<0.000000e+00> : vector<16x16xf32>
    %138 = tpu.matmul %135, %137, %cst_74 {dimension_numbers = #tpu.dot_dimension_numbers<[1], [0], [0], [1], [0, 0, 1, 1], [], []>} : vector<16x256xf32>, vector<256x16xf32>, vector<16x16xf32> -> vector<16x16xf32>
    %139 = arith.index_cast %arg1 : i32 to index
    %c1_75 = arith.constant 1 : index
    %c0_76 = arith.constant 0 : index
    %c0_77 = arith.constant 0 : index
    %140 = vector.load %arg12[%139, %c1_75, %c0_76, %c0_77] : memref<2x3x1x1xf32, #tpu.memory_space<vmem>>, vector<1x1x1x1xf32>
    %141 = vector.shape_cast %140 : vector<1x1x1x1xf32> to vector<1x1xf32>
    %142 = vector.broadcast %141 : vector<1x1xf32> to vector<16x16xf32>
    %143 = arith.addf %138, %142 : vector<16x16xf32>
    %144 = arith.negf %143 : vector<16x16xf32>
    %145 = math.exp %144 : vector<16x16xf32>
    %cst_78 = arith.constant 1.000000e+00 : f32
    %146 = vector.broadcast %cst_78 : f32 to vector<16x16xf32>
    %147 = arith.addf %146, %145 : vector<16x16xf32>
    %148 = arith.divf %146, %147 : vector<16x16xf32>
    %c0_79 = arith.constant 0 : index
    %c0_80 = arith.constant 0 : index
    %c0_81 = arith.constant 0 : index
    %c0_82 = arith.constant 0 : index
    %149 = vector.load %arg18[%c0_79, %c0_80, %c0_81, %c0_82] : memref<1x1x16x16xf32, #tpu.memory_space<vmem>>, vector<1x1x16x16xf32>
    %150 = vector.shape_cast %149 : vector<1x1x16x16xf32> to vector<16x16xf32>
    %151 = vector.shape_cast %148 : vector<16x16xf32> to vector<1x1x16x16xf32>
    tpu.vector_store %arg18[%c0_79, %c0_80, %c0_81, %c0_82], %151 {strides = array<i32>} : memref<1x1x16x16xf32, #tpu.memory_space<vmem>>, vector<1x1x16x16xf32>,
    %cst_83 = arith.constant 1.000000e+00 : f32
    %152 = vector.broadcast %cst_83 : f32 to vector<16x16xf32>
    %153 = arith.subf %152, %12 : vector<16x16xf32>
    %154 = arith.mulf %148, %153 : vector<16x16xf32>
    %155 = arith.addf %154, %12 : vector<16x16xf32>
    %cst_84 = arith.constant 9.99999997E-7 : f32
    %156 = vector.broadcast %cst_84 : f32 to vector<16x16xf32>
    %157 = arith.addf %155, %156 : vector<16x16xf32>
    %cst_85 = arith.constant dense<0.000000e+00> : vector<16xf32>
    %158 = vector.multi_reduction <add>, %157, %cst_85 [1] : vector<16x16xf32> to vector<16xf32>
    %159 = vector.shape_cast %158 : vector<16xf32> to vector<16x1xf32>
    %160 = vector.broadcast %159 : vector<16x1xf32> to vector<16x16xf32>
    %161 = arith.divf %157, %160 : vector<16x16xf32>
    %162 = arith.mulf %161, %7 : vector<16x16xf32>
    %cst_86 = arith.constant 1.000000e+00 : f32
    %163 = vector.broadcast %cst_86 : f32 to vector<16x16xf32>
    %164 = arith.subf %163, %12 : vector<16x16xf32>
    %165 = arith.mulf %162, %164 : vector<16x16xf32>
    %166 = math.absf %165 : vector<16x16xf32>
    %cst_87 = arith.constant dense<0.000000e+00> : vector<16xf32>
    %167 = vector.multi_reduction <add>, %166, %cst_87 [1] : vector<16x16xf32> to vector<16xf32>
    %168 = vector.shape_cast %167 : vector<16xf32> to vector<16x1xf32>
    %cst_88 = arith.constant 9.99999996E-13 : f32
    %169 = vector.broadcast %cst_88 : f32 to vector<16x1xf32>
    %170 = arith.maximumf %168, %169 : vector<16x1xf32>
    %171 = vector.broadcast %170 : vector<16x1xf32> to vector<16x16xf32>
    %172 = arith.divf %165, %171 : vector<16x16xf32>
    %c0_89 = arith.constant 0 : index
    %c0_90 = arith.constant 0 : index
    %c0_91 = arith.constant 0 : index
    %173 = vector.load %arg6[%c0_89, %c0_90, %c0_91] : memref<3x16x1xf32, #tpu.memory_space<vmem>>, vector<1x16x1xf32>
    %174 = vector.shape_cast %173 : vector<1x16x1xf32> to vector<16x1xf32>
    %c1_92 = arith.constant 1 : index
    %c0_93 = arith.constant 0 : index
    %c0_94 = arith.constant 0 : index
    %175 = vector.load %arg6[%c1_92, %c0_93, %c0_94] : memref<3x16x1xf32, #tpu.memory_space<vmem>>, vector<1x16x1xf32>
    %176 = vector.shape_cast %175 : vector<1x16x1xf32> to vector<16x1xf32>
    %c2_95 = arith.constant 2 : index
    %c0_96 = arith.constant 0 : index
    %c0_97 = arith.constant 0 : index
    %177 = vector.load %arg6[%c2_95, %c0_96, %c0_97] : memref<3x16x1xf32, #tpu.memory_space<vmem>>, vector<1x16x1xf32>
    %178 = vector.shape_cast %177 : vector<1x16x1xf32> to vector<16x1xf32>
    %179 = arith.truncf %3 : vector<16x256xf32> to vector<16x256xbf16>
    %180 = arith.index_cast %arg1 : i32 to index
    %c0_98 = arith.constant 0 : index
    %c0_99 = arith.constant 0 : index
    %181 = vector.load %arg14[%180, %c0_98, %c0_99] : memref<2x768x256xbf16, #tpu.memory_space<vmem>>, vector<1x768x256xbf16>
    %182 = vector.shape_cast %181 : vector<1x768x256xbf16> to vector<768x256xbf16>
    %cst_100 = arith.constant dense<0.000000e+00> : vector<16x768xf32>
    %183 = tpu.matmul %179, %182, %cst_100 {dimension_numbers = #tpu.dot_dimension_numbers<[1], [1], [0], [0], [0, 0, 1, 0], [], []>} : vector<16x256xbf16>, vector<768x256xbf16>, vector<16x768xf32> -> vector<16x768xf32>
    %184 = vector.extract_strided_slice %183 {offsets = [0, 0], sizes = [16, 256], strides = [1, 1]} : vector<16x768xf32> to vector<16x256xf32>
    %185 = vector.broadcast %174 : vector<16x1xf32> to vector<16x256xf32>
    %186 = arith.mulf %185, %184 : vector<16x256xf32>
    %187 = vector.extract_strided_slice %183 {offsets = [0, 256], sizes = [16, 256], strides = [1, 1]} : vector<16x768xf32> to vector<16x256xf32>
    %188 = vector.broadcast %176 : vector<16x1xf32> to vector<16x256xf32>
    %189 = arith.mulf %188, %187 : vector<16x256xf32>
    %190 = arith.addf %186, %189 : vector<16x256xf32>
    %191 = vector.extract_strided_slice %183 {offsets = [0, 512], sizes = [16, 256], strides = [1, 1]} : vector<16x768xf32> to vector<16x256xf32>
    %192 = vector.broadcast %178 : vector<16x1xf32> to vector<16x256xf32>
    %193 = arith.mulf %192, %191 : vector<16x256xf32>
    %194 = arith.addf %190, %193 : vector<16x256xf32>
    %195 = arith.index_cast %arg1 : i32 to index
    %c0_101 = arith.constant 0 : index
    %c0_102 = arith.constant 0 : index
    %c0_103 = arith.constant 0 : index
    %196 = vector.load %arg15[%195, %c0_101, %c0_102, %c0_103] : memref<2x6x16x256xf32, #tpu.memory_space<vmem>>, vector<1x1x16x256xf32>
    %197 = vector.shape_cast %196 : vector<1x1x16x256xf32> to vector<16x256xf32>
    %198 = arith.addf %194, %197 : vector<16x256xf32>
    %cst_104 = arith.constant dense<0.000000e+00> : vector<16x256xf32>
    %199 = tpu.matmul %172, %3, %cst_104 {dimension_numbers = #tpu.dot_dimension_numbers<[1], [0], [0], [1], [0, 0, 1, 1], [], []>} : vector<16x16xf32>, vector<16x256xf32>, vector<16x256xf32> -> vector<16x256xf32>
    %200 = arith.truncf %199 : vector<16x256xf32> to vector<16x256xbf16>
    %201 = arith.index_cast %arg1 : i32 to index
    %c0_105 = arith.constant 0 : index
    %c0_106 = arith.constant 0 : index
    %202 = vector.load %arg13[%201, %c0_105, %c0_106] : memref<2x768x256xbf16, #tpu.memory_space<vmem>>, vector<1x768x256xbf16>
    %203 = vector.shape_cast %202 : vector<1x768x256xbf16> to vector<768x256xbf16>
    %cst_107 = arith.constant dense<0.000000e+00> : vector<16x768xf32>
    %204 = tpu.matmul %200, %203, %cst_107 {dimension_numbers = #tpu.dot_dimension_numbers<[1], [1], [0], [0], [0, 0, 1, 0], [], []>} : vector<16x256xbf16>, vector<768x256xbf16>, vector<16x768xf32> -> vector<16x768xf32>
    %205 = vector.extract_strided_slice %204 {offsets = [0, 0], sizes = [16, 256], strides = [1, 1]} : vector<16x768xf32> to vector<16x256xf32>
    %206 = vector.broadcast %174 : vector<16x1xf32> to vector<16x256xf32>
    %207 = arith.mulf %206, %205 : vector<16x256xf32>
    %208 = vector.extract_strided_slice %204 {offsets = [0, 256], sizes = [16, 256], strides = [1, 1]} : vector<16x768xf32> to vector<16x256xf32>
    %209 = vector.broadcast %176 : vector<16x1xf32> to vector<16x256xf32>
    %210 = arith.mulf %209, %208 : vector<16x256xf32>
    %211 = arith.addf %207, %210 : vector<16x256xf32>
    %212 = vector.extract_strided_slice %204 {offsets = [0, 512], sizes = [16, 256], strides = [1, 1]} : vector<16x768xf32> to vector<16x256xf32>
    %213 = vector.broadcast %178 : vector<16x1xf32> to vector<16x256xf32>
    %214 = arith.mulf %213, %212 : vector<16x256xf32>
    %215 = arith.addf %211, %214 : vector<16x256xf32>
    %216 = arith.index_cast %arg1 : i32 to index
    %c1_108 = arith.constant 1 : index
    %c0_109 = arith.constant 0 : index
    %c0_110 = arith.constant 0 : index
    %217 = vector.load %arg15[%216, %c1_108, %c0_109, %c0_110] : memref<2x6x16x256xf32, #tpu.memory_space<vmem>>, vector<1x1x16x256xf32>
    %218 = vector.shape_cast %217 : vector<1x1x16x256xf32> to vector<16x256xf32>
    %219 = arith.addf %215, %218 : vector<16x256xf32>
    %220 = arith.index_cast %arg1 : i32 to index
    %c2_111 = arith.constant 2 : index
    %c0_112 = arith.constant 0 : index
    %c0_113 = arith.constant 0 : index
    %221 = vector.load %arg15[%220, %c2_111, %c0_112, %c0_113] : memref<2x6x16x256xf32, #tpu.memory_space<vmem>>, vector<1x1x16x256xf32>
    %222 = vector.shape_cast %221 : vector<1x1x16x256xf32> to vector<16x256xf32>
    %223 = arith.mulf %198, %222 : vector<16x256xf32>
    %224 = arith.index_cast %arg1 : i32 to index
    %c3 = arith.constant 3 : index
    %c0_114 = arith.constant 0 : index
    %c0_115 = arith.constant 0 : index
    %225 = vector.load %arg15[%224, %c3, %c0_114, %c0_115] : memref<2x6x16x256xf32, #tpu.memory_space<vmem>>, vector<1x1x16x256xf32>
    %226 = vector.shape_cast %225 : vector<1x1x16x256xf32> to vector<16x256xf32>
    %227 = arith.mulf %219, %226 : vector<16x256xf32>
    %228 = arith.addf %223, %227 : vector<16x256xf32>
    %cst_116 = arith.constant dense<0.000000e+00> : vector<16xf32>
    %229 = vector.multi_reduction <add>, %228, %cst_116 [1] : vector<16x256xf32> to vector<16xf32>
    %230 = vector.shape_cast %229 : vector<16xf32> to vector<16x1xf32>
    %231 = arith.index_cast %arg1 : i32 to index
    %c0_117 = arith.constant 0 : index
    %c0_118 = arith.constant 0 : index
    %232 = vector.load %arg16[%231, %c0_117, %c0_118] : memref<2x16x1xf32, #tpu.memory_space<vmem>>, vector<1x16x1xf32>
    %233 = vector.shape_cast %232 : vector<1x16x1xf32> to vector<16x1xf32>
    %234 = arith.addf %230, %233 : vector<16x1xf32>
    %235 = arith.negf %234 : vector<16x1xf32>
    %236 = math.exp %235 : vector<16x1xf32>
    %cst_119 = arith.constant 1.000000e+00 : f32
    %237 = vector.broadcast %cst_119 : f32 to vector<16x1xf32>
    %238 = arith.addf %237, %236 : vector<16x1xf32>
    %239 = arith.divf %237, %238 : vector<16x1xf32>
    %240 = vector.broadcast %239 : vector<16x1xf32> to vector<16x256xf32>
    %241 = arith.mulf %198, %240 : vector<16x256xf32>
    %cst_120 = arith.constant 1.000000e+00 : f32
    %242 = vector.broadcast %cst_120 : f32 to vector<16x1xf32>
    %243 = arith.subf %242, %239 : vector<16x1xf32>
    %244 = vector.broadcast %243 : vector<16x1xf32> to vector<16x256xf32>
    %245 = arith.mulf %219, %244 : vector<16x256xf32>
    %246 = arith.addf %241, %245 : vector<16x256xf32>
    %cst_121 = arith.constant dense<0.000000e+00> : vector<16xf32>
    %247 = vector.multi_reduction <add>, %246, %cst_121 [1] : vector<16x256xf32> to vector<16xf32>
    %248 = vector.shape_cast %247 : vector<16xf32> to vector<16x1xf32>
    %cst_122 = arith.constant 2.560000e+02 : f32
    %249 = vector.broadcast %cst_122 : f32 to vector<16x1xf32>
    %250 = arith.divf %248, %249 : vector<16x1xf32>
    %251 = vector.broadcast %250 : vector<16x1xf32> to vector<16x256xf32>
    %252 = arith.subf %246, %251 : vector<16x256xf32>
    %253 = arith.mulf %252, %252 : vector<16x256xf32>
    %cst_123 = arith.constant dense<0.000000e+00> : vector<16xf32>
    %254 = vector.multi_reduction <add>, %253, %cst_123 [1] : vector<16x256xf32> to vector<16xf32>
    %255 = vector.shape_cast %254 : vector<16xf32> to vector<16x1xf32>
    %cst_124 = arith.constant 2.560000e+02 : f32
    %256 = vector.broadcast %cst_124 : f32 to vector<16x1xf32>
    %257 = arith.divf %255, %256 : vector<16x1xf32>
    %258 = vector.broadcast %250 : vector<16x1xf32> to vector<16x256xf32>
    %259 = arith.subf %246, %258 : vector<16x256xf32>
    %cst_125 = arith.constant 9.99999974E-6 : f32
    %260 = vector.broadcast %cst_125 : f32 to vector<16x1xf32>
    %261 = arith.addf %257, %260 : vector<16x1xf32>
    %262 = math.rsqrt %261 : vector<16x1xf32>
    %263 = vector.broadcast %262 : vector<16x1xf32> to vector<16x256xf32>
    %264 = arith.mulf %259, %263 : vector<16x256xf32>
    %265 = arith.index_cast %arg1 : i32 to index
    %c4 = arith.constant 4 : index
    %c0_126 = arith.constant 0 : index
    %c0_127 = arith.constant 0 : index
    %266 = vector.load %arg15[%265, %c4, %c0_126, %c0_127] : memref<2x6x16x256xf32, #tpu.memory_space<vmem>>, vector<1x1x16x256xf32>
    %267 = vector.shape_cast %266 : vector<1x1x16x256xf32> to vector<16x256xf32>
    %268 = arith.mulf %264, %267 : vector<16x256xf32>
    %269 = arith.index_cast %arg1 : i32 to index
    %c5 = arith.constant 5 : index
    %c0_128 = arith.constant 0 : index
    %c0_129 = arith.constant 0 : index
    %270 = vector.load %arg15[%269, %c5, %c0_128, %c0_129] : memref<2x6x16x256xf32, #tpu.memory_space<vmem>>, vector<1x1x16x256xf32>
    %271 = vector.shape_cast %270 : vector<1x1x16x256xf32> to vector<16x256xf32>
    %272 = arith.addf %268, %271 : vector<16x256xf32>
    %cst_130 = arith.constant 0.000000e+00 : f32
    %273 = vector.broadcast %cst_130 : f32 to vector<16x256xf32>
    %274 = arith.maximumf %272, %273 : vector<16x256xf32>
    %c0_131 = arith.constant 0 : index
    %c0_132 = arith.constant 0 : index
    %275 = vector.load %arg19[%c0_131, %c0_132] : memref<16x256xf32, #tpu.memory_space<vmem>>, vector<16x256xf32>
    tpu.vector_store %arg19[%c0_131, %c0_132], %274 {strides = array<i32>} : memref<16x256xf32, #tpu.memory_space<vmem>>, vector<16x256xf32>,
    return
  }
  func.func @transform_0(%arg0: i32, %arg1: i32) -> (i32, i32, i32) {
    %c0_i32 = arith.constant 0 : i32
    %c0_i32_0 = arith.constant 0 : i32
    %c0_i32_1 = arith.constant 0 : i32
    return %arg0, %c0_i32, %c0_i32_0 : i32, i32, i32
  }
  func.func @transform_1(%arg0: i32, %arg1: i32) -> (i32, i32, i32) {
    %c0_i32 = arith.constant 0 : i32
    %c0_i32_0 = arith.constant 0 : i32
    %c0_i32_1 = arith.constant 0 : i32
    return %arg0, %c0_i32, %c0_i32_0 : i32, i32, i32
  }
  func.func @transform_2(%arg0: i32, %arg1: i32) -> (i32, i32, i32) {
    %c0_i32 = arith.constant 0 : i32
    %c0_i32_0 = arith.constant 0 : i32
    %c0_i32_1 = arith.constant 0 : i32
    return %arg0, %c0_i32, %c0_i32_0 : i32, i32, i32
  }
  func.func @transform_3(%arg0: i32, %arg1: i32) -> (i32, i32) {
    %c0_i32 = arith.constant 0 : i32
    %c0_i32_0 = arith.constant 0 : i32
    %c0_i32_1 = arith.constant 0 : i32
    return %c0_i32, %c0_i32_0 : i32, i32
  }
  func.func @transform_4(%arg0: i32, %arg1: i32) -> (i32, i32, i32) {
    %c0_i32 = arith.constant 0 : i32
    %c0_i32_0 = arith.constant 0 : i32
    %c0_i32_1 = arith.constant 0 : i32
    %c0_i32_2 = arith.constant 0 : i32
    return %c0_i32, %c0_i32_0, %c0_i32_1 : i32, i32, i32
  }
  func.func @transform_5(%arg0: i32, %arg1: i32) -> (i32, i32, i32) {
    %c0_i32 = arith.constant 0 : i32
    %c0_i32_0 = arith.constant 0 : i32
    %c0_i32_1 = arith.constant 0 : i32
    %c0_i32_2 = arith.constant 0 : i32
    return %c0_i32, %c0_i32_0, %c0_i32_1 : i32, i32, i32
  }
  func.func @transform_6(%arg0: i32, %arg1: i32) -> (i32, i32, i32, i32) {
    %c0_i32 = arith.constant 0 : i32
    %c0_i32_0 = arith.constant 0 : i32
    %c0_i32_1 = arith.constant 0 : i32
    %c0_i32_2 = arith.constant 0 : i32
    %c0_i32_3 = arith.constant 0 : i32
    return %c0_i32, %c0_i32_0, %c0_i32_1, %c0_i32_2 : i32, i32, i32, i32
  }
  func.func @transform_7(%arg0: i32, %arg1: i32) -> (i32, i32, i32, i32) {
    %c0_i32 = arith.constant 0 : i32
    %c0_i32_0 = arith.constant 0 : i32
    %c0_i32_1 = arith.constant 0 : i32
    %c0_i32_2 = arith.constant 0 : i32
    %c0_i32_3 = arith.constant 0 : i32
    return %c0_i32, %c0_i32_0, %c0_i32_1, %c0_i32_2 : i32, i32, i32, i32
  }
  func.func @transform_8(%arg0: i32, %arg1: i32) -> (i32, i32, i32) {
    %c0_i32 = arith.constant 0 : i32
    %c0_i32_0 = arith.constant 0 : i32
    %c0_i32_1 = arith.constant 0 : i32
    %c0_i32_2 = arith.constant 0 : i32
    return %c0_i32, %c0_i32_0, %c0_i32_1 : i32, i32, i32
  }
  func.func @transform_9(%arg0: i32, %arg1: i32) -> (i32, i32, i32, i32) {
    %c0_i32 = arith.constant 0 : i32
    %c0_i32_0 = arith.constant 0 : i32
    %c0_i32_1 = arith.constant 0 : i32
    %c0_i32_2 = arith.constant 0 : i32
    %c0_i32_3 = arith.constant 0 : i32
    return %c0_i32, %c0_i32_0, %c0_i32_1, %c0_i32_2 : i32, i32, i32, i32
  }
  func.func @transform_10(%arg0: i32, %arg1: i32) -> (i32, i32, i32, i32) {
    %c0_i32 = arith.constant 0 : i32
    %c0_i32_0 = arith.constant 0 : i32
    %c0_i32_1 = arith.constant 0 : i32
    %c0_i32_2 = arith.constant 0 : i32
    %c0_i32_3 = arith.constant 0 : i32
    return %c0_i32, %c0_i32_0, %c0_i32_1, %c0_i32_2 : i32, i32, i32, i32
  }
  func.func @transform_11(%arg0: i32, %arg1: i32) -> (i32, i32, i32) {
    %c0_i32 = arith.constant 0 : i32
    %c0_i32_0 = arith.constant 0 : i32
    %c0_i32_1 = arith.constant 0 : i32
    %c0_i32_2 = arith.constant 0 : i32
    return %c0_i32, %c0_i32_0, %c0_i32_1 : i32, i32, i32
  }
  func.func @transform_12(%arg0: i32, %arg1: i32) -> (i32, i32, i32) {
    %c0_i32 = arith.constant 0 : i32
    %c0_i32_0 = arith.constant 0 : i32
    %c0_i32_1 = arith.constant 0 : i32
    %c0_i32_2 = arith.constant 0 : i32
    return %c0_i32, %c0_i32_0, %c0_i32_1 : i32, i32, i32
  }
  func.func @transform_13(%arg0: i32, %arg1: i32) -> (i32, i32, i32, i32) {
    %c0_i32 = arith.constant 0 : i32
    %c0_i32_0 = arith.constant 0 : i32
    %c0_i32_1 = arith.constant 0 : i32
    %c0_i32_2 = arith.constant 0 : i32
    %c0_i32_3 = arith.constant 0 : i32
    return %c0_i32, %c0_i32_0, %c0_i32_1, %c0_i32_2 : i32, i32, i32, i32
  }
  func.func @transform_14(%arg0: i32, %arg1: i32) -> (i32, i32, i32) {
    %c0_i32 = arith.constant 0 : i32
    %c0_i32_0 = arith.constant 0 : i32
    %c0_i32_1 = arith.constant 0 : i32
    %c0_i32_2 = arith.constant 0 : i32
    return %c0_i32, %c0_i32_0, %c0_i32_1 : i32, i32, i32
  }
  func.func @transform_15(%arg0: i32, %arg1: i32) -> (i32, i32, i32, i32) {
    %c0_i32 = arith.constant 0 : i32
    %c0_i32_0 = arith.constant 0 : i32
    %c0_i32_1 = arith.constant 0 : i32
    return %arg0, %arg1, %c0_i32, %c0_i32_0 : i32, i32, i32, i32
  }
  func.func @transform_16(%arg0: i32, %arg1: i32) -> (i32, i32, i32, i32) {
    %c0_i32 = arith.constant 0 : i32
    %c0_i32_0 = arith.constant 0 : i32
    %c0_i32_1 = arith.constant 0 : i32
    return %arg0, %arg1, %c0_i32, %c0_i32_0 : i32, i32, i32, i32
  }
}

</mosaic_0001>

<bundles_post_ra>
// kernel: magnet_forward.2
= control target key start
LH: loop header
LB: loop body
LE: loop exit
PB: predicated region body
PF: predicated region fallthrough
CT: control target
= control target key end

     0   :  { %s3717_s3 = inlined_call_operand.vmem [shape: bf16[256,512], index: 3, kind: input, shape index: {}]   ;;  %s3718_s11 = inlined_call_operand.vmem [shape: bf16[256,1024], index: 11, kind: input, shape index: {}]   ;;  %s3719_s0 = inlined_call_operand.vmem [shape: f32[8,512], index: 0, kind: input, shape index: {}]   ;;  %s3720_s2 = inlined_call_operand.vmem [shape: f32[16,1024], index: 2, kind: input, shape index: {}]   ;;  %s3721_s7 = inlined_call_operand.vmem [shape: bf16[256,512], index: 7, kind: input, shape index: {}]   ;;  %s3722_s1 = inlined_call_operand.vmem [shape: f32[8,512], index: 1, kind: input, shape index: {}]   ;;  %s3723_s4 = inlined_call_operand.vmem [shape: f32[1,256], index: 4, kind: input, shape index: {}]   ;;  %s3724_s8 = inlined_call_operand.vmem [shape: f32[1,256], index: 8, kind: input, shape index: {}]   ;;  %s3725_s12 = inlined_call_operand.vmem [shape: f32[1,256], index: 12, kind: input, shape index: {}]   ;;  %s3726_s5 = inlined_call_operand.vmem [shape: f32[1,256], index: 5, kind: input, shape index: {}]   ;;  %s3727_s6 = inlined_call_operand.vmem [shape: f32[1,256], index: 6, kind: input, shape index: {}]   ;;  %s3728_s15 = inlined_call_operand.vmem [shape: f32[8,256], index: 15, kind: output, shape index: {0}]   ;;  %s3729_s9 = inlined_call_operand.vmem [shape: f32[1,256], index: 9, kind: input, shape index: {}]   ;;  %s3730_s13 = inlined_call_operand.vmem [shape: f32[1,256], index: 13, kind: input, shape index: {}]   ;;  %s3731_s10 = inlined_call_operand.vmem [shape: f32[1,256], index: 10, kind: input, shape index: {}]   ;;  %s3732_s14 = inlined_call_operand.vmem [shape: f32[1,256], index: 14, kind: input, shape index: {}]   ;;  %s3733_s16 = inlined_call_operand.vmem [shape: f32[8,256], index: 16, kind: output, shape index: {1}]   ;;  %s3734_s17 = inlined_call_operand.vmem [shape: f32[16,256], index: 17, kind: output, shape index: {2}]  }
   0x1   :  { %3737 = sst [smem:[#allocation2_spill]] %s3717_s3  ;;  %v54_v32 = vld [vmem:[%s3719_s0 + $0x8] sm:$0xff] }
   0x2   :  { %3738 = sst [smem:[#allocation3_spill]] %s3718_s11  ;;  %s3740_s26 = sld [smem:[#allocation2_spill]]  ;;  %v58_v34 = vpack.c.bf16 %v54_v32, %v54_v32  ;;  %v1123_v35 = vld [vmem:[%s3720_s2 + $0x8] sm:$0xff] }
   0x3   :  { %3739 = sst [smem:[#allocation4_spill]] %s3729_s9  ;;  %s3741_s9 = sld [smem:[#allocation3_spill]]  ;;  %v1131_v37 = vld [vmem:[%s3720_s2 + $0x48] sm:$0xff] }
   0x4   :  { %489 = vmatprep.mubr.bf16.mxu1 %v58_v34  ;;  %v1139_v38 = vpack.c.bf16 %v1131_v37, %v1123_v35  ;;  %s3742_s21 = sld [smem:[#allocation4_spill]] }
   0x6   :  { %1958 = vmatprep.mubr.bf16.mxu0 %v1139_v38 }
   0x8   :  { %v2466_v0 = vld [vmem:[%s3740_s26 + $0x4] ss:$16 sps:$4 sm:$0xff]   ;;  %v2468_v3 = vld [vmem:[%s3740_s26] ss:$16 sps:$4 sm:$0xff]   ;;  %v2516_v38 = vld [vmem:[%s3740_s26 + $0xc] ss:$16 sps:$4 sm:$0xff]  }
   0x9   :  { %v1146_v1 = vld [vmem:[%s3741_s9] sm:$0xff]  ;;  %457 = vmatprep.subr.bf16.mxu1 %v2466_v0  ;;  %v1151_v37 = vld [vmem:[%s3741_s9 + $0x28] sm:$0xff] }
   0xa   :  { %v1150_v2 = vld [vmem:[%s3741_s9 + $0x20] sm:$0xff]  ;;  %458 = vmatpush1.bf16.xpose.msra.mxu1 %v2468_v3 }
   0xb   :  { %v2311_v4 = vcombine.high %v1146_v1, %v1150_v2  ;;  %v2310_v5 = vcombine.low %v1146_v1, %v1150_v2  ;;  %v2469_v6 = vld [vmem:[%s3740_s26 + $0x24] ss:$16 sps:$4 sm:$0xff]   ;;  %v2471_v10 = vld [vmem:[%s3740_s26 + $0x20] ss:$16 sps:$4 sm:$0xff]  }
   0xc   :  { %v1154_v7 = vld [vmem:[%s3741_s9 + $0x40] sm:$0xff]  ;;  %459 = vmatprep.subr.bf16.mxu1 %v2469_v6 }
   0xd   :  { %v1158_v8 = vld [vmem:[%s3741_s9 + $0x60] sm:$0xff]  ;;  %1926 = vmatprep.subr.bf16.mxu0 %v2311_v4 }
   0xe   :  { %v2319_v9 = vcombine.high %v1154_v7, %v1158_v8  ;;  %1927 = vmatpush1.bf16.xpose.msra.mxu0 %v2310_v5  ;;  %v1162_v11 = vld [vmem:[%s3741_s9 + $0x80] sm:$0xff]  ;;  %v2318_v14 = vcombine.low %v1154_v7, %v1158_v8 }
   0xf   :  { %v1166_v12 = vld [vmem:[%s3741_s9 + $0xa0] sm:$0xff] }
  0x10   :  { %1928 = vmatprep.subr.bf16.mxu0 %v2319_v9  ;;  %v2472_v13 = vld [vmem:[%s3740_s26 + $0x44] ss:$16 sps:$4 sm:$0xff]   ;;  %v2327_v15 = vcombine.high %v1162_v11, %v1166_v12  ;;  %v2474_v16 = vld [vmem:[%s3740_s26 + $0x40] ss:$16 sps:$4 sm:$0xff]   ;;  %v2326_v20 = vcombine.low %v1162_v11, %v1166_v12 }
  0x11   :  { %v1170_v17 = vld [vmem:[%s3741_s9 + $0xc0] sm:$0xff] }
  0x12   :  { %460 = vmatpush1.bf16.xpose.msra.mxu1 %v2471_v10  ;;  %v1174_v18 = vld [vmem:[%s3741_s9 + $0xe0] sm:$0xff] }
  0x13   :  { %461 = vmatprep.subr.bf16.mxu1 %v2472_v13  ;;  %v2475_v19 = vld [vmem:[%s3740_s26 + $0x64] ss:$16 sps:$4 sm:$0xff]   ;;  %v2335_v21 = vcombine.high %v1170_v17, %v1174_v18  ;;  %v2477_v22 = vld [vmem:[%s3740_s26 + $0x60] ss:$16 sps:$4 sm:$0xff]   ;;  %v2334_v26 = vcombine.low %v1170_v17, %v1174_v18 }
  0x14   :  { %v1178_v23 = vld [vmem:[%s3741_s9 + $0x100] sm:$0xff] }
  0x15   :  { %v1182_v24 = vld [vmem:[%s3741_s9 + $0x120] sm:$0xff] }
  0x16   :  { %1929 = vmatpush1.bf16.xpose.msra.mxu0 %v2318_v14  ;;  %v2478_v25 = vld [vmem:[%s3740_s26 + $0x84] ss:$16 sps:$4 sm:$0xff]   ;;  %v2343_v27 = vcombine.high %v1178_v23, %v1182_v24  ;;  %v2480_v28 = vld [vmem:[%s3740_s26 + $0x80] ss:$16 sps:$4 sm:$0xff]   ;;  %v2342_v33 = vcombine.low %v1178_v23, %v1182_v24 }
  0x17   :  { %1930 = vmatprep.subr.bf16.mxu0 %v2327_v15  ;;  %v2481_v29 = vld [vmem:[%s3740_s26 + $0xa4] ss:$16 sps:$4 sm:$0xff]   ;;  %v2483_v39 = vld [vmem:[%s3740_s26 + $0xa0] ss:$16 sps:$4 sm:$0xff]  }
  0x18   :  { %v1186_v30 = vld [vmem:[%s3741_s9 + $0x140] sm:$0xff] }
  0x19   :  { %v1190_v31 = vld [vmem:[%s3741_s9 + $0x160] sm:$0xff] }
  0x1a   :  { %462 = vmatpush1.bf16.xpose.msra.mxu1 %v2474_v16  ;;  %v2351_v36 = vcombine.high %v1186_v30, %v1190_v31  ;;  %v1194_v40 = vld [vmem:[%s3741_s9 + $0x180] sm:$0xff]  ;;  %v2350_v43 = vcombine.low %v1186_v30, %v1190_v31 }
  0x1b   :  { %463 = vmatprep.subr.bf16.mxu1 %v2475_v19  ;;  %v1198_v41 = vld [vmem:[%s3741_s9 + $0x1a0] sm:$0xff] }
  0x1c   :  { %v2484_v42 = vld [vmem:[%s3740_s26 + $0xc4] ss:$16 sps:$4 sm:$0xff]   ;;  %v2359_v44 = vcombine.high %v1194_v40, %v1198_v41  ;;  %v2486_v45 = vld [vmem:[%s3740_s26 + $0xc0] ss:$16 sps:$4 sm:$0xff]   ;;  %v2358_v49 = vcombine.low %v1194_v40, %v1198_v41 }
  0x1d   :  { %v2487_v46 = vld [vmem:[%s3740_s26 + $0xe4] ss:$16 sps:$4 sm:$0xff]   ;;  %v2489_v51 = vld [vmem:[%s3740_s26 + $0xe0] ss:$16 sps:$4 sm:$0xff]  }
  0x1e   :  { %1931 = vmatpush1.bf16.xpose.msra.mxu0 %v2326_v20  ;;  %v1202_v47 = vld [vmem:[%s3741_s9 + $0x1c0] sm:$0xff] }
  0x1f   :  { %1932 = vmatprep.subr.bf16.mxu0 %v2335_v21  ;;  %v1206_v48 = vld [vmem:[%s3741_s9 + $0x1e0] sm:$0xff] }
  0x20   :  { %v2367_v50 = vcombine.high %v1202_v47, %v1206_v48  ;;  %v1210_v52 = vld [vmem:[%s3741_s9 + $0x200] sm:$0xff]  ;;  %v2366_v55 = vcombine.low %v1202_v47, %v1206_v48  ;;  %v1155_v47 = vld [vmem:[%s3741_s9 + $0x48] sm:$0xff] }
  0x21   :  { %v1214_v53 = vld [vmem:[%s3741_s9 + $0x220] sm:$0xff]  ;;  %v1159_v48 = vld [vmem:[%s3741_s9 + $0x68] sm:$0xff] }
  0x22   :  { %464 = vmatpush1.bf16.xpose.msra.mxu1 %v2477_v22  ;;  %v2490_v54 = vld [vmem:[%s3740_s26 + $0x104] ss:$16 sps:$4 sm:$0xff]   ;;  %v2375_v56 = vcombine.high %v1210_v52, %v1214_v53  ;;  %v2492_v57 = vld [vmem:[%s3740_s26 + $0x100] ss:$16 sps:$4 sm:$0xff]   ;;  %v2374_v61 = vcombine.low %v1210_v52, %v1214_v53  ;;  %v2321_v53 = vcombine.high %v1155_v47, %v1159_v48 }
  0x23   :  { %465 = vmatprep.subr.bf16.mxu1 %v2478_v25  ;;  %v1218_v58 = vld [vmem:[%s3741_s9 + $0x240] sm:$0xff] }
  0x24   :  { %v1222_v59 = vld [vmem:[%s3741_s9 + $0x260] sm:$0xff] }
  0x25   :  { %v2493_v60 = vld [vmem:[%s3740_s26 + $0x124] ss:$16 sps:$4 sm:$0xff]   ;;  %v2383_v62 = vcombine.high %v1218_v58, %v1222_v59  ;;  %v2495_v63 = vld [vmem:[%s3740_s26 + $0x120] ss:$16 sps:$4 sm:$0xff]   ;;  %v2382_v3 = vcombine.low %v1218_v58, %v1222_v59  ;;  %v1163_v58 = vld [vmem:[%s3741_s9 + $0x88] sm:$0xff] }
  0x26   :  { %1933 = vmatpush1.bf16.xpose.msra.mxu0 %v2334_v26  ;;  %v1226_v0 = vld [vmem:[%s3741_s9 + $0x280] sm:$0xff]  ;;  %v2522_v59 = vld [vmem:[%s3740_s26 + $0x4c] ss:$16 sps:$4 sm:$0xff]  }
  0x27   :  { %1934 = vmatprep.subr.bf16.mxu0 %v2343_v27  ;;  %v1230_v1 = vld [vmem:[%s3741_s9 + $0x2a0] sm:$0xff] }
  0x28   :  { %v2496_v2 = vld [vmem:[%s3740_s26 + $0x144] ss:$16 sps:$4 sm:$0xff]   ;;  %v2391_v4 = vcombine.high %v1226_v0, %v1230_v1  ;;  %v2498_v5 = vld [vmem:[%s3740_s26 + $0x140] ss:$16 sps:$4 sm:$0xff]   ;;  %v2390_v9 = vcombine.low %v1226_v0, %v1230_v1  ;;  %v1171_v0 = vld [vmem:[%s3741_s9 + $0xc8] sm:$0xff] }
  0x29   :  { %v1234_v6 = vld [vmem:[%s3741_s9 + $0x2c0] sm:$0xff]  ;;  %v2525_v1 = vld [vmem:[%s3740_s26 + $0x6c] ss:$16 sps:$4 sm:$0xff]  }
  0x2a   :  { %466 = vmatpush1.bf16.xpose.msra.mxu1 %v2480_v28  ;;  %v1238_v7 = vld [vmem:[%s3741_s9 + $0x2e0] sm:$0xff] }
  0x2b   :  { %467 = vmatprep.subr.bf16.mxu1 %v2481_v29  ;;  %v2499_v8 = vld [vmem:[%s3740_s26 + $0x164] ss:$16 sps:$4 sm:$0xff]   ;;  %v2399_v10 = vcombine.high %v1234_v6, %v1238_v7  ;;  %v2501_v11 = vld [vmem:[%s3740_s26 + $0x160] ss:$16 sps:$4 sm:$0xff]   ;;  %v2398_v15 = vcombine.low %v1234_v6, %v1238_v7  ;;  %v1179_v6 = vld [vmem:[%s3741_s9 + $0x108] sm:$0xff] }
  0x2c   :  { %v1242_v12 = vld [vmem:[%s3741_s9 + $0x300] sm:$0xff]  ;;  %v2528_v7 = vld [vmem:[%s3740_s26 + $0x8c] ss:$16 sps:$4 sm:$0xff]  }
  0x2d   :  { %v1246_v13 = vld [vmem:[%s3741_s9 + $0x320] sm:$0xff] }
  0x2e   :  { %1935 = vmatpush1.bf16.xpose.msra.mxu0 %v2342_v33  ;;  %v2502_v14 = vld [vmem:[%s3740_s26 + $0x184] ss:$16 sps:$4 sm:$0xff]   ;;  %v2407_v16 = vcombine.high %v1242_v12, %v1246_v13  ;;  %v2504_v17 = vld [vmem:[%s3740_s26 + $0x180] ss:$16 sps:$4 sm:$0xff]   ;;  %v2406_v21 = vcombine.low %v1242_v12, %v1246_v13  ;;  %v1187_v12 = vld [vmem:[%s3741_s9 + $0x148] sm:$0xff] }
  0x2f   :  { %1936 = vmatprep.subr.bf16.mxu0 %v2351_v36  ;;  %v1250_v18 = vld [vmem:[%s3741_s9 + $0x340] sm:$0xff]  ;;  %v1147_v36 = vld [vmem:[%s3741_s9 + $0x8] sm:$0xff] }
  0x30   :  { %v1254_v19 = vld [vmem:[%s3741_s9 + $0x360] sm:$0xff]  ;;  %v2313_v40 = vcombine.high %v1147_v36, %v1151_v37  ;;  %v2312_v52 = vcombine.low %v1147_v36, %v1151_v37  ;;  %v1191_v13 = vld [vmem:[%s3741_s9 + $0x168] sm:$0xff] }
  0x31   :  { %v2505_v20 = vld [vmem:[%s3740_s26 + $0x1a4] ss:$16 sps:$4 sm:$0xff]   ;;  %v2415_v22 = vcombine.high %v1250_v18, %v1254_v19  ;;  %v2507_v23 = vld [vmem:[%s3740_s26 + $0x1a0] ss:$16 sps:$4 sm:$0xff]   ;;  %v2414_v27 = vcombine.low %v1250_v18, %v1254_v19  ;;  %v1195_v18 = vld [vmem:[%s3741_s9 + $0x188] sm:$0xff] }
  0x32   :  { %468 = vmatpush1.bf16.xpose.msra.mxu1 %v2483_v39  ;;  %v1258_v24 = vld [vmem:[%s3741_s9 + $0x380] sm:$0xff]  ;;  %v1199_v19 = vld [vmem:[%s3741_s9 + $0x1a8] sm:$0xff] }
  0x33   :  { %469 = vmatprep.subr.bf16.mxu1 %v2484_v42  ;;  %v1262_v25 = vld [vmem:[%s3741_s9 + $0x3a0] sm:$0xff]  ;;  %v1219_v36 = vld [vmem:[%s3741_s9 + $0x248] sm:$0xff] }
  0x34   :  { %v2508_v26 = vld [vmem:[%s3740_s26 + $0x1c4] ss:$16 sps:$4 sm:$0xff]   ;;  %v2423_v28 = vcombine.high %v1258_v24, %v1262_v25  ;;  %v2510_v29 = vld [vmem:[%s3740_s26 + $0x1c0] ss:$16 sps:$4 sm:$0xff]   ;;  %v2422_v33 = vcombine.low %v1258_v24, %v1262_v25  ;;  %v1203_v24 = vld [vmem:[%s3741_s9 + $0x1c8] sm:$0xff] }
  0x35   :  { %v1266_v30 = vld [vmem:[%s3741_s9 + $0x3c0] sm:$0xff]  ;;  %v1207_v25 = vld [vmem:[%s3741_s9 + $0x1e8] sm:$0xff] }
  0x36   :  { %1937 = vmatpush1.bf16.xpose.msra.mxu0 %v2350_v43  ;;  %v1270_v31 = vld [vmem:[%s3741_s9 + $0x3e0] sm:$0xff]  ;;  %v1223_v37 = vld [vmem:[%s3741_s9 + $0x268] sm:$0xff] }
  0x37   :  { %1938 = vmatprep.subr.bf16.mxu0 %v2359_v44  ;;  %v2511_v32 = vld [vmem:[%s3740_s26 + $0x1e4] ss:$16 sps:$4 sm:$0xff]   ;;  %v2431_v34 = vcombine.high %v1266_v30, %v1270_v31  ;;  %v2513_v35 = vld [vmem:[%s3740_s26 + $0x1e0] ss:$16 sps:$4 sm:$0xff]   ;;  %v2430_v39 = vcombine.low %v1266_v30, %v1270_v31  ;;  %v56_v44 = vld [vmem:[%s3719_s0 + $0x18] sm:$0xff] }
  0x38   :  { %v53_v41 = vld [vmem:[%s3719_s0] sm:$0xff]  ;;  %v1211_v30 = vld [vmem:[%s3741_s9 + $0x208] sm:$0xff] }
  0x39   :  { %v1122_v42 = vld [vmem:[%s3720_s2] sm:$0xff]  ;;  %v1215_v31 = vld [vmem:[%s3741_s9 + $0x228] sm:$0xff] }
  0x3a   :  { %470 = vmatpush1.bf16.xpose.msra.mxu1 %v2486_v45  ;;  %v1130_v43 = vld [vmem:[%s3720_s2 + $0x40] sm:$0xff]  ;;  %v57_v45 = vpack.c.bf16 %v53_v41, %v53_v41  ;;  %v2541_v41 = vld [vmem:[%s3740_s26 + $0x128] ss:$16 sps:$4 sm:$0xff]  }
  0x3b   :  { %471 = vmatprep.subr.bf16.mxu1 %v2487_v46  ;;  %v2514_v46 = vld [vmem:[%s3740_s26 + $0x8] ss:$16 sps:$4 sm:$0xff]  }
  0x3e   :  { %1939 = vmatpush1.bf16.xpose.msra.mxu0 %v2358_v49  ;;  %v60_v49 = vpack.c.bf16 %v56_v44, %v56_v44  ;;  %v2546_v44 = vld [vmem:[%s3740_s26 + $0x14c] ss:$16 sps:$4 sm:$0xff]  }
  0x3f   :  { %1940 = vmatprep.subr.bf16.mxu0 %v2367_v50  ;;  %v1138_v50 = vpack.c.bf16 %v1130_v43, %v1122_v42  ;;  %v1227_v42 = vld [vmem:[%s3741_s9 + $0x288] sm:$0xff] }
  0x40   :  { %v1231_v43 = vld [vmem:[%s3741_s9 + $0x2a8] sm:$0xff] }
  0x42   :  { %472 = vmatpush1.bf16.xpose.msra.mxu1 %v2489_v51  ;;  %v2519_v51 = vld [vmem:[%s3740_s26 + $0x2c] ss:$16 sps:$4 sm:$0xff]  }
  0x43   :  { %473 = vmatprep.subr.bf16.mxu1 %v2490_v54  ;;  %v1125_v54 = vld [vmem:[%s3720_s2 + $0x18] sm:$0xff] }
  0x46   :  { %1941 = vmatpush1.bf16.xpose.msra.mxu0 %v2366_v55  ;;  %v1133_v55 = vld [vmem:[%s3720_s2 + $0x58] sm:$0xff] }
  0x47   :  { %1942 = vmatprep.subr.bf16.mxu0 %v2375_v56  ;;  %v1141_v56 = vpack.c.bf16 %v1133_v55, %v1125_v54  ;;  %v1243_v54 = vld [vmem:[%s3741_s9 + $0x308] sm:$0xff] }
  0x48   :  { %v1247_v55 = vld [vmem:[%s3741_s9 + $0x328] sm:$0xff] }
  0x4a   :  { %474 = vmatpush1.bf16.xpose.msra.mxu1 %v2492_v57  ;;  %v2517_v57 = vld [vmem:[%s3740_s26 + $0x28] ss:$16 sps:$4 sm:$0xff]  }
  0x4b   :  { %475 = vmatprep.subr.bf16.mxu1 %v2493_v60  ;;  %v1167_v60 = vld [vmem:[%s3741_s9 + $0xa8] sm:$0xff] }
  0x4e   :  { %1943 = vmatpush1.bf16.xpose.msra.mxu0 %v2374_v61  ;;  %v2320_v61 = vcombine.low %v1155_v47, %v1159_v48  ;;  %v2544_v47 = vld [vmem:[%s3740_s26 + $0x148] ss:$16 sps:$4 sm:$0xff]  }
  0x4f   :  { %1944 = vmatprep.subr.bf16.mxu0 %v2383_v62  ;;  %v2329_v62 = vcombine.high %v1163_v58, %v1167_v60  ;;  %v1235_v48 = vld [vmem:[%s3741_s9 + $0x2c8] sm:$0xff] }
  0x52   :  { %476 = vmatpush1.bf16.xpose.msra.mxu1 %v2495_v63  ;;  %v2520_v63 = vld [vmem:[%s3740_s26 + $0x48] ss:$16 sps:$4 sm:$0xff]  }
  0x53   :  { %477 = vmatprep.subr.bf16.mxu1 %v2496_v2  ;;  %v1175_v2 = vld [vmem:[%s3741_s9 + $0xe8] sm:$0xff] }
  0x56   :  { %1945 = vmatpush1.bf16.xpose.msra.mxu0 %v2382_v3  ;;  %v2328_v3 = vcombine.low %v1163_v58, %v1167_v60  ;;  %v2409_v58 = vcombine.high %v1243_v54, %v1247_v55  ;;  %v1251_v60 = vld [vmem:[%s3741_s9 + $0x348] sm:$0xff] }
  0x57   :  { %1946 = vmatprep.subr.bf16.mxu0 %v2391_v4  ;;  %v2337_v4 = vcombine.high %v1171_v0, %v1175_v2 }
  0x5a   :  { %478 = vmatpush1.bf16.xpose.msra.mxu1 %v2498_v5  ;;  %v2523_v5 = vld [vmem:[%s3740_s26 + $0x68] ss:$16 sps:$4 sm:$0xff]  }
  0x5b   :  { %479 = vmatprep.subr.bf16.mxu1 %v2499_v8  ;;  %v1183_v8 = vld [vmem:[%s3741_s9 + $0x128] sm:$0xff] }
  0x5e   :  { %1947 = vmatpush1.bf16.xpose.msra.mxu0 %v2390_v9  ;;  %v2336_v9 = vcombine.low %v1171_v0, %v1175_v2  ;;  %v1259_v2 = vld [vmem:[%s3741_s9 + $0x388] sm:$0xff] }
  0x5f   :  { %1948 = vmatprep.subr.bf16.mxu0 %v2399_v10  ;;  %v2345_v10 = vcombine.high %v1179_v6, %v1183_v8 }
  0x62   :  { %480 = vmatpush1.bf16.xpose.msra.mxu1 %v2501_v11  ;;  %v2526_v11 = vld [vmem:[%s3740_s26 + $0x88] ss:$16 sps:$4 sm:$0xff]  }
  0x63   :  { %481 = vmatprep.subr.bf16.mxu1 %v2502_v14  ;;  %v2531_v14 = vld [vmem:[%s3740_s26 + $0xac] ss:$16 sps:$4 sm:$0xff]  }
  0x66   :  { %1949 = vmatpush1.bf16.xpose.msra.mxu0 %v2398_v15  ;;  %v2344_v15 = vcombine.low %v1179_v6, %v1183_v8  ;;  %v1267_v8 = vld [vmem:[%s3741_s9 + $0x3c8] sm:$0xff] }
  0x67   :  { %1950 = vmatprep.subr.bf16.mxu0 %v2407_v16  ;;  %v2353_v16 = vcombine.high %v1187_v12, %v1191_v13 }
  0x6a   :  { %482 = vmatpush1.bf16.xpose.msra.mxu1 %v2504_v17  ;;  %v2529_v17 = vld [vmem:[%s3740_s26 + $0xa8] ss:$16 sps:$4 sm:$0xff]  }
  0x6b   :  { %483 = vmatprep.subr.bf16.mxu1 %v2505_v20  ;;  %v2534_v20 = vld [vmem:[%s3740_s26 + $0xcc] ss:$16 sps:$4 sm:$0xff]  }
  0x6e   :  { %1951 = vmatpush1.bf16.xpose.msra.mxu0 %v2406_v21  ;;  %v2352_v21 = vcombine.low %v1187_v12, %v1191_v13  ;;  %v2559_v13 = vld [vmem:[%s3740_s26 + $0x1e8] ss:$16 sps:$4 sm:$0xff]  }
  0x6f   :  { %1952 = vmatprep.subr.bf16.mxu0 %v2415_v22  ;;  %v2361_v22 = vcombine.high %v1195_v18, %v1199_v19 }
  0x72   :  { %484 = vmatpush1.bf16.xpose.msra.mxu1 %v2507_v23  ;;  %v2532_v23 = vld [vmem:[%s3740_s26 + $0xc8] ss:$16 sps:$4 sm:$0xff]  }
  0x73   :  { %485 = vmatprep.subr.bf16.mxu1 %v2508_v26  ;;  %v2537_v26 = vld [vmem:[%s3740_s26 + $0xec] ss:$16 sps:$4 sm:$0xff]  }
  0x76   :  { %1953 = vmatpush1.bf16.xpose.msra.mxu0 %v2414_v27  ;;  %v2360_v27 = vcombine.low %v1195_v18, %v1199_v19  ;;  %v55_v19 = vld [vmem:[%s3719_s0 + $0x10] sm:$0xff] }
  0x77   :  { %1954 = vmatprep.subr.bf16.mxu0 %v2423_v28  ;;  %v2369_v28 = vcombine.high %v1203_v24, %v1207_v25 }
  0x7a   :  { %486 = vmatpush1.bf16.xpose.msra.mxu1 %v2510_v29  ;;  %v2535_v29 = vld [vmem:[%s3740_s26 + $0xe8] ss:$16 sps:$4 sm:$0xff]  }
  0x7b   :  { %487 = vmatprep.subr.bf16.mxu1 %v2511_v32  ;;  %v2540_v32 = vld [vmem:[%s3740_s26 + $0x10c] ss:$16 sps:$4 sm:$0xff]  }
  0x7e   :  { %1955 = vmatpush1.bf16.xpose.msra.mxu0 %v2422_v33  ;;  %v2368_v33 = vcombine.low %v1203_v24, %v1207_v25  ;;  %v1127_v24 = vld [vmem:[%s3720_s2 + $0x28] sm:$0xff] }
  0x7f   :  { %1956 = vmatprep.subr.bf16.mxu0 %v2431_v34  ;;  %v2377_v34 = vcombine.high %v1211_v30, %v1215_v31  ;;  %v1135_v25 = vld [vmem:[%s3720_s2 + $0x68] sm:$0xff] }
  0x82   :  { %488 = vmatpush1.bf16.xpose.msra.mxu1 %v2513_v35  ;;  %v2538_v35 = vld [vmem:[%s3740_s26 + $0x108] ss:$16 sps:$4 sm:$0xff]  }
  0x83   :  { %498 = vmatprep.subr.bf16.mxu1 %v2516_v38  ;;  %v2543_v38 = vld [vmem:[%s3740_s26 + $0x12c] ss:$16 sps:$4 sm:$0xff]  }
  0x86   :  { %1957 = vmatpush1.bf16.xpose.msra.mxu0 %v2430_v39  ;;  %v2376_v39 = vcombine.low %v1211_v30, %v1215_v31  ;;  %v2567_v31 = vld [vmem:[%s3721_s7 + $0x24] ss:$16 sps:$4 sm:$0xff]  }
  0x87   :  { %1969 = vmatprep.subr.bf16.mxu0 %v2313_v40  ;;  %v2385_v40 = vcombine.high %v1219_v36, %v1223_v37 }
  0x89   :  { %490 = vmatmul.mubr.bf16.vlgmr.msra.gmra.mrb[0].mxu1 %v57_v45  ;;  %v2384_v45 = vcombine.low %v1219_v36, %v1223_v37  ;;  %v1164_v36 = vld [vmem:[%s3741_s9 + $0x90] sm:$0xff] }
  0x8a   :  { %499 = vmatpush1.bf16.xpose.msra.mxu1 %v2514_v46  ;;  %530 = vmatprep.mubr.bf16.mxu1 %v60_v49  ;;  %v2393_v46 = vcombine.high %v1227_v42, %v1231_v43  ;;  %v1239_v49 = vld [vmem:[%s3741_s9 + $0x2e8] sm:$0xff]  ;;  %v1168_v37 = vld [vmem:[%s3741_s9 + $0xb0] sm:$0xff] }
  0x8b   :  { %500 = vmatprep.subr.bf16.mxu1 %v2519_v51  ;;  %v2392_v51 = vcombine.low %v1227_v42, %v1231_v43  ;;  %v1172_v42 = vld [vmem:[%s3741_s9 + $0xd0] sm:$0xff] }
  0x8c   :  { %v1176_v43 = vld [vmem:[%s3741_s9 + $0xf0] sm:$0xff] }
  0x8d   :  { %1959 = vmatmul.mubr.bf16.vlgmr.msra.gmra.mrb[0].mxu0 %v1138_v50  ;;  %v2549_v50 = vld [vmem:[%s3740_s26 + $0x16c] ss:$16 sps:$4 sm:$0xff]  }
  0x8e   :  { %1970 = vmatpush1.bf16.xpose.msra.mxu0 %v2312_v52  ;;  %2001 = vmatprep.mubr.bf16.mxu0 %v1141_v56  ;;  %v2401_v52 = vcombine.high %v1235_v48, %v1239_v49  ;;  %v2552_v56 = vld [vmem:[%s3740_s26 + $0x18c] ss:$16 sps:$4 sm:$0xff]  }
  0x8f   :  { %1971 = vmatprep.subr.bf16.mxu0 %v2321_v53  ;;  %v2547_v53 = vld [vmem:[%s3740_s26 + $0x168] ss:$16 sps:$4 sm:$0xff]  }
  0x92   :  { %501 = vmatpush1.bf16.xpose.msra.mxu1 %v2517_v57  ;;  %v2400_v57 = vcombine.low %v1235_v48, %v1239_v49  ;;  %v1180_v48 = vld [vmem:[%s3741_s9 + $0x110] sm:$0xff] }
  0x93   :  { %502 = vmatprep.subr.bf16.mxu1 %v2522_v59  ;;  %v2550_v59 = vld [vmem:[%s3740_s26 + $0x188] ss:$16 sps:$4 sm:$0xff]   ;;  %v1184_v49 = vld [vmem:[%s3741_s9 + $0x130] sm:$0xff] }
  0x96   :  { %1972 = vmatpush1.bf16.xpose.msra.mxu0 %v2320_v61  ;;  %v1255_v61 = vld [vmem:[%s3741_s9 + $0x368] sm:$0xff] }
  0x97   :  { %1973 = vmatprep.subr.bf16.mxu0 %v2329_v62  ;;  %v2555_v62 = vld [vmem:[%s3740_s26 + $0x1ac] ss:$16 sps:$4 sm:$0xff]   ;;  %v2417_v0 = vcombine.high %v1251_v60, %v1255_v61 }
  0x9a   :  { %503 = vmatpush1.bf16.xpose.msra.mxu1 %v2520_v63  ;;  %v2408_v63 = vcombine.low %v1243_v54, %v1247_v55  ;;  %v1188_v54 = vld [vmem:[%s3741_s9 + $0x150] sm:$0xff] }
  0x9b   :  { %504 = vmatprep.subr.bf16.mxu1 %v2525_v1  ;;  %v2553_v1 = vld [vmem:[%s3740_s26 + $0x1a8] ss:$16 sps:$4 sm:$0xff]   ;;  %v1192_v55 = vld [vmem:[%s3741_s9 + $0x170] sm:$0xff] }
  0x9e   :  { %1974 = vmatpush1.bf16.xpose.msra.mxu0 %v2328_v3  ;;  %v1263_v3 = vld [vmem:[%s3741_s9 + $0x3a8] sm:$0xff] }
  0x9f   :  { %1975 = vmatprep.subr.bf16.mxu0 %v2337_v4  ;;  %v2558_v4 = vld [vmem:[%s3740_s26 + $0x1cc] ss:$16 sps:$4 sm:$0xff]   ;;  %v2425_v6 = vcombine.high %v1259_v2, %v1263_v3 }
  0xa2   :  { %505 = vmatpush1.bf16.xpose.msra.mxu1 %v2523_v5  ;;  %v2416_v5 = vcombine.low %v1251_v60, %v1255_v61  ;;  %v1196_v60 = vld [vmem:[%s3741_s9 + $0x190] sm:$0xff] }
  0xa3   :  { %506 = vmatprep.subr.bf16.mxu1 %v2528_v7  ;;  %v2556_v7 = vld [vmem:[%s3740_s26 + $0x1c8] ss:$16 sps:$4 sm:$0xff]   ;;  %v1200_v61 = vld [vmem:[%s3741_s9 + $0x1b0] sm:$0xff] }
  0xa6   :  { %1976 = vmatpush1.bf16.xpose.msra.mxu0 %v2336_v9  ;;  %v1271_v9 = vld [vmem:[%s3741_s9 + $0x3e8] sm:$0xff] }
  0xa7   :  { %1977 = vmatprep.subr.bf16.mxu0 %v2345_v10  ;;  %v2561_v10 = vld [vmem:[%s3740_s26 + $0x1ec] ss:$16 sps:$4 sm:$0xff]   ;;  %v2433_v12 = vcombine.high %v1267_v8, %v1271_v9 }
  0xaa   :  { %507 = vmatpush1.bf16.xpose.msra.mxu1 %v2526_v11  ;;  %v2424_v11 = vcombine.low %v1259_v2, %v1263_v3  ;;  %v1204_v2 = vld [vmem:[%s3741_s9 + $0x1d0] sm:$0xff] }
  0xab   :  { %508 = vmatprep.subr.bf16.mxu1 %v2531_v14  ;;  %v1148_v14 = vld [vmem:[%s3741_s9 + $0x10] sm:$0xff] }
  0xac   :  { %v1208_v3 = vld [vmem:[%s3741_s9 + $0x1f0] sm:$0xff] }
  0xae   :  { %1978 = vmatpush1.bf16.xpose.msra.mxu0 %v2344_v15  ;;  %v1152_v15 = vld [vmem:[%s3741_s9 + $0x30] sm:$0xff] }
  0xaf   :  { %1979 = vmatprep.subr.bf16.mxu0 %v2353_v16  ;;  %v2564_v16 = vld [vmem:[%s3721_s7 + $0x4] ss:$16 sps:$4 sm:$0xff]   ;;  %v2315_v18 = vcombine.high %v1148_v14, %v1152_v15 }
  0xb2   :  { %509 = vmatpush1.bf16.xpose.msra.mxu1 %v2529_v17  ;;  %v2432_v17 = vcombine.low %v1267_v8, %v1271_v9  ;;  %v1212_v8 = vld [vmem:[%s3741_s9 + $0x210] sm:$0xff] }
  0xb3   :  { %510 = vmatprep.subr.bf16.mxu1 %v2534_v20  ;;  %v1124_v20 = vld [vmem:[%s3720_s2 + $0x10] sm:$0xff] }
  0xb4   :  { %v1216_v9 = vld [vmem:[%s3741_s9 + $0x230] sm:$0xff] }
  0xb6   :  { %1980 = vmatpush1.bf16.xpose.msra.mxu0 %v2352_v21  ;;  %v1132_v21 = vld [vmem:[%s3720_s2 + $0x50] sm:$0xff] }
  0xb7   :  { %1981 = vmatprep.subr.bf16.mxu0 %v2361_v22  ;;  %v59_v22 = vpack.c.bf16 %v55_v19, %v55_v19  ;;  %v1140_v30 = vpack.c.bf16 %v1132_v21, %v1124_v20  ;;  %v2589_v19 = vld [vmem:[%s3721_s7 + $0x120] ss:$16 sps:$4 sm:$0xff]  }
  0xb8   :  { %v1228_v20 = vld [vmem:[%s3741_s9 + $0x290] sm:$0xff] }
  0xb9   :  { %v1232_v21 = vld [vmem:[%s3741_s9 + $0x2b0] sm:$0xff] }
  0xba   :  { %511 = vmatpush1.bf16.xpose.msra.mxu1 %v2532_v23  ;;  %v589_v23 = vld [vmem:[%s3722_s1 + $0x8] sm:$0xff] }
  0xbb   :  { %512 = vmatprep.subr.bf16.mxu1 %v2537_v26  ;;  %v2562_v26 = vld [vmem:[%s3721_s7] ss:$16 sps:$4 sm:$0xff]  }
  0xbe   :  { %1982 = vmatpush1.bf16.xpose.msra.mxu0 %v2360_v27  ;;  %v1156_v27 = vld [vmem:[%s3741_s9 + $0x50] sm:$0xff] }
  0xbf   :  { %1983 = vmatprep.subr.bf16.mxu0 %v2369_v28  ;;  %v1160_v28 = vld [vmem:[%s3741_s9 + $0x70] sm:$0xff] }
  0xc2   :  { %513 = vmatpush1.bf16.xpose.msra.mxu1 %v2535_v29  ;;  %v593_v29 = vpack.c.bf16 %v589_v23, %v589_v23 }
  0xc3   :  { %514 = vmatprep.subr.bf16.mxu1 %v2540_v32  ;;  %v2314_v32 = vcombine.low %v1148_v14, %v1152_v15  ;;  %v1220_v14 = vld [vmem:[%s3741_s9 + $0x250] sm:$0xff] }
  0xc4   :  { %v1224_v15 = vld [vmem:[%s3741_s9 + $0x270] sm:$0xff] }
  0xc5   :  { %v2386_v23 = vcombine.low %v1220_v14, %v1224_v15 }
  0xc6   :  { %1984 = vmatpush1.bf16.xpose.msra.mxu0 %v2368_v33  ;;  %v1143_v33 = vpack.c.bf16 %v1135_v25, %v1127_v24  ;;  %v2395_v24 = vcombine.high %v1228_v20, %v1232_v21  ;;  %v2592_v25 = vld [vmem:[%s3721_s7 + $0x140] ss:$16 sps:$4 sm:$0xff]  }
  0xc7   :  { %1985 = vmatprep.subr.bf16.mxu0 %v2377_v34  ;;  %v2323_v34 = vcombine.high %v1156_v27, %v1160_v28 }
  0xca   :  { %515 = vmatpush1.bf16.xpose.msra.mxu1 %v2538_v35  ;;  %v2565_v35 = vld [vmem:[%s3721_s7 + $0x20] ss:$16 sps:$4 sm:$0xff]  }
  0xcb   :  { %516 = vmatprep.subr.bf16.mxu1 %v2543_v38  ;;  %v2570_v38 = vld [vmem:[%s3721_s7 + $0x44] ss:$16 sps:$4 sm:$0xff]  }
  0xce   :  { %1986 = vmatpush1.bf16.xpose.msra.mxu0 %v2376_v39  ;;  %v2322_v39 = vcombine.low %v1156_v27, %v1160_v28  ;;  %v1240_v27 = vld [vmem:[%s3741_s9 + $0x2f0] sm:$0xff] }
  0xcf   :  { %1987 = vmatprep.subr.bf16.mxu0 %v2385_v40  ;;  %v2331_v40 = vcombine.high %v1164_v36, %v1168_v37  ;;  %v2597_v28 = vld [vmem:[%s3721_s7 + $0x164] ss:$16 sps:$4 sm:$0xff]  }
  0xd2   :  { %517 = vmatpush1.bf16.xpose.msra.mxu1 %v2541_v41  ;;  %v2568_v41 = vld [vmem:[%s3721_s7 + $0x40] ss:$16 sps:$4 sm:$0xff]  }
  0xd3   :  { %518 = vmatprep.subr.bf16.mxu1 %v2546_v44  ;;  %v2573_v44 = vld [vmem:[%s3721_s7 + $0x64] ss:$16 sps:$4 sm:$0xff]  }
  0xd6   :  { %1988 = vmatpush1.bf16.xpose.msra.mxu0 %v2384_v45  ;;  %v2330_v45 = vcombine.low %v1164_v36, %v1168_v37  ;;  %v2598_v37 = vld [vmem:[%s3721_s7 + $0x180] ss:$16 sps:$4 sm:$0xff]  }
  0xd7   :  { %1989 = vmatprep.subr.bf16.mxu0 %v2393_v46  ;;  %v2339_v46 = vcombine.high %v1172_v42, %v1176_v43 }
  0xda   :  { %519 = vmatpush1.bf16.xpose.msra.mxu1 %v2544_v47  ;;  %v2571_v47 = vld [vmem:[%s3721_s7 + $0x60] ss:$16 sps:$4 sm:$0xff]  }
  0xdb   :  { %520 = vmatprep.subr.bf16.mxu1 %v2549_v50  ;;  %v2576_v50 = vld [vmem:[%s3721_s7 + $0x84] ss:$16 sps:$4 sm:$0xff]  }
  0xde   :  { %1990 = vmatpush1.bf16.xpose.msra.mxu0 %v2392_v51  ;;  %v2338_v51 = vcombine.low %v1172_v42, %v1176_v43  ;;  %v2601_v43 = vld [vmem:[%s3721_s7 + $0x1a0] ss:$16 sps:$4 sm:$0xff]  }
  0xdf   :  { %1991 = vmatprep.subr.bf16.mxu0 %v2401_v52  ;;  %v2347_v52 = vcombine.high %v1180_v48, %v1184_v49 }
  0xe2   :  { %521 = vmatpush1.bf16.xpose.msra.mxu1 %v2547_v53  ;;  %v2574_v53 = vld [vmem:[%s3721_s7 + $0x80] ss:$16 sps:$4 sm:$0xff]  }
  0xe3   :  { %522 = vmatprep.subr.bf16.mxu1 %v2552_v56  ;;  %v2579_v56 = vld [vmem:[%s3721_s7 + $0xa4] ss:$16 sps:$4 sm:$0xff]  }
  0xe6   :  { %1992 = vmatpush1.bf16.xpose.msra.mxu0 %v2400_v57  ;;  %v2346_v57 = vcombine.low %v1180_v48, %v1184_v49  ;;  %v2604_v49 = vld [vmem:[%s3721_s7 + $0x1c0] ss:$16 sps:$4 sm:$0xff]  }
  0xe7   :  { %1993 = vmatprep.subr.bf16.mxu0 %v2409_v58  ;;  %v2355_v58 = vcombine.high %v1188_v54, %v1192_v55 }
  0xea   :  { %523 = vmatpush1.bf16.xpose.msra.mxu1 %v2550_v59  ;;  %v2577_v59 = vld [vmem:[%s3721_s7 + $0xa0] ss:$16 sps:$4 sm:$0xff]  }
  0xeb   :  { %524 = vmatprep.subr.bf16.mxu1 %v2555_v62  ;;  %v2582_v62 = vld [vmem:[%s3721_s7 + $0xc4] ss:$16 sps:$4 sm:$0xff]  }
  0xee   :  { %1994 = vmatpush1.bf16.xpose.msra.mxu0 %v2408_v63  ;;  %v2354_v63 = vcombine.low %v1188_v54, %v1192_v55  ;;  %v2607_v55 = vld [vmem:[%s3721_s7 + $0x1e0] ss:$16 sps:$4 sm:$0xff]  }
  0xef   :  { %1995 = vmatprep.subr.bf16.mxu0 %v2417_v0  ;;  %v2363_v0 = vcombine.high %v1196_v60, %v1200_v61 }
  0xf2   :  { %525 = vmatpush1.bf16.xpose.msra.mxu1 %v2553_v1  ;;  %v2580_v1 = vld [vmem:[%s3721_s7 + $0xc0] ss:$16 sps:$4 sm:$0xff]  }
  0xf3   :  { %526 = vmatprep.subr.bf16.mxu1 %v2558_v4  ;;  %v2585_v4 = vld [vmem:[%s3721_s7 + $0xe4] ss:$16 sps:$4 sm:$0xff]  }
  0xf6   :  { %1996 = vmatpush1.bf16.xpose.msra.mxu0 %v2416_v5  ;;  %v2362_v5 = vcombine.low %v1196_v60, %v1200_v61  ;;  %v588_v61 = vld [vmem:[%s3722_s1] sm:$0xff] }
  0xf7   :  { %1997 = vmatprep.subr.bf16.mxu0 %v2425_v6  ;;  %v2371_v6 = vcombine.high %v1204_v2, %v1208_v3 }
  0xfa   :  { %527 = vmatpush1.bf16.xpose.msra.mxu1 %v2556_v7  ;;  %v2583_v7 = vld [vmem:[%s3721_s7 + $0xe0] ss:$16 sps:$4 sm:$0xff]  }
  0xfb   :  { %528 = vmatprep.subr.bf16.mxu1 %v2561_v10  ;;  %v2588_v10 = vld [vmem:[%s3721_s7 + $0x104] ss:$16 sps:$4 sm:$0xff]  }
  0xfe   :  { %1998 = vmatpush1.bf16.xpose.msra.mxu0 %v2424_v11  ;;  %v2370_v11 = vcombine.low %v1204_v2, %v1208_v3  ;;  %v1129_v2 = vld [vmem:[%s3720_s2 + $0x38] sm:$0xff] }
  0xff   :  { %1999 = vmatprep.subr.bf16.mxu0 %v2433_v12  ;;  %v2379_v12 = vcombine.high %v1212_v8, %v1216_v9  ;;  %v1137_v3 = vld [vmem:[%s3720_s2 + $0x78] sm:$0xff] }
 0x102   :  { %529 = vmatpush1.bf16.xpose.msra.mxu1 %v2559_v13  ;;  %v2586_v13 = vld [vmem:[%s3721_s7 + $0x100] ss:$16 sps:$4 sm:$0xff]  }
 0x103   :  { %992 = vmatprep.subr.bf16.mxu1 %v2564_v16  ;;  %v2591_v16 = vld [vmem:[%s3721_s7 + $0x124] ss:$16 sps:$4 sm:$0xff]  }
 0x106   :  { %2000 = vmatpush1.bf16.xpose.msra.mxu0 %v2432_v17  ;;  %v2378_v17 = vcombine.low %v1212_v8, %v1216_v9  ;;  %v2615_v9 = vld [vmem:[%s3721_s7 + $0x2c] ss:$16 sps:$4 sm:$0xff]  }
 0x107   :  { %2012 = vmatprep.subr.bf16.mxu0 %v2315_v18  ;;  %v2387_v18 = vcombine.high %v1220_v14, %v1224_v15  ;;  %v1165_v14 = vld [vmem:[%s3741_s9 + $0x98] sm:$0xff] }
 0x108   :  { %v1169_v15 = vld [vmem:[%s3741_s9 + $0xb8] sm:$0xff] }
 0x109   :  { %531 = vmatmul.mubr.bf16.vlgmr.msra.gmra.mrb[0].mxu1 %v59_v22  ;;  %v2594_v22 = vld [vmem:[%s3721_s7 + $0x144] ss:$16 sps:$4 sm:$0xff]  }
 0x10a   :  { %993 = vmatpush1.bf16.xpose.msra.mxu1 %v2562_v26  ;;  %1024 = vmatprep.mubr.bf16.mxu1 %v593_v29  ;;  %v1236_v26 = vld [vmem:[%s3741_s9 + $0x2d0] sm:$0xff]  ;;  %v2394_v29 = vcombine.low %v1228_v20, %v1232_v21  ;;  %v1173_v20 = vld [vmem:[%s3741_s9 + $0xd8] sm:$0xff] }
 0x10b   :  { %994 = vmatprep.subr.bf16.mxu1 %v2567_v31  ;;  %v2595_v31 = vld [vmem:[%s3721_s7 + $0x160] ss:$16 sps:$4 sm:$0xff]   ;;  %v1177_v21 = vld [vmem:[%s3741_s9 + $0xf8] sm:$0xff] }
 0x10d   :  { %2002 = vmatmul.mubr.bf16.vlgmr.msra.gmra.mrb[0].mxu0 %v1140_v30  ;;  %v2403_v30 = vcombine.high %v1236_v26, %v1240_v27 }
 0x10e   :  { %2013 = vmatpush1.bf16.xpose.msra.mxu0 %v2314_v32  ;;  %2044 = vmatprep.mubr.bf16.mxu0 %v1143_v33  ;;  %v1244_v32 = vld [vmem:[%s3741_s9 + $0x310] sm:$0xff] }
 0x10f   :  { %2014 = vmatprep.subr.bf16.mxu0 %v2323_v34  ;;  %v1248_v33 = vld [vmem:[%s3741_s9 + $0x330] sm:$0xff] }
 0x110   :  { %v2600_v34 = vld [vmem:[%s3721_s7 + $0x184] ss:$16 sps:$4 sm:$0xff]   ;;  %v2411_v36 = vcombine.high %v1244_v32, %v1248_v33 }
 0x112   :  { %995 = vmatpush1.bf16.xpose.msra.mxu1 %v2565_v35  ;;  %v2402_v35 = vcombine.low %v1236_v26, %v1240_v27  ;;  %v1181_v26 = vld [vmem:[%s3741_s9 + $0x118] sm:$0xff] }
 0x113   :  { %996 = vmatprep.subr.bf16.mxu1 %v2570_v38  ;;  %v1252_v38 = vld [vmem:[%s3741_s9 + $0x350] sm:$0xff]  ;;  %v1185_v27 = vld [vmem:[%s3741_s9 + $0x138] sm:$0xff] }
 0x116   :  { %2015 = vmatpush1.bf16.xpose.msra.mxu0 %v2322_v39  ;;  %v1256_v39 = vld [vmem:[%s3741_s9 + $0x370] sm:$0xff] }
 0x117   :  { %2016 = vmatprep.subr.bf16.mxu0 %v2331_v40  ;;  %v2603_v40 = vld [vmem:[%s3721_s7 + $0x1a4] ss:$16 sps:$4 sm:$0xff]   ;;  %v2419_v42 = vcombine.high %v1252_v38, %v1256_v39 }
 0x11a   :  { %997 = vmatpush1.bf16.xpose.msra.mxu1 %v2568_v41  ;;  %v2410_v41 = vcombine.low %v1244_v32, %v1248_v33  ;;  %v1189_v32 = vld [vmem:[%s3741_s9 + $0x158] sm:$0xff] }
 0x11b   :  { %998 = vmatprep.subr.bf16.mxu1 %v2573_v44  ;;  %v1260_v44 = vld [vmem:[%s3741_s9 + $0x390] sm:$0xff]  ;;  %v1193_v33 = vld [vmem:[%s3741_s9 + $0x178] sm:$0xff] }
 0x11e   :  { %2017 = vmatpush1.bf16.xpose.msra.mxu0 %v2330_v45  ;;  %v1264_v45 = vld [vmem:[%s3741_s9 + $0x3b0] sm:$0xff] }
 0x11f   :  { %2018 = vmatprep.subr.bf16.mxu0 %v2339_v46  ;;  %v2606_v46 = vld [vmem:[%s3721_s7 + $0x1c4] ss:$16 sps:$4 sm:$0xff]   ;;  %v2427_v48 = vcombine.high %v1260_v44, %v1264_v45 }
 0x122   :  { %999 = vmatpush1.bf16.xpose.msra.mxu1 %v2571_v47  ;;  %v2418_v47 = vcombine.low %v1252_v38, %v1256_v39  ;;  %v1197_v38 = vld [vmem:[%s3741_s9 + $0x198] sm:$0xff] }
 0x123   :  { %1000 = vmatprep.subr.bf16.mxu1 %v2576_v50  ;;  %v1268_v50 = vld [vmem:[%s3741_s9 + $0x3d0] sm:$0xff]  ;;  %v1201_v39 = vld [vmem:[%s3741_s9 + $0x1b8] sm:$0xff] }
 0x126   :  { %2019 = vmatpush1.bf16.xpose.msra.mxu0 %v2338_v51  ;;  %v1272_v51 = vld [vmem:[%s3741_s9 + $0x3f0] sm:$0xff] }
 0x127   :  { %2020 = vmatprep.subr.bf16.mxu0 %v2347_v52  ;;  %v2609_v52 = vld [vmem:[%s3721_s7 + $0x1e4] ss:$16 sps:$4 sm:$0xff]   ;;  %v2435_v54 = vcombine.high %v1268_v50, %v1272_v51 }
 0x12a   :  { %1001 = vmatpush1.bf16.xpose.msra.mxu1 %v2574_v53  ;;  %v2426_v53 = vcombine.low %v1260_v44, %v1264_v45  ;;  %v1205_v44 = vld [vmem:[%s3741_s9 + $0x1d8] sm:$0xff] }
 0x12b   :  { %1002 = vmatprep.subr.bf16.mxu1 %v2579_v56  ;;  %v1149_v56 = vld [vmem:[%s3741_s9 + $0x18] sm:$0xff] }
 0x12c   :  { %v1209_v45 = vld [vmem:[%s3741_s9 + $0x1f8] sm:$0xff] }
 0x12e   :  { %2021 = vmatpush1.bf16.xpose.msra.mxu0 %v2346_v57  ;;  %v1153_v57 = vld [vmem:[%s3741_s9 + $0x38] sm:$0xff] }
 0x12f   :  { %2022 = vmatprep.subr.bf16.mxu0 %v2355_v58  ;;  %v2612_v58 = vld [vmem:[%s3721_s7 + $0xc] ss:$16 sps:$4 sm:$0xff]   ;;  %v2317_v60 = vcombine.high %v1149_v56, %v1153_v57 }
 0x132   :  { %1003 = vmatpush1.bf16.xpose.msra.mxu1 %v2577_v59  ;;  %v2434_v59 = vcombine.low %v1268_v50, %v1272_v51  ;;  %v1213_v50 = vld [vmem:[%s3741_s9 + $0x218] sm:$0xff] }
 0x133   :  { %1004 = vmatprep.subr.bf16.mxu1 %v2582_v62  ;;  %v1126_v62 = vld [vmem:[%s3720_s2 + $0x20] sm:$0xff]  ;;  %v1217_v51 = vld [vmem:[%s3741_s9 + $0x238] sm:$0xff] }
 0x136   :  { %2023 = vmatpush1.bf16.xpose.msra.mxu0 %v2354_v63  ;;  %v1134_v63 = vld [vmem:[%s3720_s2 + $0x60] sm:$0xff] }
 0x137   :  { %2024 = vmatprep.subr.bf16.mxu0 %v2363_v0  ;;  %v591_v0 = vld [vmem:[%s3722_s1 + $0x18] sm:$0xff]  ;;  %v1142_v8 = vpack.c.bf16 %v1134_v63, %v1126_v62 }
 0x138   :  { %v2637_v62 = vld [vmem:[%s3721_s7 + $0x128] ss:$16 sps:$4 sm:$0xff]  }
 0x139   :  { %v1229_v63 = vld [vmem:[%s3741_s9 + $0x298] sm:$0xff] }
 0x13a   :  { %1005 = vmatpush1.bf16.xpose.msra.mxu1 %v2580_v1  ;;  %v592_v1 = vpack.c.bf16 %v588_v61, %v588_v61  ;;  %v127_v61 = vlaneseq }
 0x13b   :  { %1006 = vmatprep.subr.bf16.mxu1 %v2585_v4  ;;  %v2610_v4 = vld [vmem:[%s3721_s7 + $0x8] ss:$16 sps:$4 sm:$0xff]  }
 0x13e   :  { %2025 = vmatpush1.bf16.xpose.msra.mxu0 %v2362_v5  ;;  %v1157_v5 = vld [vmem:[%s3741_s9 + $0x58] sm:$0xff] }
 0x13f   :  { %2026 = vmatprep.subr.bf16.mxu0 %v2371_v6  ;;  %v1161_v6 = vld [vmem:[%s3741_s9 + $0x78] sm:$0xff] }
 0x142   :  { %1007 = vmatpush1.bf16.xpose.msra.mxu1 %v2583_v7  ;;  %v595_v7 = vpack.c.bf16 %v591_v0, %v591_v0  ;;  %v1233_v0 = vld [vmem:[%s3741_s9 + $0x2b8] sm:$0xff] }
 0x143   :  { %1008 = vmatprep.subr.bf16.mxu1 %v2588_v10  ;;  %v2316_v10 = vcombine.low %v1149_v56, %v1153_v57  ;;  %v1221_v56 = vld [vmem:[%s3741_s9 + $0x258] sm:$0xff] }
 0x144   :  { %v1225_v57 = vld [vmem:[%s3741_s9 + $0x278] sm:$0xff] }
 0x146   :  { %2027 = vmatpush1.bf16.xpose.msra.mxu0 %v2370_v11  ;;  %v1145_v11 = vpack.c.bf16 %v1137_v3, %v1129_v2  ;;  %v2388_v2 = vcombine.low %v1221_v56, %v1225_v57  ;;  %v2397_v3 = vcombine.high %v1229_v63, %v1233_v0 }
 0x147   :  { %2028 = vmatprep.subr.bf16.mxu0 %v2379_v12  ;;  %v2325_v12 = vcombine.high %v1157_v5, %v1161_v6 }
 0x14a   :  { %1009 = vmatpush1.bf16.xpose.msra.mxu1 %v2586_v13  ;;  %v2613_v13 = vld [vmem:[%s3721_s7 + $0x28] ss:$16 sps:$4 sm:$0xff]  }
 0x14b   :  { %1010 = vmatprep.subr.bf16.mxu1 %v2591_v16  ;;  %v2618_v16 = vld [vmem:[%s3721_s7 + $0x4c] ss:$16 sps:$4 sm:$0xff]  }
 0x14e   :  { %2029 = vmatpush1.bf16.xpose.msra.mxu0 %v2378_v17  ;;  %v2324_v17 = vcombine.low %v1157_v5, %v1161_v6  ;;  %v2640_v5 = vld [vmem:[%s3721_s7 + $0x148] ss:$16 sps:$4 sm:$0xff]  }
 0x14f   :  { %2030 = vmatprep.subr.bf16.mxu0 %v2387_v18  ;;  %v2333_v18 = vcombine.high %v1165_v14, %v1169_v15 }
 0x152   :  { %1011 = vmatpush1.bf16.xpose.msra.mxu1 %v2589_v19  ;;  %v2616_v19 = vld [vmem:[%s3721_s7 + $0x48] ss:$16 sps:$4 sm:$0xff]  }
 0x153   :  { %1012 = vmatprep.subr.bf16.mxu1 %v2594_v22  ;;  %v2621_v22 = vld [vmem:[%s3721_s7 + $0x6c] ss:$16 sps:$4 sm:$0xff]  }
 0x156   :  { %2031 = vmatpush1.bf16.xpose.msra.mxu0 %v2386_v23  ;;  %v2332_v23 = vcombine.low %v1165_v14, %v1169_v15 }
 0x157   :  { %2032 = vmatprep.subr.bf16.mxu0 %v2395_v24  ;;  %v2341_v24 = vcombine.high %v1173_v20, %v1177_v21 }
 0x15a   :  { %1013 = vmatpush1.bf16.xpose.msra.mxu1 %v2592_v25  ;;  %v2619_v25 = vld [vmem:[%s3721_s7 + $0x68] ss:$16 sps:$4 sm:$0xff]  }
 0x15b   :  { %1014 = vmatprep.subr.bf16.mxu1 %v2597_v28  ;;  %v2624_v28 = vld [vmem:[%s3721_s7 + $0x8c] ss:$16 sps:$4 sm:$0xff]  }
 0x15e   :  { %2033 = vmatpush1.bf16.xpose.msra.mxu0 %v2394_v29  ;;  %v2340_v29 = vcombine.low %v1173_v20, %v1177_v21  ;;  %v2643_v21 = vld [vmem:[%s3721_s7 + $0x168] ss:$16 sps:$4 sm:$0xff]  }
 0x15f   :  { %2034 = vmatprep.subr.bf16.mxu0 %v2403_v30  ;;  %v2349_v30 = vcombine.high %v1181_v26, %v1185_v27 }
 0x162   :  { %1015 = vmatpush1.bf16.xpose.msra.mxu1 %v2595_v31  ;;  %v2622_v31 = vld [vmem:[%s3721_s7 + $0x88] ss:$16 sps:$4 sm:$0xff]  }
 0x163   :  { %1016 = vmatprep.subr.bf16.mxu1 %v2600_v34  ;;  %v2627_v34 = vld [vmem:[%s3721_s7 + $0xac] ss:$16 sps:$4 sm:$0xff]  }
 0x166   :  { %2035 = vmatpush1.bf16.xpose.msra.mxu0 %v2402_v35  ;;  %v2348_v35 = vcombine.low %v1181_v26, %v1185_v27 }
 0x167   :  { %2036 = vmatprep.subr.bf16.mxu0 %v2411_v36  ;;  %v2357_v36 = vcombine.high %v1189_v32, %v1193_v33 }
 0x16a   :  { %1017 = vmatpush1.bf16.xpose.msra.mxu1 %v2598_v37  ;;  %v2625_v37 = vld [vmem:[%s3721_s7 + $0xa8] ss:$16 sps:$4 sm:$0xff]  }
 0x16b   :  { %1018 = vmatprep.subr.bf16.mxu1 %v2603_v40  ;;  %v2630_v40 = vld [vmem:[%s3721_s7 + $0xcc] ss:$16 sps:$4 sm:$0xff]  }
 0x16e   :  { %2037 = vmatpush1.bf16.xpose.msra.mxu0 %v2410_v41  ;;  %v2356_v41 = vcombine.low %v1189_v32, %v1193_v33  ;;  %v2651_v32 = vld [vmem:[%s3721_s7 + $0x1ac] ss:$16 sps:$4 sm:$0xff]  }
 0x16f   :  { %2038 = vmatprep.subr.bf16.mxu0 %v2419_v42  ;;  %v2365_v42 = vcombine.high %v1197_v38, %v1201_v39 }
 0x172   :  { %1019 = vmatpush1.bf16.xpose.msra.mxu1 %v2601_v43  ;;  %v2628_v43 = vld [vmem:[%s3721_s7 + $0xc8] ss:$16 sps:$4 sm:$0xff]  }
 0x173   :  { %1020 = vmatprep.subr.bf16.mxu1 %v2606_v46  ;;  %v2633_v46 = vld [vmem:[%s3721_s7 + $0xec] ss:$16 sps:$4 sm:$0xff]  }
 0x176   :  { %2039 = vmatpush1.bf16.xpose.msra.mxu0 %v2418_v47  ;;  %v2364_v47 = vcombine.low %v1197_v38, %v1201_v39  ;;  %v2654_v38 = vld [vmem:[%s3721_s7 + $0x1cc] ss:$16 sps:$4 sm:$0xff]  }
 0x177   :  { %2040 = vmatprep.subr.bf16.mxu0 %v2427_v48  ;;  %v2373_v48 = vcombine.high %v1205_v44, %v1209_v45 }
 0x17a   :  { %1021 = vmatpush1.bf16.xpose.msra.mxu1 %v2604_v49  ;;  %v2631_v49 = vld [vmem:[%s3721_s7 + $0xe8] ss:$16 sps:$4 sm:$0xff]  }
 0x17b   :  { %1022 = vmatprep.subr.bf16.mxu1 %v2609_v52  ;;  %v2636_v52 = vld [vmem:[%s3721_s7 + $0x10c] ss:$16 sps:$4 sm:$0xff]  }
 0x17e   :  { %2041 = vmatpush1.bf16.xpose.msra.mxu0 %v2426_v53  ;;  %v2372_v53 = vcombine.low %v1205_v44, %v1209_v45  ;;  %v2657_v44 = vld [vmem:[%s3721_s7 + $0x1ec] ss:$16 sps:$4 sm:$0xff]  }
 0x17f   :  { %2042 = vmatprep.subr.bf16.mxu0 %v2435_v54  ;;  %v2381_v54 = vcombine.high %v1213_v50, %v1217_v51 }
 0x182   :  { %1023 = vmatpush1.bf16.xpose.msra.mxu1 %v2607_v55  ;;  %v2634_v55 = vld [vmem:[%s3721_s7 + $0x108] ss:$16 sps:$4 sm:$0xff]  }
 0x183   :  { %1033 = vmatprep.subr.bf16.mxu1 %v2612_v58  ;;  %v2639_v58 = vld [vmem:[%s3721_s7 + $0x12c] ss:$16 sps:$4 sm:$0xff]  }
 0x186   :  { %2043 = vmatpush1.bf16.xpose.msra.mxu0 %v2434_v59  ;;  %v2380_v59 = vcombine.low %v1213_v50, %v1217_v51  ;;  %v1128_v50 = vld [vmem:[%s3720_s2 + $0x30] sm:$0xff] }
 0x187   :  { %2055 = vmatprep.subr.bf16.mxu0 %v2317_v60  ;;  %v2389_v60 = vcombine.high %v1221_v56, %v1225_v57  ;;  %v1136_v51 = vld [vmem:[%s3720_s2 + $0x70] sm:$0xff]  ;;  %v1274_v57 = vld [vmem:[%s3725_s12] sm:$0x3] }
 0x189   :  { %1025 = vmatmul.mubr.bf16.vlgmr.msra.gmra.mrb[4].mxu1 %v592_v1  ;;  %v2642_v1 = vld [vmem:[%s3721_s7 + $0x14c] ss:$16 sps:$4 sm:$0xff]  }
 0x18a   :  { %1034 = vmatpush1.bf16.xpose.msra.mxu1 %v2610_v4  ;;  %1065 = vmatprep.mubr.bf16.mxu1 %v595_v7  ;;  %v128_v4 = vshrl.u32 %v127_v61, 7  ;;  %v125_v7 = vld [vmem:[%s3723_s4] sm:$0x3] }
 0x18b   :  { %1035 = vmatprep.subr.bf16.mxu1 %v2615_v9  ;;  %v1237_v9 = vld [vmem:[%s3741_s9 + $0x2d8] sm:$0xff] }
 0x18c   :  { %v3527_v6 = vsub.s32 0, %v128_v4 }
 0x18d   :  { %2045 = vmatmul.mubr.bf16.vlgmr.msra.gmra.mrb[0].mxu0 %v1142_v8  ;;  %v3532_v8 = vsub.s32 1, %v128_v4 }
 0x18e   :  { %2056 = vmatpush1.bf16.xpose.msra.mxu0 %v2316_v10  ;;  %2087 = vmatprep.mubr.bf16.mxu0 %v1145_v11  ;;  %v1241_v10 = vld [vmem:[%s3741_s9 + $0x2f8] sm:$0xff] }
 0x18f   :  { %2057 = vmatprep.subr.bf16.mxu0 %v2325_v12  ;;  %v2645_v11 = vld [vmem:[%s3721_s7 + $0x16c] ss:$16 sps:$4 sm:$0xff]   ;;  %v2396_v12 = vcombine.low %v1229_v63, %v1233_v0  ;;  %v2405_v14 = vcombine.high %v1237_v9, %v1241_v10  ;;  %v134_v15 = vrot.slane %v125_v7, %v3532_v8  ;;  %v2404_v26 = vcombine.low %v1237_v9, %v1241_v10 }
 0x190   :  { %v1283_v0 = vrot.slane %v1274_v57, %v3532_v8 }
 0x192   :  { %1036 = vmatpush1.bf16.xpose.msra.mxu1 %v2613_v13  ;;  %v130_v13 = vrot.slane %v125_v7, %v3527_v6 }
 0x193   :  { %1037 = vmatprep.subr.bf16.mxu1 %v2618_v16 }
 0x196   :  { %2058 = vmatpush1.bf16.xpose.msra.mxu0 %v2324_v17 }
 0x197   :  { %2059 = vmatprep.subr.bf16.mxu0 %v2333_v18 }
 0x19a   :  { %1038 = vmatpush1.bf16.xpose.msra.mxu1 %v2616_v19 }
 0x19b   :  { %1039 = vmatprep.subr.bf16.mxu1 %v2621_v22  ;;  %v1245_v22 = vld [vmem:[%s3741_s9 + $0x318] sm:$0xff] }
 0x19e   :  { %2060 = vmatpush1.bf16.xpose.msra.mxu0 %v2332_v23  ;;  %v1249_v23 = vld [vmem:[%s3741_s9 + $0x338] sm:$0xff] }
 0x19f   :  { %2061 = vmatprep.subr.bf16.mxu0 %v2341_v24  ;;  %v2412_v33 = vcombine.low %v1245_v22, %v1249_v23 }
 0x1a2   :  { %1040 = vmatpush1.bf16.xpose.msra.mxu1 %v2619_v25  ;;  %v2648_v25 = vld [vmem:[%s3721_s7 + $0x18c] ss:$16 sps:$4 sm:$0xff]  }
 0x1a3   :  { %1041 = vmatprep.subr.bf16.mxu1 %v2624_v28  ;;  %v2413_v28 = vcombine.high %v1245_v22, %v1249_v23 }
 0x1a6   :  { %2062 = vmatpush1.bf16.xpose.msra.mxu0 %v2340_v29  ;;  %v2646_v29 = vld [vmem:[%s3721_s7 + $0x188] ss:$16 sps:$4 sm:$0xff]  }
 0x1a7   :  { %2063 = vmatprep.subr.bf16.mxu0 %v2349_v30  ;;  %v1253_v30 = vld [vmem:[%s3741_s9 + $0x358] sm:$0xff] }
 0x1aa   :  { %1042 = vmatpush1.bf16.xpose.msra.mxu1 %v2622_v31  ;;  %v1257_v31 = vld [vmem:[%s3741_s9 + $0x378] sm:$0xff] }
 0x1ab   :  { %1043 = vmatprep.subr.bf16.mxu1 %v2627_v34  ;;  %v2421_v34 = vcombine.high %v1253_v30, %v1257_v31  ;;  %v2420_v39 = vcombine.low %v1253_v30, %v1257_v31 }
 0x1ae   :  { %2064 = vmatpush1.bf16.xpose.msra.mxu0 %v2348_v35  ;;  %v2649_v35 = vld [vmem:[%s3721_s7 + $0x1a8] ss:$16 sps:$4 sm:$0xff]  }
 0x1af   :  { %2065 = vmatprep.subr.bf16.mxu0 %v2357_v36  ;;  %v1261_v36 = vld [vmem:[%s3741_s9 + $0x398] sm:$0xff] }
 0x1b2   :  { %1044 = vmatpush1.bf16.xpose.msra.mxu1 %v2625_v37  ;;  %v1265_v37 = vld [vmem:[%s3741_s9 + $0x3b8] sm:$0xff] }
 0x1b3   :  { %1045 = vmatprep.subr.bf16.mxu1 %v2630_v40  ;;  %v2429_v40 = vcombine.high %v1261_v36, %v1265_v37  ;;  %v2428_v45 = vcombine.low %v1261_v36, %v1265_v37 }
 0x1b6   :  { %2066 = vmatpush1.bf16.xpose.msra.mxu0 %v2356_v41  ;;  %v2652_v41 = vld [vmem:[%s3721_s7 + $0x1c8] ss:$16 sps:$4 sm:$0xff]  }
 0x1b7   :  { %2067 = vmatprep.subr.bf16.mxu0 %v2365_v42  ;;  %v1269_v42 = vld [vmem:[%s3741_s9 + $0x3d8] sm:$0xff] }
 0x1ba   :  { %1046 = vmatpush1.bf16.xpose.msra.mxu1 %v2628_v43  ;;  %v1273_v43 = vld [vmem:[%s3741_s9 + $0x3f8] sm:$0xff] }
 0x1bb   :  { %1047 = vmatprep.subr.bf16.mxu1 %v2633_v46  ;;  %v2437_v46 = vcombine.high %v1269_v42, %v1273_v43 }
 0x1be   :  { %2068 = vmatpush1.bf16.xpose.msra.mxu0 %v2364_v47  ;;  %v2655_v47 = vld [vmem:[%s3721_s7 + $0x1e8] ss:$16 sps:$4 sm:$0xff]  }
 0x1bf   :  { %2069 = vmatprep.subr.bf16.mxu0 %v2373_v48  ;;  %v2436_v48 = vcombine.low %v1269_v42, %v1273_v43 }
 0x1c2   :  { %1048 = vmatpush1.bf16.xpose.msra.mxu1 %v2631_v49  ;;  %v590_v49 = vld [vmem:[%s3722_s1 + $0x10] sm:$0xff] }
 0x1c3   :  { %1049 = vmatprep.subr.bf16.mxu1 %v2636_v52  ;;  %v594_v52 = vpack.c.bf16 %v590_v49, %v590_v49 }
 0x1c6   :  { %2070 = vmatpush1.bf16.xpose.msra.mxu0 %v2372_v53  ;;  %v1144_v53 = vpack.c.bf16 %v1136_v51, %v1128_v50 }
 0x1c7   :  { %2071 = vmatprep.subr.bf16.mxu0 %v2381_v54 }
 0x1ca   :  { %1050 = vmatpush1.bf16.xpose.msra.mxu1 %v2634_v55  ;;  %v660_v55 = vld [vmem:[%s3724_s8] sm:$0x3] }
 0x1cb   :  { %1051 = vmatprep.subr.bf16.mxu1 %v2639_v58  ;;  %v665_v58 = vrot.slane %v660_v55, %v3527_v6 }
 0x1ce   :  { %2072 = vmatpush1.bf16.xpose.msra.mxu0 %v2380_v59  ;;  %v669_v59 = vrot.slane %v660_v55, %v3532_v8 }
 0x1cf   :  { %2073 = vmatprep.subr.bf16.mxu0 %v2389_v60  ;;  %v1279_v60 = vrot.slane %v1274_v57, %v3527_v6 }
 0x1d2   :  { %1052 = vmatpush1.bf16.xpose.msra.mxu1 %v2637_v62 }
 0x1d3   :  { %1053 = vmatprep.subr.bf16.mxu1 %v2642_v1 }
 0x1d6   :  { %2074 = vmatpush1.bf16.xpose.msra.mxu0 %v2388_v2 }
 0x1d7   :  { %2075 = vmatprep.subr.bf16.mxu0 %v2397_v3 }
 0x1da   :  { %1054 = vmatpush1.bf16.xpose.msra.mxu1 %v2640_v5 }
 0x1db   :  { %1055 = vmatprep.subr.bf16.mxu1 %v2645_v11 }
 0x1dc   :  { %v532_v16 = vpop.f32.mrb[0].mxu1 }
 0x1dd   :  { %v3545_v17 = vadd.f32 %v532_v16, %v130_v13  ;;  %v534_v18 = vpop.f32.mrb[1].mxu1 }
 0x1de   :  { %2076 = vmatpush1.bf16.xpose.msra.mxu0 %v2396_v12  ;;  %v3547_v19 = vadd.f32 %v534_v18, %v134_v15  ;;  %v536_v20 = vpop.f32.mrb[2].mxu1 }
 0x1df   :  { %2077 = vmatprep.subr.bf16.mxu0 %v2405_v14  ;;  %v537_v24 = vpop.f32.mrb[3].mxu1 }
 0x1e0   :  { %v539_v27 = vadd.f32 %v3547_v19, %v3545_v17 }
 0x1e2   :  { %1056 = vmatpush1.bf16.xpose.msra.mxu1 %v2643_v21  ;;  %540 = vadd.xlane.f32.xlu0 %v539_v27 }
 0x1e3   :  { %1057 = vmatprep.subr.bf16.mxu1 %v2648_v25 }
 0x1e6   :  { %2078 = vmatpush1.bf16.xpose.msra.mxu0 %v2404_v26 }
 0x1e7   :  { %2079 = vmatprep.subr.bf16.mxu0 %v2413_v28 }
 0x1ea   :  { %1058 = vmatpush1.bf16.xpose.msra.mxu1 %v2646_v29 }
 0x1eb   :  { %1059 = vmatprep.subr.bf16.mxu1 %v2651_v32 }
 0x1ee   :  { %2080 = vmatpush1.bf16.xpose.msra.mxu0 %v2412_v33 }
 0x1ef   :  { %2081 = vmatprep.subr.bf16.mxu0 %v2421_v34 }
 0x1f2   :  { %1060 = vmatpush1.bf16.xpose.msra.mxu1 %v2649_v35 }
 0x1f3   :  { %1061 = vmatprep.subr.bf16.mxu1 %v2654_v38 }
 0x1f6   :  { %2082 = vmatpush1.bf16.xpose.msra.mxu0 %v2420_v39 }
 0x1f7   :  { %2083 = vmatprep.subr.bf16.mxu0 %v2429_v40 }
 0x1fa   :  { %1062 = vmatpush1.bf16.xpose.msra.mxu1 %v2652_v41 }
 0x1fb   :  { %1063 = vmatprep.subr.bf16.mxu1 %v2657_v44 }
 0x1fe   :  { %2084 = vmatpush1.bf16.xpose.msra.mxu0 %v2428_v45 }
 0x1ff   :  { %2085 = vmatprep.subr.bf16.mxu0 %v2437_v46  ;;  %v556_v46 = vld [vmem:[%s3726_s5] sm:$0x3] }
 0x200   :  { %v565_v49 = vrot.slane %v556_v46, %v3532_v8 }
 0x202   :  { %1064 = vmatpush1.bf16.xpose.msra.mxu1 %v2655_v47  ;;  %v570_v47 = vld [vmem:[%s3727_s6] sm:$0x3] }
 0x203   :  { %v575_v51 = vrot.slane %v570_v47, %v3527_v6 }
 0x206   :  { %2086 = vmatpush1.bf16.xpose.msra.mxu0 %v2436_v48  ;;  %v561_v48 = vrot.slane %v556_v46, %v3527_v6 }
 0x209   :  { %1066 = vmatmul.mubr.bf16.vlgmr.msra.gmra.mrb[4].mxu1 %v594_v52  ;;  %v579_v52 = vrot.slane %v570_v47, %v3532_v8 }
 0x20d   :  { %2088 = vmatmul.mubr.bf16.vlgmr.msra.gmra.mrb[0].mxu0 %v1144_v53 }
 0x26f   :  { %v541_v54 = vpop.xlane.xlu0 %540 }
 0x270   :  { %v543_v56 = vmul.f32 0.00390625, %v541_v54 }
 0x272   :  { %v3621_v61 = vsub.f32 %v3545_v17, %v543_v56  ;;  %v3624_v62 = vsub.f32 %v3547_v19, %v543_v56 }
 0x274   :  { %v546_v14 = vmul.f32 %v3621_v61, %v3621_v61  ;;  %v547_v15 = vmul.f32 %v3624_v62, %v3624_v62 }
 0x276   :  { %v548_v20 = vadd.f32 %v547_v15, %v546_v14 }
 0x2dc   :  { %v1067_v63 = vpop.f32.mrb[4].mxu1 }
 0x2dd   :  { %v2440_v1 = vadd.f32 %v1067_v63, %v665_v58  ;;  %v1069_v2 = vpop.f32.mrb[5].mxu1 }
 0x2de   :  { %v2441_v4 = vadd.f32 %v1069_v2, %v669_v59  ;;  %v1071_v5 = vpop.f32.mrb[6].mxu1 }
 0x2df   :  { %v1072_v10 = vpop.f32.mrb[7].mxu1 }
 0x2e0   :  { %v2089_v3 = vpop.f32.mrb[0].mxu0  ;;  %v1074_v13 = vadd.f32 %v2441_v4, %v2440_v1  ;;  %v1104_v10 = vld [vmem:[%s3731_s10] sm:$0x3] }
 0x2e1   :  { %v2442_v7 = vadd.f32 %v2089_v3, %v1279_v60  ;;  %v2091_v9 = vpop.f32.mrb[1].mxu0 }
 0x2e2   :  { %v2443_v11 = vadd.f32 %v2091_v9, %v1283_v0  ;;  %v2093_v12 = vpop.f32.mrb[2].mxu0  ;;  %1075 = vadd.xlane.f32.xlu0 %v1074_v13  ;;  %v2130_v9 = vld [vmem:[%s3730_s13] sm:$0x3] }
 0x2e3   :  { %v2095_v16 = vpop.f32.mrb[3].mxu0  ;;  %v2444_v17 = vadd.f32 %v2093_v12, %v1279_v60  ;;  %v2146_v13 = vld [vmem:[%s3732_s14] sm:$0x3]  ;;  %v2135_v15 = vrot.slane %v2130_v9, %v3527_v6 }
 0x2e4   :  { %v2445_v18 = vadd.f32 %v2095_v16, %v1283_v0  ;;  %v2098_v19 = vadd.f32 %v2443_v11, %v2442_v7  ;;  %v2139_v16 = vrot.slane %v2130_v9, %v3532_v8 }
 0x2e6   :  { %2099 = vadd.xlane.f32.xlu1 %v2098_v19  ;;  %v2101_v21 = vadd.f32 %v2445_v18, %v2444_v17  ;;  %549 = vadd.xlane.f32.xlu0 %v548_v20  ;;  %v1113_v19 = vrot.slane %v1104_v10, %v3532_v8 }
 0x2ea   :  { %2102 = vadd.xlane.f32.xlu1 %v2101_v21 }
 0x36f   :  { %v1076_v22 = vpop.xlane.xlu0 %1075 }
 0x370   :  { %v1077_v23 = vmul.f32 0.00390625, %v1076_v22  ;;  %v2151_v22 = vrot.slane %v2146_v13, %v3527_v6 }
 0x372   :  { %v3631_v26 = vsub.f32 %v2440_v1, %v1077_v23  ;;  %v3633_v27 = vsub.f32 %v2441_v4, %v1077_v23  ;;  %v2155_v23 = vrot.slane %v2146_v13, %v3532_v8 }
 0x373   :  { %v2100_v24 = vpop.xlane.xlu1 %2099  ;;  %v550_v28 = vpop.xlane.xlu0 %549 }
 0x374   :  { %v2104_v25 = vmul.f32 0.00390625, %v2100_v24  ;;  %v551_v31 = vmul.f32 0.00390625, %v550_v28  ;;  %v1080_v32 = vmul.f32 %v3631_v26, %v3631_v26  ;;  %v1081_v34 = vmul.f32 %v3633_v27, %v3633_v27 }
 0x376   :  { %v3635_v29 = vsub.f32 %v2442_v7, %v2104_v25  ;;  %v3637_v30 = vsub.f32 %v2443_v11, %v2104_v25  ;;  %v552_v36 = vadd.f32 1e-05, %v551_v31  ;;  %v1082_v39 = vadd.f32 %v1081_v34, %v1080_v32  ;;  %v1090_v7 = vld [vmem:[%s3742_s21] sm:$0x3] }
 0x377   :  { %v2103_v33 = vpop.xlane.xlu1 %2102  ;;  %v1095_v11 = vrot.slane %v1090_v7, %v3527_v6  ;;  %v1099_v12 = vrot.slane %v1090_v7, %v3532_v8 }
 0x378   :  { %v2105_v35 = vmul.f32 0.00390625, %v2103_v33  ;;  %v2110_v37 = vmul.f32 %v3635_v29, %v3635_v29  ;;  %v2111_v38 = vmul.f32 %v3637_v30, %v3637_v30  ;;  %2658 = vrsqrt.f32 %v552_v36  ;;  %1083 = vadd.xlane.f32.xlu1 %v1082_v39 }
 0x37a   :  { %v3647_v40 = vsub.f32 %v2444_v17, %v2105_v35  ;;  %v3649_v41 = vsub.f32 %v2445_v18, %v2105_v35  ;;  %v2114_v42 = vadd.f32 %v2111_v38, %v2110_v37  ;;  %v1109_v18 = vrot.slane %v1104_v10, %v3527_v6 }
 0x37c   :  { %2115 = vadd.xlane.f32.xlu0 %v2114_v42  ;;  %v2112_v43 = vmul.f32 %v3647_v40, %v3647_v40  ;;  %v2113_v44 = vmul.f32 %v3649_v41, %v3649_v41 }
 0x37e   :  { %v2117_v45 = vadd.f32 %v2113_v44, %v2112_v43 }
 0x380   :  { %2118 = vadd.xlane.f32.xlu1 %v2117_v45 }
 0x382   :  { %v2659_v50 = vpop.eup %2658 }
 0x383   :  { %v554_v53 = vmul.f32 %v2659_v50, %v3621_v61  ;;  %v555_v54 = vmul.f32 %v2659_v50, %v3624_v62 }
 0x385   :  { %v568_v55 = vmul.f32 %v561_v48, %v554_v53  ;;  %v569_v56 = vmul.f32 %v565_v49, %v555_v54 }
 0x387   :  { %v582_v57 = vadd.f32 %v575_v51, %v568_v55  ;;  %v583_v58 = vadd.f32 %v579_v52, %v569_v56 }
 0x389   :  { %v584_v59 = vmax.f32 %v582_v57, 0.0  ;;  %v585_v60 = vmax.f32 %v583_v58, 0.0 }
 0x38b   :  { %586 = vst [vmem:[%s3728_s15] sm:$0xff] %v584_v59  ;;  %587 = vst [vmem:[%s3728_s15 + $0x8] sm:$0xff] %v585_v60 }
 0x405   :  { %v1084_v63 = vpop.xlane.xlu1 %1083 }
 0x406   :  { %v1085_v0 = vmul.f32 0.00390625, %v1084_v63 }
 0x408   :  { %v1086_v2 = vadd.f32 1e-05, %v1085_v0 }
 0x409   :  { %v2116_v1 = vpop.xlane.xlu0 %2115 }
 0x40a   :  { %v2120_v61 = vmul.f32 0.00390625, %v2116_v1  ;;  %2660 = vrsqrt.f32 %v1086_v2 }
 0x40c   :  { %v2122_v62 = vadd.f32 1e-05, %v2120_v61 }
 0x40d   :  { %v2119_v3 = vpop.xlane.xlu1 %2118 }
 0x40e   :  { %2662 = vrsqrt.f32 %v2122_v62  ;;  %v2121_v4 = vmul.f32 0.00390625, %v2119_v3 }
 0x410   :  { %v2123_v5 = vadd.f32 1e-05, %v2121_v4 }
 0x412   :  { %2664 = vrsqrt.f32 %v2123_v5 }
 0x414   :  { %v2661_v14 = vpop.eup %2660 }
 0x415   :  { %v1088_v20 = vmul.f32 %v2661_v14, %v3631_v26  ;;  %v1089_v21 = vmul.f32 %v2661_v14, %v3633_v27 }
 0x417   :  { %v1102_v28 = vmul.f32 %v1095_v11, %v1088_v20  ;;  %v1103_v31 = vmul.f32 %v1099_v12, %v1089_v21 }
 0x418   :  { %v2663_v17 = vpop.eup %2662 }
 0x419   :  { %v2126_v24 = vmul.f32 %v2663_v17, %v3635_v29  ;;  %v2127_v25 = vmul.f32 %v2663_v17, %v3637_v30  ;;  %v1116_v35 = vadd.f32 %v1109_v18, %v1102_v28  ;;  %v1117_v36 = vadd.f32 %v1113_v19, %v1103_v31 }
 0x41b   :  { %v2142_v32 = vmul.f32 %v2135_v15, %v2126_v24  ;;  %v2143_v33 = vmul.f32 %v2139_v16, %v2127_v25  ;;  %v1118_v6 = vmax.f32 %v1116_v35, 0.0  ;;  %v1119_v39 = vmax.f32 %v1117_v36, 0.0 }
 0x41c   :  { %v2665_v34 = vpop.eup %2664 }
 0x41d   :  { %v2158_v37 = vadd.f32 %v2151_v22, %v2142_v32  ;;  %v2159_v38 = vadd.f32 %v2155_v23, %v2143_v33  ;;  %v2128_v26 = vmul.f32 %v2665_v34, %v3647_v40  ;;  %v2129_v27 = vmul.f32 %v2665_v34, %v3649_v41  ;;  %1120 = vst [vmem:[%s3733_s16] sm:$0xff] %v1118_v6 }
 0x41e   :  { %1121 = vst [vmem:[%s3733_s16 + $0x8] sm:$0xff] %v1119_v39 }
 0x41f   :  { %v2162_v8 = vmax.f32 %v2158_v37, 0.0  ;;  %v2163_v42 = vmax.f32 %v2159_v38, 0.0  ;;  %v2144_v29 = vmul.f32 %v2135_v15, %v2128_v26  ;;  %v2145_v43 = vmul.f32 %v2139_v16, %v2129_v27 }
 0x421   :  { %2166 = vst [vmem:[%s3734_s17] sm:$0xff] %v2162_v8  ;;  %2167 = vst [vmem:[%s3734_s17 + $0x8] sm:$0xff] %v2163_v42  ;;  %v2160_v30 = vadd.f32 %v2151_v22, %v2144_v29  ;;  %v2161_v40 = vadd.f32 %v2155_v23, %v2145_v43 }
 0x423   :  { %v2164_v41 = vmax.f32 %v2160_v30, 0.0  ;;  %v2165_v44 = vmax.f32 %v2161_v40, 0.0 }
 0x425   :  { %2168 = vst [vmem:[%s3734_s17 + $0x10] sm:$0xff] %v2164_v41  ;;  %2169 = vst [vmem:[%s3734_s17 + $0x18] sm:$0xff] %v2165_v44 }

// kernel: magnet_forward.3
= control target key start
LH: loop header
LB: loop body
LE: loop exit
PB: predicated region body
PF: predicated region fallthrough
CT: control target
= control target key end

     0   :  { %s6176_s21 = smov 0   ;;  %s6178_s22 = smov 0   ;;  %s7322_s0 = inlined_call_operand.vmem [shape: f32[2,16,256], index: 0, kind: input, shape index: {}]   ;;  %s7323_s1 = inlined_call_operand.vmem [shape: f32[2,16,16], index: 1, kind: input, shape index: {}]   ;;  %s7324_s2 = inlined_call_operand.vmem [shape: f32[2,16,16], index: 2, kind: input, shape index: {}]   ;;  %s7325_s3 = inlined_call_operand.vmem [shape: f32[16,16], index: 3, kind: input, shape index: {}]   ;;  %s7326_s4 = inlined_call_operand.vmem [shape: f32[3,16,1], index: 4, kind: input, shape index: {}]   ;;  %s7327_s5 = inlined_call_operand.vmem [shape: f32[2,256,16], index: 5, kind: input, shape index: {}]   ;;  %s7328_s6 = inlined_call_operand.vmem [shape: f32[2,3,1,16], index: 6, kind: input, shape index: {}]   ;;  %s7329_s7 = inlined_call_operand.vmem [shape: f32[2,2,16,16], index: 7, kind: input, shape index: {}]   ;;  %s7330_s8 = inlined_call_operand.vmem [shape: f32[2,32,16], index: 8, kind: input, shape index: {}]   ;;  %s7331_s9 = inlined_call_operand.vmem [shape: f32[2,2,1,32], index: 9, kind: input, shape index: {}]   ;;  %s7332_s10 = inlined_call_operand.vmem [shape: f32[2,3,1,1], index: 10, kind: input, shape index: {}]   ;;  %s7333_s11 = inlined_call_operand.vmem [shape: bf16[2,768,256], index: 11, kind: input, shape index: {}]   ;;  %s7334_s12 = inlined_call_operand.vmem [shape: bf16[2,768,256], index: 12, kind: input, shape index: {}]   ;;  %s7335_s13 = inlined_call_operand.vmem [shape: f32[2,6,16,256], index: 13, kind: input, shape index: {}]   ;;  %s7336_s14 = inlined_call_operand.vmem [shape: f32[2,16,1], index: 14, kind: input, shape index: {}]   ;;  %s7337_s15 = inlined_call_operand.vmem [shape: f32[2,2,16,16], index: 15, kind: output, shape index: {0}]   ;;  %s7338_s16 = inlined_call_operand.vmem [shape: f32[2,2,16,16], index: 16, kind: output, shape index: {1}]  }
   0x1   :  { %7343 = sst [smem:[#allocation9_spill]] %s7322_s0  ;;  %s6180_s23 = smov 0  }
   0x2   :  { %7344 = sst [smem:[#allocation10_spill]] %s7326_s4  ;;  %s6182_s24 = smov 0  }
   0x3   :  { %7345 = sst [smem:[#allocation11_spill]] %s7330_s8  ;;  %s6184_s25 = smov 0  }
   0x4   :  { %7346 = sst [smem:[#allocation12_spill]] %s7331_s9 }
   0x5   :  { %7347 = sst [smem:[#allocation13_spill]] %s7333_s11 }
   0x6   :  { %7348 = sst [smem:[#allocation14_spill]] %s7334_s12 }
   0x7   :  { %7349 = sst [smem:[#allocation15_spill]] %s7335_s13 }
   0x8   :  { %7350 = sst [smem:[#allocation16_spill]] %s7336_s14 }
   0x9 LB: > { %7351 = sst [smem:[#allocation4_spill]] %s6078_s23  ;;  %s36_s26 = sadd.s32 1, %s6078_s23  ;;  %s6086_s25 = sphi %s6184_s25, %s27_s25   ;;  %s6082_s24 = sphi %s6182_s24, %s7373_s24   ;;  %s6078_s23 = sphi %s6180_s23, %s7372_s23   ;;  %s6074_s22 = sphi %s6178_s22, %s7371_s22   ;;  %s6070_s21 = sphi %s6176_s21, %s7370_s21  }
   0xa   : > { %7352 = sst [smem:[#allocation5_spill]] %s6082_s24  ;;  %s39_s27 = sadd.s32 1, %s6082_s24 }
   0xb   : > { %7353 = sst [smem:[#allocation6_spill]] %s6086_s25  ;;  %p37_p0 = scmp.ge.s32.totalorder %s36_s26, 2 }
   0xc   : > { %p4765_p1 = scmp.ge.s32.totalorder %s6086_s25, 1  ;;  %p501_p2 = scmp.lt.s32.totalorder %s6086_s25, 5 }
   0xd   : > { %s7375_s26 = smov (%p37_p0, %s36_s26), 0  ;;  %s7377_s27 = smov (!%p37_p0, %s39_s27), %s6082_s24 }
   0xe   : > { %7354 = sst [smem:[#allocation7_spill]] %s7375_s26  ;;  %p502_p3 = pnand %p4765_p1, %p501_p2 }
   0xf   : > { %p41_p4 = scmp.ge.s32.totalorder %s7377_s27, 2  ;;  %p574_p5 = scmp.lt.s32.totalorder (!%p502_p3), %s6074_s22, 1 }
  0x10   : > { %505 = sbr.rel (%p502_p3) target bundleno = 3998 (0xf9e), region = 80  ;;  %p591_p6 = scmp.lt.s32.totalorder (!%p502_p3), %s6070_s21, 1 }
  0x11   : > { %s7379_s27 = smov (%p41_p4, %s7377_s27), 0  ;;  %s7356_s18 = sld [smem:[#allocation9_spill]] (!%p502_p3) }
  0x12   : > { %7355 = sst [smem:[#allocation8_spill]] %s7379_s27  ;;  %p4778_p7 = scmp.ne.s32.totalorder (!%p502_p3), %s6070_s21, 0 }
  0x17   : > { %s7381_s22 = smov (!%p574_p5, %s6074_s22), 1  ;;  %vm621_vm0 = vcmask (!%p4778_p7), 130048  }
  0x18   : > { %s592_s28 = scalar_select %p591_p6, %s6070_s21, 1 }
  0x19   : > { %s5191_s29 = sshll.u32 %s7381_s22, 5  ;;  %s5192_s30 = sshll.u32 %s7381_s22, 4 }
  0x1a   : > { %s578_s19 = scalar_lea.vmem %s7356_s18, %s5191_s29  ;;  %s583_s24 = scalar_lea.vmem %s7323_s1, %s5192_s30 }
  0x1b   : > { %s6219_s27 = scalar_lea.vmem %s7324_s2, %s5192_s30  ;;  %s4772_s14 = sshll.u32 %s592_s28, 1  ;;  %v611_v0 = vld [vmem:[%s578_s19] sm:$0xff] (!%p4778_p7)  ;;  %v612_v1 = vld [vmem:[%s578_s19 + $0x8] sm:$0xff] (!%p4778_p7)  ;;  %v613_v2 = vld [vmem:[%s578_s19 + $0x10] sm:$0xff] (!%p4778_p7) }
  0x1c   : > { %s4773_s13 = sshll.u32 %s7381_s22, 2  ;;  %610 = sbr.rel (%p4778_p7) target bundleno = 35 (0x23), region = 84  ;;  %615 = vst [vmem:[#allocation2] sm:$0xff] (!%p4778_p7), %v611_v0  ;;  %616 = vst [vmem:[#allocation2 + $0x8] sm:$0xff] (!%p4778_p7), %v612_v1  ;;  %v614_v3 = vld [vmem:[%s578_s19 + $0x18] sm:$0xff] (!%p4778_p7)  ;;  %v619_v4 = vld [vmem:[%s583_s24] sm:$0xff] (!%p4778_p7) }
  0x1d   : > { %s595_s11 = sadd.s32 %s4773_s13, %s4772_s14  ;;  %617 = vst [vmem:[#allocation2 + $0x10] sm:$0xff] (!%p4778_p7), %v613_v2  ;;  %v620_v5 = vld [vmem:[%s583_s24 + $0x8] sm:$0xff] (!%p4778_p7)  ;;  %618 = vst [vmem:[#allocation2 + $0x18] sm:$0xff] (!%p4778_p7), %v614_v3 }
  0x1e   : > { %s4774_s4 = sshll.u32 %s595_s11, 3  ;;  %622 = vst.msk [vmem:[#allocation3] sm:$0xff] (!%p4778_p7), %vm621_vm0, %v619_v4  ;;  %623 = vst.msk [vmem:[#allocation3 + $0x8] sm:$0xff] (!%p4778_p7), %vm621_vm0, %v620_v5 }
  0x1f   : > { %s6224_s8 = scalar_lea.vmem %s7337_s15, %s4774_s4  ;;  %s6229_s17 = scalar_lea.vmem %s7338_s16, %s4774_s4 }
  0x23 PF: > { %v624_v6 = vld [vmem:[#allocation2] sm:$0xff]  ;;  %v625_v7 = vld [vmem:[#allocation2 + $0x8] sm:$0xff]  ;;  %s950_s4 = smul.u32 3, %s6070_s21  ;;  %vm758_vm5 = vcmask 130048   ;;  %s4795_s26 = sshll.u32 %s6070_s21, 5  ;;  %vm2503_vm13 = vcmask 261120  }
  0x24   : > { %v626_v8 = vld [vmem:[#allocation2 + $0x10] sm:$0xff]  ;;  %v645_v9 = vmul.f32 %v624_v6, %v624_v6  ;;  %v646_v10 = vmul.f32 %v625_v7, %v625_v7  ;;  %v627_v11 = vld [vmem:[#allocation2 + $0x18] sm:$0xff]  ;;  %v632_v41 = vld [vmem:[%s7325_s3] sm:$0xff]  ;;  %s1037_s30 = scalar_lea.vmem %s7329_s7, %s4795_s26  ;;  %s7359_s9 = sld [smem:[#allocation11_spill]] }
  0x25   : > { %v647_v12 = vmul.f32 %v626_v8, %v626_v8  ;;  %v648_v13 = vmul.f32 %v627_v11, %v627_v11  ;;  %s6243_s14 = scalar_lea.vmem %s7328_s6, %s950_s4  ;;  %v633_v47 = vld [vmem:[%s7325_s3 + $0x8] sm:$0xff]  ;;  %v630_v58 = vld [vmem:[%s6219_s27] sm:$0xff]  ;;  %vm6272_vm8 = vmpackc.low %vm758_vm5, %vm758_vm5  ;;  %s6294_s25 = scalar_lea.vmem %s7332_s10, %s950_s4 }
  0x26   : > { %v649_v14 = vadd.f32 %v646_v10, %v645_v9  ;;  %v4791_v50 = vld [vmem:[%s6243_s14] ss:$0 sm:$0xff]  ;;  %v631_v59 = vld [vmem:[%s6219_s27 + $0x8] sm:$0xff]  ;;  %vm761_vm6 = vcmp.gt.f32.partialorder %v630_v58, 0.0  ;;  %s7360_s20 = sld [smem:[#allocation14_spill]]  ;;  %s4905_s29 = sshll.u32 %s6070_s21, 1 }
  0x27   : > { %v652_v15 = vadd.f32 %v648_v13, %v647_v12  ;;  %vm762_vm7 = vcmp.gt.f32.partialorder %v631_v59, 0.0  ;;  %v763_v60 = vsel %vm761_vm6, 1.0, %v630_v58  ;;  %v4944_v58 = vld [vmem:[%s6294_s25 + $0x2] ss:$0 sm:$0xff]  ;;  %s7362_s22 = sld [smem:[#allocation10_spill]]  ;;  %s7366_s4 = sld [smem:[#allocation13_spill]] }
  0x28   : > { %650 = vadd.xlane.f32.xlu0 %v649_v14  ;;  %v764_v61 = vsel %vm762_vm7, 1.0, %v631_v59  ;;  %s7367_s13 = sld [smem:[#allocation15_spill]]  ;;  %s7368_s24 = sld [smem:[#allocation16_spill]] }
  0x29   : > { %v5547_v62 = vpack.c.bf16 %v764_v61, %v763_v60 }
  0x2a   : > { %s2008_s11 = scalar_lea.vmem %s7359_s9, %s4795_s26 }
  0x2c   : > { %653 = vadd.xlane.f32.xlu0 %v652_v15 }
  0xb5   : > { %v651_v16 = vpop.xlane.xlu0 %650 }
  0xb6   : > { %5960 = vrsqrt.f32 %v651_v16  ;;  %vm657_vm1 = vcmp.eq.f32.partialorder %v651_v16, inf  ;;  %v660_v20 = vand.u32 2147483648, %v651_v16  ;;  %vm659_vm2 = vcmp.eq.f32.partialorder %v651_v16, 0.0 }
  0xb9   : > { %v654_v17 = vpop.xlane.xlu0 %653 }
  0xba   : > { %5962 = vrsqrt.f32 %v654_v17  ;;  %vm664_vm3 = vcmp.eq.f32.partialorder %v654_v17, inf  ;;  %v667_v26 = vand.u32 2147483648, %v654_v17  ;;  %vm666_vm4 = vcmp.eq.f32.partialorder %v654_v17, 0.0 }
  0xc0   : > { %v5961_v18 = vpop.eup %5960 }
  0xc1   : > { %v656_v19 = vmul.f32 %v5961_v18, %v651_v16 }
  0xc3   : > { %v658_v21 = vsel %vm657_vm1, %v651_v16, %v656_v19 }
  0xc4   : > { %v5963_v22 = vpop.eup %5962  ;;  %v661_v23 = vsel %vm659_vm2, %v660_v20, %v658_v21  ;;  %v4790_v21 = vld [vmem:[%s6243_s14 + $0x1] ss:$0 sm:$0xff] }
  0xc5   : > { %v663_v24 = vmul.f32 %v5963_v22, %v654_v17  ;;  %v669_v25 = vmax.f32 %v661_v23, 1e-12 }
  0xc7   : > { %v665_v27 = vsel %vm664_vm3, %v654_v17, %v663_v24  ;;  %5964 = vrcp.f32 %v669_v25  ;;  %v1249_v17 = vld [vmem:[%s7327_s5 + $0x60] sm:$0xff] }
  0xc8   : > { %v668_v28 = vsel %vm666_vm4, %v667_v26, %v665_v27 }
  0xc9   : > { %v670_v29 = vmax.f32 %v668_v28, 1e-12  ;;  %v6088_v28 = vmov 0  }
  0xca   : > { %5670 = vset.pattern.permute.xlu0 %v6088_v28  ;;  %5671 = vset.pattern.permute.xlu1 %v6088_v28  ;;  %v4813_v28 = vld [vmem:[%s7327_s5 + $0x120] sm:$0xff] }
  0xcb   : > { %5966 = vrcp.f32 %v670_v29 }
  0xd1   : > { %v5965_v30 = vpop.eup %5964 }
  0xd2   : > { %v673_v31 = vmul.f32 %v5965_v30, %v625_v7  ;;  %v672_v34 = vmul.f32 %v5965_v30, %v624_v6  ;;  %v4792_v30 = vld [vmem:[%s6294_s25] ss:$0 sm:$0xff] }
  0xd4   : > { %741 = vmatprep.mubr.f32.mxu1 %v673_v31 }
  0xd5   : > { %v5967_v32 = vpop.eup %5966 }
  0xd6   : > { %v676_v33 = vmul.f32 %v5967_v32, %v627_v11  ;;  %v675_v35 = vmul.f32 %v5967_v32, %v626_v8 }
  0xd8   : > { %v5543_v36 = vpack.c.bf16 %v676_v33, %v673_v31  ;;  %v5545_v37 = vpack.c.bf16 %v675_v35, %v672_v34 }
  0xda   : > { %5544 = vmatprep.subr.bf16.mxu1 %v5543_v36 }
  0xdb   : > { %5546 = vmatpush1.bf16.xpose.msra.mxu1 %v5545_v37 }
  0xdc   : > { %5548 = vmatprep.subr.bf16.mxu1 %v5547_v62 }
  0xe2   : > { %742 = vmatmul.mubr.f32.vlgmr.msra.gmra.mrb[0].mxu1 %v672_v34 }
  0xe3   : > { %746 = vmatprep.mubr.f32.mxu1 %v676_v33  ;;  %5550 = vmatpush3.bf16.msra.mxu1 %v5547_v62 }
  0xe6   : > { %747 = vmatmul.mubr.f32.gmra.mrb[2].mxu1 %v675_v35 }
 0x1b5   : > { %v743_v38 = vpop.f32.mrb[0].mxu1 }
 0x1b6   : > { %v4781_v39 = vadd.f32 -0.0001, %v743_v38  ;;  %v745_v40 = vpop.f32.mrb[1].mxu1 }
 0x1b8   : > { %v754_v42 = vmax.f32 %v4781_v39, 0.0 }
 0x1b9   : > { %v748_v43 = vpop.f32.mrb[2].mxu1 }
 0x1ba   : > { %v6236_v44 = vmul.f32 %v754_v42, %v632_v41  ;;  %v4782_v45 = vadd.f32 -0.0001, %v748_v43  ;;  %v750_v46 = vpop.f32.mrb[3].mxu1 }
 0x1bb   : > { %v4798_v46 = vld [vmem:[%s1037_s30 + $0x18] sm:$0xff] }
 0x1bc   : > { %759 = vst.msk [vmem:[%s6224_s8] sm:$0xff] %vm758_vm5, %v6236_v44  ;;  %v755_v48 = vmax.f32 %v4782_v45, 0.0  ;;  %v765_v49 = vsel %vm758_vm5, %v6236_v44, 0.0  ;;  %v976_v53 = vmul.f32 %v4791_v50, %v6236_v44  ;;  %v4797_v45 = vld [vmem:[%s1037_s30 + $0x10] sm:$0xff] }
 0x1bd   : > { %766 = vadd.xlane.f32.xlu1 %v765_v49 }
 0x1be   : > { %v6254_v51 = vmul.f32 %v755_v48, %v633_v47  ;;  %v978_v55 = vsel %vm758_vm5, %v976_v53, 0.0  ;;  %v5557_v47 = vpack.c.bf16 %v4798_v46, %v4797_v45  ;;  %v1039_v53 = vld [vmem:[%s1037_s30 + $0x8] sm:$0xff]  ;;  %v4821_v45 = vld [vmem:[%s7327_s5 + $0x160] sm:$0xff] }
 0x1bf   : > { %v1250_v46 = vld [vmem:[%s7327_s5 + $0x68] sm:$0xff] }
 0x1c0   : > { %760 = vst.msk [vmem:[%s6224_s8 + $0x8] sm:$0xff] %vm758_vm5, %v6254_v51  ;;  %v768_v52 = vsel %vm758_vm5, %v6254_v51, 0.0  ;;  %v977_v56 = vmul.f32 %v4791_v50, %v6254_v51  ;;  %5559 = vmatprep.subr.msk.bf16.mxu0 %vm6272_vm8, %v5557_v47  ;;  %v628_v50 = vld [vmem:[#allocation3] sm:$0xff]  ;;  %s7363_s8 = smov %s7362_s22 }
 0x1c1   : > { %769 = vadd.xlane.f32.xlu1 %v768_v52  ;;  %v771_v54 = vadd.f32 %v768_v52, %v765_v49  ;;  %5562 = vmatpush3.bf16.xpose.msk.msra.mxu0 %vm6272_vm8, %v5557_v47  ;;  %v1038_v52 = vld [vmem:[%s1037_s30] sm:$0xff]  ;;  %v4822_v47 = vld [vmem:[%s7327_s5 + $0x168] sm:$0xff]  ;;  %s5194_s30 = smul.u32 768, %s6070_s21 }
 0x1c2   : > { %v982_v57 = vsel %vm758_vm5, %v977_v56, 0.0  ;;  %5373 = vmatprep.mubr.msk.f32.mxu0 %vm758_vm5, %v628_v50  ;;  %v629_v56 = vld [vmem:[#allocation3 + $0x8] sm:$0xff]  ;;  %v1252_v50 = vld [vmem:[%s7327_s5 + $0x78] sm:$0xff] }
 0x1c3   : > { %v772_v63 = vrot.slane %v771_v54, 4  ;;  %s6597_s0 = scalar_lea.vmem %s7360_s20, %s5194_s30  ;;  %s7117_s9 = scalar_lea.vmem %s7366_s4, %s5194_s30 }
 0x1c4   : > { %s5195_s30 = smul.u32 192, %s6070_s21 }
 0x1c5   : > { %979 = vadd.xlane.f32.xlu1 %v978_v55  ;;  %v773_v0 = vadd.f32 %v772_v63, %v771_v54  ;;  %v5563_v55 = vpack.c.bf16 %v1039_v53, %v1038_v52  ;;  %v4824_v52 = vld [vmem:[%s7327_s5 + $0x178] sm:$0xff]  ;;  %v1253_v53 = vld [vmem:[%s7327_s5 + $0x80] sm:$0xff] }
 0x1c7   : > { %v774_v1 = vrot.slane %v773_v0, 2  ;;  %5565 = vmatprep.subr.msk.bf16.mxu0 %vm6272_vm8, %v5563_v55 }
 0x1c8   : > { %5374 = vmatmul.mubr.msk.f32.vlgmr.msra.gmra.mrb[0].mxu0 %vm758_vm5, %v629_v56  ;;  %v4826_v56 = vld [vmem:[%s7327_s5 + $0x188] sm:$0xff] }
 0x1c9   : > { %983 = vadd.xlane.f32.xlu1 %v982_v57  ;;  %v775_v2 = vadd.f32 %v774_v1, %v773_v0  ;;  %5568 = vmatpush3.bf16.xpose.msk.msra.mxu0 %vm6272_vm8, %v5563_v55  ;;  %v1254_v55 = vld [vmem:[%s7327_s5 + $0x88] sm:$0xff] }
 0x1cb   : > { %v776_v3 = vrot.slane %v775_v2, 1 }
 0x1cd   : > { %v777_v4 = vadd.f32 %v776_v3, %v775_v2 }
 0x1cf   : > { %v784_v6 = vmax.f32 %v777_v4, 1e-12 }
 0x24a   : > { %v767_v5 = vpop.xlane.xlu1 %766 }
 0x24b   : > { %v778_v7 = vmax.f32 %v767_v5, 1e-12  ;;  %v1237_v5 = vld [vmem:[%s7327_s5] sm:$0xff] }
 0x24d   : > { %5968 = vrsqrt.f32 %v778_v7 }
 0x24e   : > { %v770_v8 = vpop.xlane.xlu1 %769  ;;  %5970 = vrsqrt.f32 %v784_v6  ;;  %v4809_v6 = vld [vmem:[%s7327_s5 + $0x100] sm:$0xff] }
 0x24f   : > { %v779_v9 = vmax.f32 %v770_v8, 1e-12 }
 0x251   : > { %5972 = vrsqrt.f32 %v779_v9 }
 0x252   : > { %v980_v29 = vpop.xlane.xlu1 %979 }
 0x256   : > { %v984_v34 = vpop.xlane.xlu1 %983 }
 0x257   : > { %v5969_v10 = vpop.eup %5968 }
 0x258   : > { %v782_v11 = vmul.f32 %v5969_v10, %v6236_v44  ;;  %v5971_v12 = vpop.eup %5970 }
 0x25a   : > { %v786_v13 = vmul.f32 %v5971_v12, %v782_v11 }
 0x25b   : > { %v5973_v14 = vpop.eup %5972 }
 0x25c   : > { %v783_v15 = vmul.f32 %v5973_v14, %v6254_v51  ;;  %5359 = vmatprep.mubr.msk.f32.mxu1 %vm758_vm5, %v786_v13 }
 0x25e   : > { %v787_v16 = vmul.f32 %v5971_v12, %v783_v15  ;;  %v2009_v12 = vld [vmem:[%s2008_s11] sm:$0xff] }
 0x260   : > { %5360 = vmatmul.mubr.msk.f32.vlgmr.msra.gmra.mrb[4].mxu1 %vm758_vm5, %v787_v16  ;;  %v5551_v18 = vpack.c.bf16 %v787_v16, %v786_v13  ;;  %v2010_v13 = vld [vmem:[%s2008_s11 + $0x8] sm:$0xff] }
 0x262   : > { %5553 = vmatprep.subr.msk.bf16.mxu1 %vm6272_vm8, %v5551_v18 }
 0x263   : > { %5556 = vmatpush3.bf16.xpose.msk.msra.mxu1 %vm6272_vm8, %v5551_v18  ;;  %v5577_v18 = vpack.c.bf16 %v2010_v13, %v2009_v12  ;;  %v4837_v12 = vld [vmem:[%s7327_s5 + $0x1e0] sm:$0xff]  ;;  %v1266_v13 = vld [vmem:[%s7327_s5 + $0xe8] sm:$0xff] }
 0x333   : > { %v5361_v19 = vpop.f32.mrb[4].mxu1 }
 0x334   : > { %v860_v20 = vpop.f32.mrb[5].mxu1 }
 0x335   : > { %5366 = vmatprep.mubr.msk.f32.mxu1 %vm758_vm5, %v860_v20  ;;  %v4810_v20 = vld [vmem:[%s7327_s5 + $0x108] sm:$0xff] }
 0x336   : > { %5367 = vmatmul.mubr.msk.f32.vlgmr.msra.gmra.mrb[6].mxu1 %vm758_vm5, %v5361_v19  ;;  %v1238_v19 = vld [vmem:[%s7327_s5 + $0x8] sm:$0xff] }
 0x337   : > { %5387 = vmatprep.mubr.msk.f32.mxu1 %vm758_vm5, %v1237_v5  ;;  %v1261_v5 = vld [vmem:[%s7327_s5 + $0xc0] sm:$0xff] }
 0x409   : > { %v6284_v22 = vpop.f32.mrb[6].mxu1 }
 0x40a   : > { %v941_v23 = vpop.f32.mrb[7].mxu1  ;;  %v963_v25 = vmul.f32 %v6284_v22, %v4790_v21 }
 0x40b   : > { %v962_v24 = vmul.f32 %v4790_v21, %v941_v23  ;;  %v1239_v21 = vld [vmem:[%s7327_s5 + $0x10] sm:$0xff] }
 0x40c   : > { %v967_v27 = vsel %vm758_vm5, %v963_v25, 0.0  ;;  %v1240_v25 = vld [vmem:[%s7327_s5 + $0x18] sm:$0xff] }
 0x40d   : > { %v964_v26 = vsel %vm758_vm5, %v962_v24, 0.0  ;;  %v2012_v24 = vld [vmem:[%s2008_s11 + $0x18] sm:$0xff] }
 0x40e   : > { %965 = vadd.xlane.f32.xlu0 %v964_v26  ;;  %v4812_v26 = vld [vmem:[%s7327_s5 + $0x118] sm:$0xff] }
 0x412   : > { %968 = vadd.xlane.f32.xlu0 %v967_v27  ;;  %v1241_v27 = vld [vmem:[%s7327_s5 + $0x20] sm:$0xff] }
 0x49b   : > { %v966_v31 = vpop.xlane.xlu0 %965 }
 0x49c   : > { %v981_v32 = vadd.f32 %v980_v29, %v966_v31  ;;  %v4814_v31 = vld [vmem:[%s7327_s5 + $0x128] sm:$0xff] }
 0x49e   : > { %v994_v33 = vadd.f32 %v4792_v30, %v981_v32  ;;  %v1243_v32 = vld [vmem:[%s7327_s5 + $0x30] sm:$0xff] }
 0x49f   : > { %v969_v35 = vpop.xlane.xlu0 %968 }
 0x4a0   : > { %v4793_v36 = vmul.f32 -1.442695, %v994_v33  ;;  %v985_v37 = vadd.f32 %v984_v34, %v969_v35  ;;  %v4815_v33 = vld [vmem:[%s7327_s5 + $0x130] sm:$0xff]  ;;  %v1244_v34 = vld [vmem:[%s7327_s5 + $0x38] sm:$0xff] }
 0x4a1   : > { %v4816_v35 = vld [vmem:[%s7327_s5 + $0x138] sm:$0xff] }
 0x4a2   : > { %5974 = vpow2.f32 %v4793_v36  ;;  %v995_v38 = vadd.f32 %v4792_v30, %v985_v37  ;;  %v1242_v30 = vld [vmem:[%s7327_s5 + $0x28] sm:$0xff]  ;;  %v1245_v36 = vld [vmem:[%s7327_s5 + $0x40] sm:$0xff] }
 0x4a3   : > { %v4817_v37 = vld [vmem:[%s7327_s5 + $0x140] sm:$0xff] }
 0x4a4   : > { %v4794_v39 = vmul.f32 -1.442695, %v995_v38  ;;  %v1246_v38 = vld [vmem:[%s7327_s5 + $0x48] sm:$0xff] }
 0x4a6   : > { %5976 = vpow2.f32 %v4794_v39  ;;  %v4818_v39 = vld [vmem:[%s7327_s5 + $0x148] sm:$0xff] }
 0x4ac   : > { %v5975_v40 = vpop.eup %5974 }
 0x4ad   : > { %v1002_v41 = vadd.f32 1.0, %v5975_v40  ;;  %v1247_v40 = vld [vmem:[%s7327_s5 + $0x50] sm:$0xff] }
 0x4af   : > { %5978 = vrcp.f32 %v1002_v41  ;;  %v4819_v41 = vld [vmem:[%s7327_s5 + $0x150] sm:$0xff] }
 0x4b0   : > { %v5977_v42 = vpop.eup %5976 }
 0x4b1   : > { %v1003_v43 = vadd.f32 1.0, %v5977_v42  ;;  %v1248_v42 = vld [vmem:[%s7327_s5 + $0x58] sm:$0xff] }
 0x4b3   : > { %5980 = vrcp.f32 %v1003_v43  ;;  %v4820_v43 = vld [vmem:[%s7327_s5 + $0x158] sm:$0xff] }
 0x4b9   : > { %v5979_v48 = vpop.eup %5978 }
 0x4ba   : > { %1010 = vperm.xlu0 %5670, %v5979_v48   ;;  %v1020_v54 = vsub.f32 1.0, %v5979_v48  ;;  %v1251_v48 = vld [vmem:[%s7327_s5 + $0x70] sm:$0xff] }
 0x4bd   : > { %v5981_v49 = vpop.eup %5980 }
 0x4be   : > { %1015 = vperm.xlu1 %5671, %v5981_v49   ;;  %v1021_v57 = vsub.f32 1.0, %v5981_v49  ;;  %v4823_v49 = vld [vmem:[%s7327_s5 + $0x170] sm:$0xff] }
 0x4c2   : > { %1024 = vperm.xlu1 %5671, %v1020_v54   ;;  %v4825_v54 = vld [vmem:[%s7327_s5 + $0x180] sm:$0xff] }
 0x4c6   : > { %1029 = vperm.xlu1 %5671, %v1021_v57   ;;  %v1255_v57 = vld [vmem:[%s7327_s5 + $0x90] sm:$0xff] }
 0x4ca   : > { %2395 = vperm.xlu1 %5671, %v4944_v58   ;;  %v4827_v58 = vld [vmem:[%s7327_s5 + $0x190] sm:$0xff] }
 0x539   : > { %v1011_v60 = vpop.permute.xlu0 %1010 }
 0x53a   : > { %v1018_v62 = vmul.f32 %v1011_v60, %v941_v23  ;;  %v2011_v23 = vld [vmem:[%s2008_s11 + $0x10] sm:$0xff]  ;;  %v4828_v60 = vld [vmem:[%s7327_s5 + $0x198] sm:$0xff]  ;;  %s7361_s11 = sld [smem:[#allocation12_spill]] }
 0x53b   : > { %v5583_v29 = vpack.c.bf16 %v2012_v24, %v2011_v23 }
 0x53d   : > { %v1016_v59 = vpop.permute.xlu1 %1015 }
 0x53e   : > { %v1019_v2 = vmul.f32 %v6284_v22, %v1016_v59  ;;  %v4811_v22 = vld [vmem:[%s7327_s5 + $0x110] sm:$0xff]  ;;  %v1256_v59 = vld [vmem:[%s7327_s5 + $0x98] sm:$0xff] }
 0x540   : > { %s2014_s12 = scalar_lea.vmem %s7361_s11, %s4905_s29 }
 0x541   : > { %v1025_v61 = vpop.permute.xlu1 %1024 }
 0x542   : > { %v1032_v63 = vmul.f32 %v1025_v61, %v6236_v44  ;;  %v4808_v44 = vld [vmem:[%s6243_s14 + $0x2] ss:$0 sm:$0xff]  ;;  %s7257_s14 = scalar_lea.vmem %s7367_s13, %s5195_s30 }
 0x543   : > { %v1257_v61 = vld [vmem:[%s7327_s5 + $0xa0] sm:$0xff] }
 0x544   : > { %v1034_v0 = vadd.f32 %v1032_v63, %v1018_v62  ;;  %v4829_v62 = vld [vmem:[%s7327_s5 + $0x1a0] sm:$0xff]  ;;  %v1258_v63 = vld [vmem:[%s7327_s5 + $0xa8] sm:$0xff] }
 0x545   : > { %v1030_v1 = vpop.permute.xlu1 %1029 }
 0x546   : > { %v1033_v3 = vmul.f32 %v1030_v1, %v6254_v51  ;;  %5380 = vmatprep.mubr.msk.f32.mxu0 %vm758_vm5, %v1034_v0  ;;  %v4830_v0 = vld [vmem:[%s7327_s5 + $0x1a8] sm:$0xff]  ;;  %v1259_v1 = vld [vmem:[%s7327_s5 + $0xb0] sm:$0xff] }
 0x548   : > { %v1035_v4 = vadd.f32 %v1033_v3, %v1019_v2  ;;  %v4831_v2 = vld [vmem:[%s7327_s5 + $0x1b0] sm:$0xff]  ;;  %v1260_v3 = vld [vmem:[%s7327_s5 + $0xb8] sm:$0xff] }
 0x54a   : > { %5381 = vmatmul.mubr.msk.f32.vlgmr.msra.gmra.mrb[0].mxu0 %vm758_vm5, %v1035_v4  ;;  %v4832_v4 = vld [vmem:[%s7327_s5 + $0x1b8] sm:$0xff] }
 0x54b   : > { %5439 = vmatprep.mubr.msk.f32.mxu0 %vm758_vm5, %v4809_v6  ;;  %v4833_v6 = vld [vmem:[%s7327_s5 + $0x1c0] sm:$0xff] }
 0x61d   : > { %v5382_v7 = vpop.f32.mrb[0].mxu0 }
 0x61e   : > { %v1228_v51 = vadd.f32 %v5382_v7, %v4808_v44  ;;  %v1209_v8 = vpop.f32.mrb[1].mxu0  ;;  %v4834_v7 = vld [vmem:[%s7327_s5 + $0x1c8] sm:$0xff] }
 0x61f   : > { %v1227_v9 = vadd.f32 %v4808_v44, %v1209_v8  ;;  %v1262_v44 = vld [vmem:[%s7327_s5 + $0xc8] sm:$0xff]  ;;  %v4835_v8 = vld [vmem:[%s7327_s5 + $0x1d0] sm:$0xff] }
 0x620   : > { %vm1230_vm9 = vcmp.ge.f32.partialorder %v1228_v51, 0.0  ;;  %v1232_v10 = vmul.f32 0.01, %v1228_v51 }
 0x621   : > { %vm1229_vm10 = vcmp.ge.f32.partialorder %v1227_v9, 0.0  ;;  %v1231_v11 = vmul.f32 0.01, %v1227_v9 }
 0x622   : > { %v1234_v14 = vsel %vm1230_vm9, %v1228_v51, %v1232_v10  ;;  %v1263_v51 = vld [vmem:[%s7327_s5 + $0xd0] sm:$0xff]  ;;  %v4836_v10 = vld [vmem:[%s7327_s5 + $0x1d8] sm:$0xff] }
 0x623   : > { %1236 = vst.msk [vmem:[#allocation3 + $0x8] sm:$0xff] %vm758_vm5, %v1234_v14  ;;  %v1233_v15 = vsel %vm1229_vm10, %v1227_v9, %v1231_v11  ;;  %v1264_v9 = vld [vmem:[%s7327_s5 + $0xd8] sm:$0xff]  ;;  %v1265_v11 = vld [vmem:[%s7327_s5 + $0xe0] sm:$0xff] }
 0x624   : > { %1235 = vst.msk [vmem:[#allocation3] sm:$0xff] %vm758_vm5, %v1233_v15  ;;  %v5569_v16 = vpack.c.bf16 %v1234_v14, %v1233_v15  ;;  %v4838_v14 = vld [vmem:[%s7327_s5 + $0x1e8] sm:$0xff]  ;;  %v1267_v15 = vld [vmem:[%s7327_s5 + $0xf0] sm:$0xff] }
 0x626   : > { %5570 = vmatprep.subr.bf16.mxu1 %v5569_v16  ;;  %5574 = vmatprep.subr.bf16.mxu0 %v5569_v16 }
 0x627   : > { %5572 = vmatpush3.bf16.msra.mxu1 %v5569_v16  ;;  %5576 = vmatpush3.bf16.msra.mxu0 %v5569_v16  ;;  %v4839_v16 = vld [vmem:[%s7327_s5 + $0x1f0] sm:$0xff] }
 0x628   : > { %5579 = vmatprep.subr.msk.bf16.mxu1 %vm6272_vm8, %v5577_v18 }
 0x62a   : > { %5388 = vmatmul.mubr.msk.f32.vlgmr.msra.gmra.mrb[8].mxu1 %vm758_vm5, %v1238_v19  ;;  %5440 = vmatmul.mubr.msk.f32.vlgmr.msra.gmra.mrb[2].mxu0 %vm758_vm5, %v4810_v20  ;;  %v4840_v19 = vld [vmem:[%s7327_s5 + $0x1f8] sm:$0xff]  ;;  %v5674_v20 = vld [vmem:[%s6597_s0 + $0x4] ss:$8 sps:$4 sm:$0xff]  }
 0x62b   : > { %5390 = vmatprep.mubr.msk.f32.mxu1 %vm758_vm5, %v1239_v21  ;;  %5442 = vmatprep.mubr.msk.f32.mxu0 %vm758_vm5, %v4811_v22 }
 0x62e   : > { %5391 = vmatmul.mubr.msk.f32.gmra.mrb[10].mxu1 %vm758_vm5, %v1240_v25  ;;  %5443 = vmatmul.mubr.msk.f32.gmra.mrb[4].mxu0 %vm758_vm5, %v4812_v26 }
 0x62f   : > { %5393 = vmatprep.mubr.msk.f32.mxu1 %vm758_vm5, %v1241_v27  ;;  %5445 = vmatprep.mubr.msk.f32.mxu0 %vm758_vm5, %v4813_v28 }
 0x630   : > { %5582 = vmatpush3.bf16.xpose.msk.msra.mxu1 %vm6272_vm8, %v5577_v18  ;;  %v1268_v18 = vld [vmem:[%s7327_s5 + $0xf8] sm:$0xff] }
 0x631   : > { %5585 = vmatprep.subr.msk.bf16.mxu1 %vm6272_vm8, %v5583_v29 }
 0x632   : > { %5394 = vmatmul.mubr.msk.f32.gmra.mrb[12].mxu1 %vm758_vm5, %v1242_v30  ;;  %5446 = vmatmul.mubr.msk.f32.gmra.mrb[6].mxu0 %vm758_vm5, %v4814_v31  ;;  %v5672_v30 = vld [vmem:[%s6597_s0] ss:$8 sps:$4 sm:$0xff]  }
 0x633   : > { %5396 = vmatprep.mubr.msk.f32.mxu1 %vm758_vm5, %v1243_v32  ;;  %5448 = vmatprep.mubr.msk.f32.mxu0 %vm758_vm5, %v4815_v33 }
 0x636   : > { %5397 = vmatmul.mubr.msk.f32.gmra.mrb[14].mxu1 %vm758_vm5, %v1244_v34  ;;  %5449 = vmatmul.mubr.msk.f32.gmra.mrb[8].mxu0 %vm758_vm5, %v4816_v35  ;;  %v5677_v35 = vld [vmem:[%s6597_s0 + $0x14] ss:$8 sps:$4 sm:$0xff]  }
 0x637   : > { %5399 = vmatprep.mubr.msk.f32.mxu1 %vm758_vm5, %v1245_v36  ;;  %5451 = vmatprep.mubr.msk.f32.mxu0 %vm758_vm5, %v4817_v37 }
 0x638   : > { %5588 = vmatpush3.bf16.xpose.msk.msra.mxu1 %vm6272_vm8, %v5583_v29 }
 0x639   : > { %3382 = vmatprep.subr.bf16.mxu1 %v5674_v20  ;;  %v5681_v20 = vld [vmem:[%s6597_s0 + $0x30] ss:$8 sps:$4 sm:$0xff]  }
 0x63a   : > { %5400 = vmatmul.mubr.msk.f32.gmra.mrb[16].mxu1 %vm758_vm5, %v1246_v38  ;;  %5452 = vmatmul.mubr.msk.f32.gmra.mrb[10].mxu0 %vm758_vm5, %v4818_v39 }
 0x63b   : > { %5402 = vmatprep.mubr.msk.f32.mxu1 %vm758_vm5, %v1247_v40  ;;  %5454 = vmatprep.mubr.msk.f32.mxu0 %vm758_vm5, %v4819_v41 }
 0x63e   : > { %5403 = vmatmul.mubr.msk.f32.gmra.mrb[18].mxu1 %vm758_vm5, %v1248_v42  ;;  %5455 = vmatmul.mubr.msk.f32.gmra.mrb[12].mxu0 %vm758_vm5, %v4820_v43 }
 0x63f   : > { %5405 = vmatprep.mubr.msk.f32.mxu1 %vm758_vm5, %v1249_v17  ;;  %5457 = vmatprep.mubr.msk.f32.mxu0 %vm758_vm5, %v4821_v45 }
 0x642   : > { %5406 = vmatmul.mubr.msk.f32.gmra.mrb[20].mxu1 %vm758_vm5, %v1250_v46  ;;  %5458 = vmatmul.mubr.msk.f32.gmra.mrb[14].mxu0 %vm758_vm5, %v4822_v47 }
 0x643   : > { %5408 = vmatprep.mubr.msk.f32.mxu1 %vm758_vm5, %v1251_v48  ;;  %5460 = vmatprep.mubr.msk.f32.mxu0 %vm758_vm5, %v4823_v49  ;;  %v5675_v48 = vld [vmem:[%s6597_s0 + $0x10] ss:$8 sps:$4 sm:$0xff]  }
 0x646   : > { %5409 = vmatmul.mubr.msk.f32.gmra.mrb[22].mxu1 %vm758_vm5, %v1252_v50  ;;  %5461 = vmatmul.mubr.msk.f32.gmra.mrb[16].mxu0 %vm758_vm5, %v4824_v52 }
 0x647   : > { %5411 = vmatprep.mubr.msk.f32.mxu1 %vm758_vm5, %v1253_v53  ;;  %5463 = vmatprep.mubr.msk.f32.mxu0 %vm758_vm5, %v4825_v54  ;;  %v5680_v54 = vld [vmem:[%s6597_s0 + $0x24] ss:$8 sps:$4 sm:$0xff]  }
 0x64a   : > { %5412 = vmatmul.mubr.msk.f32.gmra.mrb[24].mxu1 %vm758_vm5, %v1254_v55  ;;  %5464 = vmatmul.mubr.msk.f32.gmra.mrb[18].mxu0 %vm758_vm5, %v4826_v56 }
 0x64b   : > { %5414 = vmatprep.mubr.msk.f32.mxu1 %vm758_vm5, %v1255_v57  ;;  %5466 = vmatprep.mubr.msk.f32.mxu0 %vm758_vm5, %v4827_v58 }
 0x64e   : > { %5415 = vmatmul.mubr.msk.f32.gmra.mrb[26].mxu1 %vm758_vm5, %v1256_v59  ;;  %5467 = vmatmul.mubr.msk.f32.gmra.mrb[20].mxu0 %vm758_vm5, %v4828_v60 }
 0x64f   : > { %5417 = vmatprep.mubr.msk.f32.mxu1 %vm758_vm5, %v1257_v61  ;;  %5469 = vmatprep.mubr.msk.f32.mxu0 %vm758_vm5, %v4829_v62 }
 0x652   : > { %5418 = vmatmul.mubr.msk.f32.gmra.mrb[28].mxu1 %vm758_vm5, %v1258_v63  ;;  %5470 = vmatmul.mubr.msk.f32.gmra.mrb[22].mxu0 %vm758_vm5, %v4830_v0 }
 0x653   : > { %5420 = vmatprep.mubr.msk.f32.mxu1 %vm758_vm5, %v1259_v1  ;;  %5472 = vmatprep.mubr.msk.f32.mxu0 %vm758_vm5, %v4831_v2 }
 0x656   : > { %5421 = vmatmul.mubr.msk.f32.gmra.mrb[30].mxu1 %vm758_vm5, %v1260_v3  ;;  %5473 = vmatmul.mubr.msk.f32.gmra.mrb[24].mxu0 %vm758_vm5, %v4832_v4  ;;  %v5678_v3 = vld [vmem:[%s6597_s0 + $0x20] ss:$8 sps:$4 sm:$0xff]  }
 0x657   : > { %5423 = vmatprep.mubr.msk.f32.mxu1 %vm758_vm5, %v1261_v5  ;;  %5475 = vmatprep.mubr.msk.f32.mxu0 %vm758_vm5, %v4833_v6 }
 0x65a   : > { %5424 = vmatmul.mubr.msk.f32.gmra.mrb[32].mxu1 %vm758_vm5, %v1262_v44  ;;  %5476 = vmatmul.mubr.msk.f32.gmra.mrb[26].mxu0 %vm758_vm5, %v4834_v7  ;;  %v5683_v7 = vld [vmem:[%s6597_s0 + $0x34] ss:$8 sps:$4 sm:$0xff]  }
 0x65b   : > { %5426 = vmatprep.mubr.msk.f32.mxu1 %vm758_vm5, %v1263_v51  ;;  %5478 = vmatprep.mubr.msk.f32.mxu0 %vm758_vm5, %v4835_v8 }
 0x65e   : > { %5427 = vmatmul.mubr.msk.f32.gmra.mrb[34].mxu1 %vm758_vm5, %v1264_v9  ;;  %5479 = vmatmul.mubr.msk.f32.gmra.mrb[28].mxu0 %vm758_vm5, %v4836_v10 }
 0x65f   : > { %5429 = vmatprep.mubr.msk.f32.mxu1 %vm758_vm5, %v1265_v11  ;;  %5481 = vmatprep.mubr.msk.f32.mxu0 %vm758_vm5, %v4837_v12 }
 0x662   : > { %5430 = vmatmul.mubr.msk.f32.gmra.mrb[36].mxu1 %vm758_vm5, %v1266_v13  ;;  %5482 = vmatmul.mubr.msk.f32.gmra.mrb[30].mxu0 %vm758_vm5, %v4838_v14 }
 0x663   : > { %5432 = vmatprep.mubr.msk.f32.mxu1 %vm758_vm5, %v1267_v15  ;;  %5484 = vmatprep.mubr.msk.f32.mxu0 %vm758_vm5, %v4839_v16 }
 0x666   : > { %5433 = vmatmul.mubr.msk.f32.gmra.mrb[38].mxu1 %vm758_vm5, %v1268_v18  ;;  %5485 = vmatmul.mubr.msk.f32.gmra.mrb[32].mxu0 %vm758_vm5, %v4840_v19 }
 0x6fd   : > { %v5389_v21 = vpop.f32.mrb[8].mxu1  ;;  %v5441_v22 = vpop.f32.mrb[2].mxu0 }
 0x6fe   : > { %v1945_v23 = vsub.f32 %v5389_v21, %v5441_v22  ;;  %v1464_v24 = vpop.f32.mrb[9].mxu1  ;;  %v1785_v25 = vpop.f32.mrb[3].mxu0 }
 0x6ff   : > { %v1944_v26 = vsub.f32 %v1464_v24, %v1785_v25  ;;  %v5686_v25 = vld [vmem:[%s6597_s0 + $0x44] ss:$8 sps:$4 sm:$0xff]  }
 0x700   : > { %v1977_v31 = vand.u32 2147483647, %v1945_v23 }
 0x701   : > { %v1976_v27 = vand.u32 2147483647, %v1944_v26  ;;  %v5392_v28 = vpop.f32.mrb[10].mxu1  ;;  %v5444_v29 = vpop.f32.mrb[4].mxu0 }
 0x702   : > { %v1947_v32 = vsub.f32 %v5392_v28, %v5444_v29  ;;  %v1474_v33 = vpop.f32.mrb[11].mxu1  ;;  %v1795_v34 = vpop.f32.mrb[5].mxu0 }
 0x703   : > { %v1946_v36 = vsub.f32 %v1474_v33, %v1795_v34  ;;  %5495 = vmatprep.mubr.msk.f32.mxu1 %vm758_vm5, %v1976_v27 }
 0x704   : > { %5496 = vmatmul.mubr.msk.f32.vlgmr.msra.gmra.mrb[40].mxu1 %vm758_vm5, %v1977_v31  ;;  %v1979_v40 = vand.u32 2147483647, %v1947_v32 }
 0x705   : > { %v1978_v37 = vand.u32 2147483647, %v1946_v36  ;;  %3383 = vmatpush1.bf16.xpose.msra.mxu1 %v5672_v30  ;;  %v5395_v38 = vpop.f32.mrb[12].mxu1  ;;  %v5447_v39 = vpop.f32.mrb[6].mxu0 }
 0x706   : > { %v1949_v41 = vsub.f32 %v5395_v38, %v5447_v39  ;;  %v1484_v42 = vpop.f32.mrb[13].mxu1  ;;  %v1805_v43 = vpop.f32.mrb[7].mxu0  ;;  %3384 = vmatprep.subr.bf16.mxu1 %v5677_v35  ;;  %v5684_v38 = vld [vmem:[%s6597_s0 + $0x40] ss:$8 sps:$4 sm:$0xff]  }
 0x707   : > { %v1948_v17 = vsub.f32 %v1484_v42, %v1805_v43  ;;  %5498 = vmatprep.mubr.msk.f32.mxu1 %vm758_vm5, %v1978_v37  ;;  %v5689_v43 = vld [vmem:[%s6597_s0 + $0x54] ss:$8 sps:$4 sm:$0xff]  }
 0x708   : > { %5499 = vmatmul.mubr.msk.f32.gmra.mrb[42].mxu1 %vm758_vm5, %v1979_v40  ;;  %v1981_v49 = vand.u32 2147483647, %v1949_v41 }
 0x709   : > { %v1980_v45 = vand.u32 2147483647, %v1948_v17  ;;  %v5398_v46 = vpop.f32.mrb[14].mxu1  ;;  %v5450_v47 = vpop.f32.mrb[8].mxu0 }
 0x70a   : > { %v1951_v50 = vsub.f32 %v5398_v46, %v5450_v47  ;;  %v1494_v52 = vpop.f32.mrb[15].mxu1  ;;  %v1815_v53 = vpop.f32.mrb[9].mxu0 }
 0x70b   : > { %v1950_v55 = vsub.f32 %v1494_v52, %v1815_v53  ;;  %5501 = vmatprep.mubr.msk.f32.mxu1 %vm758_vm5, %v1980_v45 }
 0x70c   : > { %5502 = vmatmul.mubr.msk.f32.gmra.mrb[44].mxu1 %vm758_vm5, %v1981_v49  ;;  %v1983_v59 = vand.u32 2147483647, %v1951_v50 }
 0x70d   : > { %v1982_v56 = vand.u32 2147483647, %v1950_v55  ;;  %3385 = vmatpush1.bf16.xpose.msra.mxu1 %v5675_v48  ;;  %v5401_v57 = vpop.f32.mrb[16].mxu1  ;;  %v5453_v58 = vpop.f32.mrb[10].mxu0 }
 0x70e   : > { %v1953_v60 = vsub.f32 %v5401_v57, %v5453_v58  ;;  %v1504_v61 = vpop.f32.mrb[17].mxu1  ;;  %v1825_v62 = vpop.f32.mrb[11].mxu0  ;;  %3386 = vmatprep.subr.bf16.mxu1 %v5680_v54  ;;  %v5687_v57 = vld [vmem:[%s6597_s0 + $0x50] ss:$8 sps:$4 sm:$0xff]  }
 0x70f   : > { %v1952_v63 = vsub.f32 %v1504_v61, %v1825_v62  ;;  %5504 = vmatprep.mubr.msk.f32.mxu1 %vm758_vm5, %v1982_v56  ;;  %v5692_v62 = vld [vmem:[%s6597_s0 + $0x64] ss:$8 sps:$4 sm:$0xff]  }
 0x710   : > { %5505 = vmatmul.mubr.msk.f32.gmra.mrb[46].mxu1 %vm758_vm5, %v1983_v59  ;;  %v1985_v4 = vand.u32 2147483647, %v1953_v60 }
 0x711   : > { %v1984_v0 = vand.u32 2147483647, %v1952_v63  ;;  %v5404_v1 = vpop.f32.mrb[18].mxu1  ;;  %v5456_v2 = vpop.f32.mrb[12].mxu0 }
 0x712   : > { %v1955_v5 = vsub.f32 %v5404_v1, %v5456_v2  ;;  %v1514_v6 = vpop.f32.mrb[19].mxu1  ;;  %v1835_v44 = vpop.f32.mrb[13].mxu0 }
 0x713   : > { %v1954_v51 = vsub.f32 %v1514_v6, %v1835_v44  ;;  %5507 = vmatprep.mubr.msk.f32.mxu1 %vm758_vm5, %v1984_v0 }
 0x714   : > { %5508 = vmatmul.mubr.msk.f32.gmra.mrb[48].mxu1 %vm758_vm5, %v1985_v4  ;;  %v1987_v11 = vand.u32 2147483647, %v1955_v5 }
 0x715   : > { %v1986_v8 = vand.u32 2147483647, %v1954_v51  ;;  %3387 = vmatpush1.bf16.xpose.msra.mxu1 %v5678_v3  ;;  %v5407_v9 = vpop.f32.mrb[20].mxu1  ;;  %v5459_v10 = vpop.f32.mrb[14].mxu0 }
 0x716   : > { %v1957_v12 = vsub.f32 %v5407_v9, %v5459_v10  ;;  %v1524_v13 = vpop.f32.mrb[21].mxu1  ;;  %v1845_v14 = vpop.f32.mrb[15].mxu0  ;;  %3388 = vmatprep.subr.bf16.mxu1 %v5683_v7  ;;  %v5690_v9 = vld [vmem:[%s6597_s0 + $0x60] ss:$8 sps:$4 sm:$0xff]  }
 0x717   : > { %v1956_v15 = vsub.f32 %v1524_v13, %v1845_v14  ;;  %5510 = vmatprep.mubr.msk.f32.mxu1 %vm758_vm5, %v1986_v8  ;;  %v5695_v14 = vld [vmem:[%s6597_s0 + $0x74] ss:$8 sps:$4 sm:$0xff]  }
 0x718   : > { %5511 = vmatmul.mubr.msk.f32.gmra.mrb[50].mxu1 %vm758_vm5, %v1987_v11  ;;  %v1989_v21 = vand.u32 2147483647, %v1957_v12 }
 0x719   : > { %v1988_v16 = vand.u32 2147483647, %v1956_v15  ;;  %v5410_v18 = vpop.f32.mrb[22].mxu1  ;;  %v5462_v19 = vpop.f32.mrb[16].mxu0 }
 0x71a   : > { %v1959_v22 = vsub.f32 %v5410_v18, %v5462_v19  ;;  %v1534_v23 = vpop.f32.mrb[23].mxu1  ;;  %v1855_v24 = vpop.f32.mrb[17].mxu0 }
 0x71b   : > { %v1958_v26 = vsub.f32 %v1534_v23, %v1855_v24  ;;  %5513 = vmatprep.mubr.msk.f32.mxu1 %vm758_vm5, %v1988_v16 }
 0x71c   : > { %5514 = vmatmul.mubr.msk.f32.gmra.mrb[52].mxu1 %vm758_vm5, %v1989_v21  ;;  %v1991_v30 = vand.u32 2147483647, %v1959_v22 }
 0x71d   : > { %v1990_v27 = vand.u32 2147483647, %v1958_v26  ;;  %3389 = vmatpush1.bf16.xpose.msra.mxu1 %v5681_v20  ;;  %v5413_v28 = vpop.f32.mrb[24].mxu1  ;;  %v5465_v29 = vpop.f32.mrb[18].mxu0 }
 0x71e   : > { %v1961_v31 = vsub.f32 %v5413_v28, %v5465_v29  ;;  %v1544_v32 = vpop.f32.mrb[25].mxu1  ;;  %v1865_v33 = vpop.f32.mrb[19].mxu0  ;;  %3390 = vmatprep.subr.bf16.mxu1 %v5686_v25  ;;  %v5693_v28 = vld [vmem:[%s6597_s0 + $0x70] ss:$8 sps:$4 sm:$0xff]  }
 0x71f   : > { %v1960_v34 = vsub.f32 %v1544_v32, %v1865_v33  ;;  %5516 = vmatprep.mubr.msk.f32.mxu1 %vm758_vm5, %v1990_v27  ;;  %v5698_v33 = vld [vmem:[%s6597_s0 + $0x84] ss:$8 sps:$4 sm:$0xff]  }
 0x720   : > { %5517 = vmatmul.mubr.msk.f32.gmra.mrb[54].mxu1 %vm758_vm5, %v1991_v30  ;;  %v1993_v39 = vand.u32 2147483647, %v1961_v31 }
 0x721   : > { %v1992_v35 = vand.u32 2147483647, %v1960_v34  ;;  %v5416_v36 = vpop.f32.mrb[26].mxu1  ;;  %v5468_v37 = vpop.f32.mrb[20].mxu0 }
 0x722   : > { %v1963_v40 = vsub.f32 %v5416_v36, %v5468_v37  ;;  %v1554_v41 = vpop.f32.mrb[27].mxu1  ;;  %v1875_v42 = vpop.f32.mrb[21].mxu0  ;;  %v6010_v36 = vld [vmem:[#allocation2 + $0x8] sm:$0xff]  ;;  %v6011_v37 = vld [vmem:[#allocation2 + $0x18] sm:$0xff] }
 0x723   : > { %v1962_v17 = vsub.f32 %v1554_v41, %v1875_v42  ;;  %5519 = vmatprep.mubr.msk.f32.mxu1 %vm758_vm5, %v1992_v35  ;;  %v5701_v41 = vld [vmem:[%s6597_s0 + $0x94] ss:$8 sps:$4 sm:$0xff]   ;;  %v5699_v42 = vld [vmem:[%s6597_s0 + $0x90] ss:$8 sps:$4 sm:$0xff]  }
 0x724   : > { %5520 = vmatmul.mubr.msk.f32.gmra.mrb[56].mxu1 %vm758_vm5, %v1993_v39  ;;  %v1995_v48 = vand.u32 2147483647, %v1963_v40  ;;  %v5696_v40 = vld [vmem:[%s6597_s0 + $0x80] ss:$8 sps:$4 sm:$0xff]  }
 0x725   : > { %v1994_v45 = vand.u32 2147483647, %v1962_v17  ;;  %3391 = vmatpush1.bf16.xpose.msra.mxu1 %v5684_v38  ;;  %v5419_v46 = vpop.f32.mrb[28].mxu1  ;;  %v5471_v47 = vpop.f32.mrb[22].mxu0  ;;  %v6646_v38 = vpack.c.bf16 %v6011_v37, %v6010_v36  ;;  %v5702_v17 = vld [vmem:[%s6597_s0 + $0xa0] ss:$8 sps:$4 sm:$0xff]  }
 0x726   : > { %v1965_v49 = vsub.f32 %v5419_v46, %v5471_v47  ;;  %v1564_v50 = vpop.f32.mrb[29].mxu1  ;;  %v1885_v52 = vpop.f32.mrb[23].mxu0  ;;  %3392 = vmatprep.subr.bf16.mxu1 %v5689_v43  ;;  %v5704_v43 = vld [vmem:[%s6597_s0 + $0xa4] ss:$8 sps:$4 sm:$0xff]   ;;  %v5705_v46 = vld [vmem:[%s6597_s0 + $0xb0] ss:$8 sps:$4 sm:$0xff]  }
 0x727   : > { %v1964_v53 = vsub.f32 %v1564_v50, %v1885_v52  ;;  %5522 = vmatprep.mubr.msk.f32.mxu1 %vm758_vm5, %v1994_v45  ;;  %v5707_v45 = vld [vmem:[%s6597_s0 + $0xb4] ss:$8 sps:$4 sm:$0xff]   ;;  %v5710_v47 = vld [vmem:[%s6597_s0 + $0xc4] ss:$8 sps:$4 sm:$0xff]   ;;  %v5711_v50 = vld [vmem:[%s6597_s0 + $0xd0] ss:$8 sps:$4 sm:$0xff]  }
 0x728   : > { %5523 = vmatmul.mubr.msk.f32.gmra.mrb[58].mxu1 %vm758_vm5, %v1995_v48  ;;  %v1997_v58 = vand.u32 2147483647, %v1965_v49  ;;  %v5708_v48 = vld [vmem:[%s6597_s0 + $0xc0] ss:$8 sps:$4 sm:$0xff]   ;;  %v5713_v49 = vld [vmem:[%s6597_s0 + $0xd4] ss:$8 sps:$4 sm:$0xff]  }
 0x729   : > { %v1996_v54 = vand.u32 2147483647, %v1964_v53  ;;  %v5422_v55 = vpop.f32.mrb[30].mxu1  ;;  %v5474_v56 = vpop.f32.mrb[24].mxu0  ;;  %v5716_v52 = vld [vmem:[%s6597_s0 + $0xe4] ss:$8 sps:$4 sm:$0xff]  }
 0x72a   : > { %v1967_v59 = vsub.f32 %v5422_v55, %v5474_v56  ;;  %v1574_v60 = vpop.f32.mrb[31].mxu1  ;;  %v1895_v61 = vpop.f32.mrb[25].mxu0  ;;  %v5714_v53 = vld [vmem:[%s6597_s0 + $0xe0] ss:$8 sps:$4 sm:$0xff]   ;;  %v5717_v55 = vld [vmem:[%s6597_s0 + $0xf0] ss:$8 sps:$4 sm:$0xff]  }
 0x72b   : > { %v1966_v63 = vsub.f32 %v1574_v60, %v1895_v61  ;;  %5525 = vmatprep.mubr.msk.f32.mxu1 %vm758_vm5, %v1996_v54  ;;  %v5719_v54 = vld [vmem:[%s6597_s0 + $0xf4] ss:$8 sps:$4 sm:$0xff]   ;;  %v5722_v56 = vld [vmem:[%s6597_s0 + $0x204] ss:$8 sps:$4 sm:$0xff]   ;;  %v5720_v60 = vld [vmem:[%s6597_s0 + $0x200] ss:$8 sps:$4 sm:$0xff]  }
 0x72c   : > { %5526 = vmatmul.mubr.msk.f32.gmra.mrb[60].mxu1 %vm758_vm5, %v1997_v58  ;;  %v1999_v3 = vand.u32 2147483647, %v1967_v59  ;;  %v6013_v58 = vld [vmem:[#allocation2 + $0x10] sm:$0xff] }
 0x72d   : > { %v1998_v0 = vand.u32 2147483647, %v1966_v63  ;;  %3393 = vmatpush1.bf16.xpose.msra.mxu1 %v5687_v57  ;;  %v5425_v1 = vpop.f32.mrb[32].mxu1  ;;  %v5477_v2 = vpop.f32.mrb[26].mxu0  ;;  %v6012_v57 = vld [vmem:[#allocation2] sm:$0xff] }
 0x72e   : > { %v1969_v4 = vsub.f32 %v5425_v1, %v5477_v2  ;;  %v1584_v5 = vpop.f32.mrb[33].mxu1  ;;  %v1905_v6 = vpop.f32.mrb[27].mxu0  ;;  %3394 = vmatprep.subr.bf16.mxu1 %v5692_v62  ;;  %v6667_v59 = vpack.c.bf16 %v6013_v58, %v6012_v57  ;;  %v5725_v61 = vld [vmem:[%s6597_s0 + $0x214] ss:$8 sps:$4 sm:$0xff]   ;;  %v5723_v62 = vld [vmem:[%s6597_s0 + $0x210] ss:$8 sps:$4 sm:$0xff]  }
 0x72f   : > { %v1968_v44 = vsub.f32 %v1584_v5, %v1905_v6  ;;  %5528 = vmatprep.mubr.msk.f32.mxu1 %vm758_vm5, %v1998_v0  ;;  %v5728_v63 = vld [vmem:[%s6597_s0 + $0x224] ss:$8 sps:$4 sm:$0xff]   ;;  %v5726_v0 = vld [vmem:[%s6597_s0 + $0x220] ss:$8 sps:$4 sm:$0xff]   ;;  %v5731_v1 = vld [vmem:[%s6597_s0 + $0x234] ss:$8 sps:$4 sm:$0xff]  }
 0x730   : > { %5529 = vmatmul.mubr.msk.f32.gmra.mrb[62].mxu1 %vm758_vm5, %v1999_v3  ;;  %v2001_v10 = vand.u32 2147483647, %v1969_v4  ;;  %v5729_v2 = vld [vmem:[%s6597_s0 + $0x230] ss:$8 sps:$4 sm:$0xff]   ;;  %v5734_v3 = vld [vmem:[%s6597_s0 + $0x244] ss:$8 sps:$4 sm:$0xff]  }
 0x731   : > { %v2000_v7 = vand.u32 2147483647, %v1968_v44  ;;  %v5428_v51 = vpop.f32.mrb[34].mxu1  ;;  %v5480_v8 = vpop.f32.mrb[28].mxu0  ;;  %v5732_v4 = vld [vmem:[%s6597_s0 + $0x240] ss:$8 sps:$4 sm:$0xff]  }
 0x732   : > { %v1971_v11 = vsub.f32 %v5428_v51, %v5480_v8  ;;  %v1594_v12 = vpop.f32.mrb[35].mxu1  ;;  %v1915_v13 = vpop.f32.mrb[29].mxu0  ;;  %v5737_v5 = vld [vmem:[%s6597_s0 + $0x254] ss:$8 sps:$4 sm:$0xff]   ;;  %v5735_v6 = vld [vmem:[%s6597_s0 + $0x250] ss:$8 sps:$4 sm:$0xff]  }
 0x733   : > { %v1970_v15 = vsub.f32 %v1594_v12, %v1915_v13  ;;  %5531 = vmatprep.mubr.msk.f32.mxu1 %vm758_vm5, %v2000_v7  ;;  %v5740_v44 = vld [vmem:[%s6597_s0 + $0x264] ss:$8 sps:$4 sm:$0xff]   ;;  %v5738_v7 = vld [vmem:[%s6597_s0 + $0x260] ss:$8 sps:$4 sm:$0xff]   ;;  %v5743_v51 = vld [vmem:[%s6597_s0 + $0x274] ss:$8 sps:$4 sm:$0xff]  }
 0x734   : > { %5532 = vmatmul.mubr.msk.f32.gmra.mrb[64].mxu1 %vm758_vm5, %v2001_v10  ;;  %v2003_v20 = vand.u32 2147483647, %v1971_v11  ;;  %v5741_v8 = vld [vmem:[%s6597_s0 + $0x270] ss:$8 sps:$4 sm:$0xff]   ;;  %v5744_v10 = vld [vmem:[%s6597_s0 + $0x280] ss:$8 sps:$4 sm:$0xff]  }
 0x735   : > { %v2002_v16 = vand.u32 2147483647, %v1970_v15  ;;  %3395 = vmatpush1.bf16.xpose.msra.mxu1 %v5690_v9  ;;  %v5431_v18 = vpop.f32.mrb[36].mxu1  ;;  %v5483_v19 = vpop.f32.mrb[30].mxu0  ;;  %v5746_v9 = vld [vmem:[%s6597_s0 + $0x284] ss:$8 sps:$4 sm:$0xff]  }
 0x736   : > { %v1973_v21 = vsub.f32 %v5431_v18, %v5483_v19  ;;  %v1604_v22 = vpop.f32.mrb[37].mxu1  ;;  %v1925_v23 = vpop.f32.mrb[31].mxu0  ;;  %3396 = vmatprep.subr.bf16.mxu1 %v5695_v14  ;;  %v5749_v11 = vld [vmem:[%s6597_s0 + $0x294] ss:$8 sps:$4 sm:$0xff]   ;;  %v5747_v12 = vld [vmem:[%s6597_s0 + $0x290] ss:$8 sps:$4 sm:$0xff]  }
 0x737   : > { %v1972_v24 = vsub.f32 %v1604_v22, %v1925_v23  ;;  %5534 = vmatprep.mubr.msk.f32.mxu1 %vm758_vm5, %v2002_v16  ;;  %v5752_v13 = vld [vmem:[%s6597_s0 + $0x2a4] ss:$8 sps:$4 sm:$0xff]   ;;  %v5750_v14 = vld [vmem:[%s6597_s0 + $0x2a0] ss:$8 sps:$4 sm:$0xff]   ;;  %v5755_v15 = vld [vmem:[%s6597_s0 + $0x2b4] ss:$8 sps:$4 sm:$0xff]  }
 0x738   : > { %5535 = vmatmul.mubr.msk.f32.gmra.mrb[66].mxu1 %vm758_vm5, %v2003_v20  ;;  %v2005_v29 = vand.u32 2147483647, %v1973_v21  ;;  %v6697_v16 = vld [vmem:[%s2014_s12] ss:$0 sm:$0xff]  ;;  %v6700_v21 = vpop.permute.xlu1 %2395  ;;  %v5753_v23 = vld [vmem:[%s6597_s0 + $0x2b0] ss:$8 sps:$4 sm:$0xff]  }
 0x739   : > { %v2004_v25 = vand.u32 2147483647, %v1972_v24  ;;  %v5434_v26 = vpop.f32.mrb[38].mxu1  ;;  %v5486_v27 = vpop.f32.mrb[32].mxu0 }
 0x73a   : > { %v1975_v30 = vsub.f32 %v5434_v26, %v5486_v27  ;;  %v1614_v31 = vpop.f32.mrb[39].mxu1  ;;  %v1935_v32 = vpop.f32.mrb[33].mxu0  ;;  %v5758_v26 = vld [vmem:[%s6597_s0 + $0x2c4] ss:$8 sps:$4 sm:$0xff]  }
 0x73b   : > { %v1974_v34 = vsub.f32 %v1614_v31, %v1935_v32  ;;  %5537 = vmatprep.mubr.msk.f32.mxu1 %vm758_vm5, %v2004_v25  ;;  %v6705_v25 = vld [vmem:[%s2014_s12 + $0x1] ss:$0 sm:$0xff] }
 0x73c   : > { %5538 = vmatmul.mubr.msk.f32.gmra.mrb[68].mxu1 %vm758_vm5, %v2005_v29  ;;  %v2007_v39 = vand.u32 2147483647, %v1975_v30 }
 0x73d   : > { %v2006_v35 = vand.u32 2147483647, %v1974_v34  ;;  %3397 = vmatpush1.bf16.xpose.msra.mxu1 %v5693_v28 }
 0x73e   : > { %3398 = vmatprep.subr.bf16.mxu1 %v5698_v33 }
 0x73f   : > { %5540 = vmatprep.mubr.msk.f32.mxu1 %vm758_vm5, %v2006_v35 }
 0x740   : > { %5541 = vmatmul.mubr.msk.f32.gmra.mrb[70].mxu1 %vm758_vm5, %v2007_v39 }
 0x741   : > { %3414 = vmatprep.mubr.bf16.mxu1 %v6646_v38 }
 0x745   : > { %3399 = vmatpush1.bf16.xpose.msra.mxu1 %v5696_v40 }
 0x746   : > { %3400 = vmatprep.subr.bf16.mxu1 %v5701_v41 }
 0x74d   : > { %3401 = vmatpush1.bf16.xpose.msra.mxu1 %v5699_v42 }
 0x74e   : > { %3402 = vmatprep.subr.bf16.mxu1 %v5704_v43 }
 0x755   : > { %3403 = vmatpush1.bf16.xpose.msra.mxu1 %v5702_v17 }
 0x756   : > { %3404 = vmatprep.subr.bf16.mxu1 %v5707_v45  ;;  %v5756_v45 = vld [vmem:[%s6597_s0 + $0x2c0] ss:$8 sps:$4 sm:$0xff]  }
 0x75d   : > { %3405 = vmatpush1.bf16.xpose.msra.mxu1 %v5705_v46 }
 0x75e   : > { %3406 = vmatprep.subr.bf16.mxu1 %v5710_v47 }
 0x765   : > { %3407 = vmatpush1.bf16.xpose.msra.mxu1 %v5708_v48 }
 0x766   : > { %3408 = vmatprep.subr.bf16.mxu1 %v5713_v49 }
 0x76d   : > { %3409 = vmatpush1.bf16.xpose.msra.mxu1 %v5711_v50  ;;  %v5761_v50 = vld [vmem:[%s6597_s0 + $0x2d4] ss:$8 sps:$4 sm:$0xff]  }
 0x76e   : > { %3410 = vmatprep.subr.bf16.mxu1 %v5716_v52 }
 0x775   : > { %3411 = vmatpush1.bf16.xpose.msra.mxu1 %v5714_v53 }
 0x776   : > { %3412 = vmatprep.subr.bf16.mxu1 %v5719_v54 }
 0x77d   : > { %3413 = vmatpush1.bf16.xpose.msra.mxu1 %v5717_v55 }
 0x77e   : > { %3468 = vmatprep.subr.bf16.mxu1 %v5722_v56 }
 0x784   : > { %3415 = vmatmul.mubr.bf16.vlgmr.msra.gmra.mrb[72].mxu1 %v6667_v59 }
 0x785   : > { %3469 = vmatpush1.bf16.xpose.msra.mxu1 %v5720_v60  ;;  %3500 = vmatprep.mubr.bf16.mxu1 %v6646_v38 }
 0x786   : > { %3470 = vmatprep.subr.bf16.mxu1 %v5725_v61 }
 0x78d   : > { %3471 = vmatpush1.bf16.xpose.msra.mxu1 %v5723_v62 }
 0x78e   : > { %3472 = vmatprep.subr.bf16.mxu1 %v5728_v63 }
 0x795   : > { %3473 = vmatpush1.bf16.xpose.msra.mxu1 %v5726_v0 }
 0x796   : > { %3474 = vmatprep.subr.bf16.mxu1 %v5731_v1 }
 0x79d   : > { %3475 = vmatpush1.bf16.xpose.msra.mxu1 %v5729_v2 }
 0x79e   : > { %3476 = vmatprep.subr.bf16.mxu1 %v5734_v3 }
 0x7a5   : > { %3477 = vmatpush1.bf16.xpose.msra.mxu1 %v5732_v4 }
 0x7a6   : > { %3478 = vmatprep.subr.bf16.mxu1 %v5737_v5 }
 0x7ad   : > { %3479 = vmatpush1.bf16.xpose.msra.mxu1 %v5735_v6 }
 0x7ae   : > { %3480 = vmatprep.subr.bf16.mxu1 %v5740_v44 }
 0x7b5   : > { %3481 = vmatpush1.bf16.xpose.msra.mxu1 %v5738_v7 }
 0x7b6   : > { %3482 = vmatprep.subr.bf16.mxu1 %v5743_v51  ;;  %v5759_v51 = vld [vmem:[%s6597_s0 + $0x2d0] ss:$8 sps:$4 sm:$0xff]  }
 0x7bd   : > { %3483 = vmatpush1.bf16.xpose.msra.mxu1 %v5741_v8 }
 0x7be   : > { %3484 = vmatprep.subr.bf16.mxu1 %v5746_v9 }
 0x7c5   : > { %3485 = vmatpush1.bf16.xpose.msra.mxu1 %v5744_v10 }
 0x7c6   : > { %3486 = vmatprep.subr.bf16.mxu1 %v5749_v11 }
 0x7cd   : > { %3487 = vmatpush1.bf16.xpose.msra.mxu1 %v5747_v12  ;;  %v5764_v12 = vld [vmem:[%s6597_s0 + $0x2e4] ss:$8 sps:$4 sm:$0xff]  }
 0x7ce   : > { %3488 = vmatprep.subr.bf16.mxu1 %v5752_v13 }
 0x7d5   : > { %3489 = vmatpush1.bf16.xpose.msra.mxu1 %v5750_v14 }
 0x7d6   : > { %3490 = vmatprep.subr.bf16.mxu1 %v5755_v15 }
 0x7d7   : > { %v5497_v18 = vpop.f32.mrb[40].mxu1 }
 0x7d8   : > { %v2202_v19 = vadd.f32 %v5497_v18, %v6697_v16  ;;  %v2196_v20 = vpop.f32.mrb[41].mxu1 }
 0x7d9   : > { %v2197_v22 = vadd.f32 %v6697_v16, %v2196_v20 }
 0x7da   : > { %vm2356_vm11 = vcmp.ge.f32.partialorder %v2202_v19, 0.0  ;;  %v2399_v24 = vmul.f32 %v6700_v21, %v2202_v19 }
 0x7db   : > { %vm2355_vm12 = vcmp.ge.f32.partialorder %v2197_v22, 0.0  ;;  %v2398_v27 = vmul.f32 %v6700_v21, %v2197_v22  ;;  %v5500_v28 = vpop.f32.mrb[42].mxu1 }
 0x7dc   : > { %v2212_v29 = vadd.f32 %v5500_v28, %v6697_v16  ;;  %v2206_v30 = vpop.f32.mrb[43].mxu1  ;;  %v2431_v31 = vsel %vm2356_vm11, %v2202_v19, %v2399_v24 }
 0x7dd   : > { %v2207_v32 = vadd.f32 %v6697_v16, %v2206_v30  ;;  %3491 = vmatpush1.bf16.xpose.msra.mxu1 %v5753_v23  ;;  %v2472_v33 = vmul.f32 %v6705_v25, %v2431_v31  ;;  %v2430_v34 = vsel %vm2355_vm12, %v2197_v22, %v2398_v27 }
 0x7de   : > { %vm2358_vm14 = vcmp.ge.f32.partialorder %v2212_v29, 0.0  ;;  %v2401_v35 = vmul.f32 %v6700_v21, %v2212_v29  ;;  %3492 = vmatprep.subr.bf16.mxu1 %v5758_v26  ;;  %v2471_v40 = vmul.f32 %v6705_v25, %v2430_v34 }
 0x7df   : > { %vm2357_vm15 = vcmp.ge.f32.partialorder %v2207_v32, 0.0  ;;  %v2400_v36 = vmul.f32 %v6700_v21, %v2207_v32  ;;  %v5503_v37 = vpop.f32.mrb[44].mxu1  ;;  %v2507_v39 = vsel %vm2503_vm13, %v2472_v33, 0.0 }
 0x7e0   : > { %v2222_v41 = vadd.f32 %v5503_v37, %v6697_v16  ;;  %2508 = vadd.xlane.f32.xlu1 %v2507_v39  ;;  %v2216_v42 = vpop.f32.mrb[45].mxu1  ;;  %v2433_v43 = vsel %vm2358_vm14, %v2212_v29, %v2401_v35  ;;  %v2504_v55 = vsel %vm2503_vm13, %v2471_v40, 0.0  ;;  %v5762_v37 = vld [vmem:[%s6597_s0 + $0x2e0] ss:$8 sps:$4 sm:$0xff]  }
 0x7e1   : > { %v2217_v17 = vadd.f32 %v6697_v16, %v2216_v42  ;;  %v2474_v46 = vmul.f32 %v6705_v25, %v2433_v43  ;;  %v2432_v47 = vsel %vm2357_vm15, %v2207_v32, %v2400_v36  ;;  %v5767_v43 = vld [vmem:[%s6597_s0 + $0x2f4] ss:$8 sps:$4 sm:$0xff]  }
 0x7e2   : > { %vm2360_vm0 = vcmp.ge.f32.partialorder %v2222_v41, 0.0  ;;  %v2403_v48 = vmul.f32 %v6700_v21, %v2222_v41  ;;  %v2473_v49 = vmul.f32 %v6705_v25, %v2432_v47 }
 0x7e3   : > { %vm2359_vm1 = vcmp.ge.f32.partialorder %v2217_v17, 0.0  ;;  %v2402_v52 = vmul.f32 %v6700_v21, %v2217_v17  ;;  %v5506_v53 = vpop.f32.mrb[46].mxu1  ;;  %v2513_v54 = vsel %vm2503_vm13, %v2474_v46, 0.0 }
 0x7e4   : > { %v2232_v56 = vadd.f32 %v5506_v53, %v6697_v16  ;;  %2514 = vadd.xlane.f32.xlu0 %v2513_v54  ;;  %v2226_v57 = vpop.f32.mrb[47].mxu1  ;;  %2505 = vadd.xlane.f32.xlu1 %v2504_v55  ;;  %v2435_v58 = vsel %vm2360_vm0, %v2222_v41, %v2403_v48  ;;  %v2510_v0 = vsel %vm2503_vm13, %v2473_v49, 0.0 }
 0x7e5   : > { %v2227_v60 = vadd.f32 %v6697_v16, %v2226_v57  ;;  %3493 = vmatpush1.bf16.xpose.msra.mxu1 %v5756_v45  ;;  %v2476_v61 = vmul.f32 %v6705_v25, %v2435_v58  ;;  %v2434_v62 = vsel %vm2359_vm1, %v2217_v17, %v2402_v52 }
 0x7e6   : > { %vm2362_vm2 = vcmp.ge.f32.partialorder %v2232_v56, 0.0  ;;  %v2405_v63 = vmul.f32 %v6700_v21, %v2232_v56  ;;  %3494 = vmatprep.subr.bf16.mxu1 %v5761_v50  ;;  %v2475_v4 = vmul.f32 %v6705_v25, %v2434_v62 }
 0x7e7   : > { %vm2361_vm3 = vcmp.ge.f32.partialorder %v2227_v60, 0.0  ;;  %v2404_v1 = vmul.f32 %v6700_v21, %v2227_v60  ;;  %v5509_v2 = vpop.f32.mrb[48].mxu1  ;;  %v2519_v3 = vsel %vm2503_vm13, %v2476_v61, 0.0 }
 0x7e8   : > { %v2242_v5 = vadd.f32 %v5509_v2, %v6697_v16  ;;  %2520 = vadd.xlane.f32.xlu0 %v2519_v3  ;;  %v2236_v6 = vpop.f32.mrb[49].mxu1  ;;  %2511 = vadd.xlane.f32.xlu1 %v2510_v0  ;;  %v2437_v44 = vsel %vm2362_vm2, %v2232_v56, %v2405_v63  ;;  %v2516_v18 = vsel %vm2503_vm13, %v2475_v4, 0.0  ;;  %v5765_v2 = vld [vmem:[%s6597_s0 + $0x2f0] ss:$8 sps:$4 sm:$0xff]  }
 0x7e9   : > { %v2237_v7 = vadd.f32 %v6697_v16, %v2236_v6  ;;  %v2478_v8 = vmul.f32 %v6705_v25, %v2437_v44  ;;  %v2436_v9 = vsel %vm2361_vm3, %v2227_v60, %v2404_v1 }
 0x7ea   : > { %vm2364_vm4 = vcmp.ge.f32.partialorder %v2242_v5, 0.0  ;;  %v2407_v10 = vmul.f32 %v6700_v21, %v2242_v5  ;;  %v2477_v11 = vmul.f32 %v6705_v25, %v2436_v9 }
 0x7eb   : > { %vm2363_vm6 = vcmp.ge.f32.partialorder %v2237_v7, 0.0  ;;  %v2406_v13 = vmul.f32 %v6700_v21, %v2237_v7  ;;  %v5512_v14 = vpop.f32.mrb[50].mxu1  ;;  %v2525_v15 = vsel %vm2503_vm13, %v2478_v8, 0.0 }
 0x7ec   : > { %v2252_v19 = vadd.f32 %v5512_v14, %v6697_v16  ;;  %2526 = vadd.xlane.f32.xlu0 %v2525_v15  ;;  %v2246_v20 = vpop.f32.mrb[51].mxu1  ;;  %2517 = vadd.xlane.f32.xlu1 %v2516_v18  ;;  %v2439_v22 = vsel %vm2364_vm4, %v2242_v5, %v2407_v10  ;;  %v2522_v28 = vsel %vm2503_vm13, %v2477_v11, 0.0 }
 0x7ed   : > { %v2247_v23 = vadd.f32 %v6697_v16, %v2246_v20  ;;  %3495 = vmatpush1.bf16.xpose.msra.mxu1 %v5759_v51  ;;  %v2480_v24 = vmul.f32 %v6705_v25, %v2439_v22  ;;  %v2438_v26 = vsel %vm2363_vm6, %v2237_v7, %v2406_v13 }
 0x7ee   : > { %vm2366_vm7 = vcmp.ge.f32.partialorder %v2252_v19, 0.0  ;;  %v2409_v27 = vmul.f32 %v6700_v21, %v2252_v19  ;;  %3496 = vmatprep.subr.bf16.mxu1 %v5764_v12  ;;  %v2479_v32 = vmul.f32 %v6705_v25, %v2438_v26 }
 0x7ef   : > { %vm2365_vm8 = vcmp.ge.f32.partialorder %v2247_v23, 0.0  ;;  %v2408_v29 = vmul.f32 %v6700_v21, %v2247_v23  ;;  %v5515_v30 = vpop.f32.mrb[52].mxu1  ;;  %v2531_v31 = vsel %vm2503_vm13, %v2480_v24, 0.0 }
 0x7f0   : > { %v2262_v33 = vadd.f32 %v5515_v30, %v6697_v16  ;;  %2532 = vadd.xlane.f32.xlu0 %v2531_v31  ;;  %v2256_v34 = vpop.f32.mrb[53].mxu1  ;;  %2523 = vadd.xlane.f32.xlu1 %v2522_v28  ;;  %v2441_v35 = vsel %vm2366_vm7, %v2252_v19, %v2409_v27  ;;  %v2528_v47 = vsel %vm2503_vm13, %v2479_v32, 0.0 }
 0x7f1   : > { %v2257_v36 = vadd.f32 %v6697_v16, %v2256_v34  ;;  %v2482_v39 = vmul.f32 %v6705_v25, %v2441_v35  ;;  %v2440_v40 = vsel %vm2365_vm8, %v2247_v23, %v2408_v29 }
 0x7f2   : > { %vm2368_vm9 = vcmp.ge.f32.partialorder %v2262_v33, 0.0  ;;  %v2411_v41 = vmul.f32 %v6700_v21, %v2262_v33  ;;  %v2481_v42 = vmul.f32 %v6705_v25, %v2440_v40 }
 0x7f3   : > { %vm2367_vm10 = vcmp.ge.f32.partialorder %v2257_v36, 0.0  ;;  %v2410_v17 = vmul.f32 %v6700_v21, %v2257_v36  ;;  %v5518_v45 = vpop.f32.mrb[54].mxu1  ;;  %v2537_v46 = vsel %vm2503_vm13, %v2482_v39, 0.0 }
 0x7f4   : > { %v2272_v48 = vadd.f32 %v5518_v45, %v6697_v16  ;;  %2538 = vadd.xlane.f32.xlu0 %v2537_v46  ;;  %v2266_v49 = vpop.f32.mrb[55].mxu1  ;;  %2529 = vadd.xlane.f32.xlu1 %v2528_v47  ;;  %v2443_v50 = vsel %vm2368_vm9, %v2262_v33, %v2411_v41  ;;  %v2534_v56 = vsel %vm2503_vm13, %v2481_v42, 0.0 }
 0x7f5   : > { %v2267_v52 = vadd.f32 %v6697_v16, %v2266_v49  ;;  %3497 = vmatpush1.bf16.xpose.msra.mxu1 %v5762_v37  ;;  %v2484_v53 = vmul.f32 %v6705_v25, %v2443_v50  ;;  %v2442_v54 = vsel %vm2367_vm10, %v2257_v36, %v2410_v17 }
 0x7f6   : > { %vm2370_vm11 = vcmp.ge.f32.partialorder %v2272_v48, 0.0  ;;  %v2413_v55 = vmul.f32 %v6700_v21, %v2272_v48  ;;  %3498 = vmatprep.subr.bf16.mxu1 %v5767_v43  ;;  %v2483_v61 = vmul.f32 %v6705_v25, %v2442_v54 }
 0x7f7   : > { %vm2369_vm12 = vcmp.ge.f32.partialorder %v2267_v52, 0.0  ;;  %v2412_v57 = vmul.f32 %v6700_v21, %v2267_v52  ;;  %v5521_v58 = vpop.f32.mrb[56].mxu1  ;;  %v2543_v60 = vsel %vm2503_vm13, %v2484_v53, 0.0 }
 0x7f8   : > { %v2282_v62 = vadd.f32 %v5521_v58, %v6697_v16  ;;  %2544 = vadd.xlane.f32.xlu0 %v2543_v60  ;;  %v2276_v63 = vpop.f32.mrb[57].mxu1  ;;  %2535 = vadd.xlane.f32.xlu1 %v2534_v56  ;;  %v2445_v0 = vsel %vm2370_vm11, %v2272_v48, %v2413_v55  ;;  %v2540_v51 = vsel %vm2503_vm13, %v2483_v61, 0.0 }
 0x7f9   : > { %v2277_v1 = vadd.f32 %v6697_v16, %v2276_v63  ;;  %v2486_v3 = vmul.f32 %v6705_v25, %v2445_v0  ;;  %v2444_v4 = vsel %vm2369_vm12, %v2267_v52, %v2412_v57 }
 0x7fa   : > { %vm2372_vm14 = vcmp.ge.f32.partialorder %v2282_v62, 0.0  ;;  %v2415_v5 = vmul.f32 %v6700_v21, %v2282_v62  ;;  %v2485_v6 = vmul.f32 %v6705_v25, %v2444_v4 }
 0x7fb   : > { %vm2371_vm15 = vcmp.ge.f32.partialorder %v2277_v1, 0.0  ;;  %v2414_v44 = vmul.f32 %v6700_v21, %v2277_v1  ;;  %v5524_v7 = vpop.f32.mrb[58].mxu1  ;;  %v6779_v8 = vsel %vm2503_vm13, %v2486_v3, 0.0 }
 0x7fc   : > { %v2292_v9 = vadd.f32 %v5524_v7, %v6697_v16  ;;  %v2286_v10 = vpop.f32.mrb[59].mxu1  ;;  %2541 = vadd.xlane.f32.xlu1 %v2540_v51  ;;  %v2447_v11 = vsel %vm2372_vm14, %v2282_v62, %v2415_v5  ;;  %v6783_v12 = vsel %vm2503_vm13, %v2485_v6, 0.0 }
 0x7fd   : > { %v2287_v13 = vadd.f32 %v6697_v16, %v2286_v10  ;;  %3499 = vmatpush1.bf16.xpose.msra.mxu1 %v5765_v2  ;;  %v2488_v14 = vmul.f32 %v6705_v25, %v2447_v11  ;;  %v2446_v15 = vsel %vm2371_vm15, %v2277_v1, %v2414_v44 }
 0x7fe   : > { %vm2374_vm0 = vcmp.ge.f32.partialorder %v2292_v9, 0.0  ;;  %v2417_v18 = vmul.f32 %v6700_v21, %v2292_v9  ;;  %v2487_v19 = vmul.f32 %v6705_v25, %v2446_v15 }
 0x7ff   : > { %vm2373_vm1 = vcmp.ge.f32.partialorder %v2287_v13, 0.0  ;;  %v2416_v20 = vmul.f32 %v6700_v21, %v2287_v13  ;;  %v5527_v22 = vpop.f32.mrb[60].mxu1  ;;  %v2555_v23 = vsel %vm2503_vm13, %v2488_v14, 0.0 }
 0x800   : > { %v2302_v24 = vadd.f32 %v5527_v22, %v6697_v16  ;;  %2556 = vadd.xlane.f32.xlu0 %v2555_v23  ;;  %v2296_v26 = vpop.f32.mrb[61].mxu1  ;;  %v2552_v27 = vsel %vm2503_vm13, %v2487_v19, 0.0  ;;  %v2449_v28 = vsel %vm2374_vm0, %v2292_v9, %v2417_v18 }
 0x801   : > { %v2297_v29 = vadd.f32 %v6697_v16, %v2296_v26  ;;  %2553 = vadd.xlane.f32.xlu1 %v2552_v27  ;;  %v2490_v30 = vmul.f32 %v6705_v25, %v2449_v28  ;;  %v2448_v31 = vsel %vm2373_vm1, %v2287_v13, %v2416_v20 }
 0x802   : > { %vm2376_vm2 = vcmp.ge.f32.partialorder %v2302_v24, 0.0  ;;  %v2419_v32 = vmul.f32 %v6700_v21, %v2302_v24  ;;  %v2489_v33 = vmul.f32 %v6705_v25, %v2448_v31 }
 0x803   : > { %vm2375_vm3 = vcmp.ge.f32.partialorder %v2297_v29, 0.0  ;;  %v2418_v34 = vmul.f32 %v6700_v21, %v2297_v29  ;;  %v5530_v35 = vpop.f32.mrb[62].mxu1  ;;  %v2561_v36 = vsel %vm2503_vm13, %v2490_v30, 0.0 }
 0x804   : > { %v2312_v37 = vadd.f32 %v5530_v35, %v6697_v16  ;;  %3501 = vmatmul.mubr.bf16.vlgmr.msra.gmra.mrb[76].mxu1 %v6667_v59  ;;  %2562 = vadd.xlane.f32.xlu0 %v2561_v36  ;;  %v2306_v39 = vpop.f32.mrb[63].mxu1  ;;  %v2558_v40 = vsel %vm2503_vm13, %v2489_v33, 0.0  ;;  %v2451_v41 = vsel %vm2376_vm2, %v2302_v24, %v2419_v32 }
 0x805   : > { %v2307_v42 = vadd.f32 %v6697_v16, %v2306_v39  ;;  %2559 = vadd.xlane.f32.xlu1 %v2558_v40  ;;  %v2492_v43 = vmul.f32 %v6705_v25, %v2451_v41  ;;  %v2450_v17 = vsel %vm2375_vm3, %v2297_v29, %v2418_v34 }
 0x806   : > { %vm2378_vm4 = vcmp.ge.f32.partialorder %v2312_v37, 0.0  ;;  %v2421_v45 = vmul.f32 %v6700_v21, %v2312_v37  ;;  %v2491_v46 = vmul.f32 %v6705_v25, %v2450_v17 }
 0x807   : > { %vm2377_vm6 = vcmp.ge.f32.partialorder %v2307_v42, 0.0  ;;  %v2420_v47 = vmul.f32 %v6700_v21, %v2307_v42  ;;  %v5533_v48 = vpop.f32.mrb[64].mxu1  ;;  %v2567_v49 = vsel %vm2503_vm13, %v2492_v43, 0.0 }
 0x808   : > { %v2322_v50 = vadd.f32 %v5533_v48, %v6697_v16  ;;  %2568 = vadd.xlane.f32.xlu0 %v2567_v49  ;;  %v2316_v52 = vpop.f32.mrb[65].mxu1  ;;  %v2564_v53 = vsel %vm2503_vm13, %v2491_v46, 0.0  ;;  %v2453_v54 = vsel %vm2378_vm4, %v2312_v37, %v2421_v45 }
 0x809   : > { %v2317_v55 = vadd.f32 %v6697_v16, %v2316_v52  ;;  %2565 = vadd.xlane.f32.xlu1 %v2564_v53  ;;  %v2494_v56 = vmul.f32 %v6705_v25, %v2453_v54  ;;  %v2452_v57 = vsel %vm2377_vm6, %v2307_v42, %v2420_v47  ;;  %v4953_v47 = vld [vmem:[%s6294_s25 + $0x1] ss:$0 sm:$0xff]  ;;  %v4960_v53 = vld [vmem:[%s7363_s8 + $0x10] sm:$0xff]  ;;  %v4961_v54 = vld [vmem:[%s7363_s8 + $0x18] sm:$0xff] }
 0x80a   : > { %vm2380_vm7 = vcmp.ge.f32.partialorder %v2322_v50, 0.0  ;;  %v2423_v58 = vmul.f32 %v6700_v21, %v2322_v50  ;;  %v2493_v60 = vmul.f32 %v6705_v25, %v2452_v57  ;;  %v2793_v52 = vld [vmem:[%s7362_s22] sm:$0xff]  ;;  %s5176_s22 = sshll.u32 %s6070_s21, 4 }
 0x80b   : > { %vm2379_vm8 = vcmp.ge.f32.partialorder %v2317_v55, 0.0  ;;  %v2422_v61 = vmul.f32 %v6700_v21, %v2317_v55  ;;  %v5536_v62 = vpop.f32.mrb[66].mxu1  ;;  %v2573_v63 = vsel %vm2503_vm13, %v2494_v56, 0.0  ;;  %v4963_v56 = vld [vmem:[%s7363_s8 + $0x28] sm:$0xff]  ;;  %s4428_s26 = scalar_lea.vmem %s7368_s24, %s5176_s22 }
 0x80c   : > { %v2332_v0 = vadd.f32 %v5536_v62, %v6697_v16  ;;  %2574 = vadd.xlane.f32.xlu0 %v2573_v63  ;;  %v2326_v1 = vpop.f32.mrb[67].mxu1  ;;  %v2570_v2 = vsel %vm2503_vm13, %v2493_v60, 0.0  ;;  %v2455_v3 = vsel %vm2380_vm7, %v2322_v50, %v2423_v58 }
 0x80d   : > { %v2327_v4 = vadd.f32 %v6697_v16, %v2326_v1  ;;  %2571 = vadd.xlane.f32.xlu1 %v2570_v2  ;;  %v2496_v5 = vmul.f32 %v6705_v25, %v2455_v3  ;;  %v2454_v6 = vsel %vm2379_vm8, %v2317_v55, %v2422_v61  ;;  %v4962_v55 = vld [vmem:[%s7363_s8 + $0x20] sm:$0xff] }
 0x80e   : > { %vm2382_vm9 = vcmp.ge.f32.partialorder %v2332_v0, 0.0  ;;  %v2425_v44 = vmul.f32 %v6700_v21, %v2332_v0  ;;  %v2495_v7 = vmul.f32 %v6705_v25, %v2454_v6 }
 0x80f   : > { %vm2381_vm10 = vcmp.ge.f32.partialorder %v2327_v4, 0.0  ;;  %v2424_v51 = vmul.f32 %v6700_v21, %v2327_v4  ;;  %v5539_v9 = vpop.f32.mrb[68].mxu1  ;;  %v2579_v10 = vsel %vm2503_vm13, %v2496_v5, 0.0 }
 0x810   : > { %v2342_v11 = vadd.f32 %v5539_v9, %v6697_v16  ;;  %2580 = vadd.xlane.f32.xlu0 %v2579_v10  ;;  %v2336_v13 = vpop.f32.mrb[69].mxu1  ;;  %v2576_v14 = vsel %vm2503_vm13, %v2495_v7, 0.0  ;;  %v2457_v15 = vsel %vm2382_vm9, %v2332_v0, %v2425_v44 }
 0x811   : > { %v2337_v18 = vadd.f32 %v6697_v16, %v2336_v13  ;;  %2577 = vadd.xlane.f32.xlu1 %v2576_v14  ;;  %v2498_v19 = vmul.f32 %v6705_v25, %v2457_v15  ;;  %v2456_v20 = vsel %vm2381_vm10, %v2327_v4, %v2424_v51  ;;  %v6014_v13 = vld [vmem:[%s7327_s5 + $0x100] sm:$0xff]  ;;  %v6015_v15 = vld [vmem:[%s7327_s5 + $0x188] sm:$0xff] }
 0x812   : > { %vm2384_vm11 = vcmp.ge.f32.partialorder %v2342_v11, 0.0  ;;  %v2427_v22 = vmul.f32 %v6700_v21, %v2342_v11  ;;  %v2497_v23 = vmul.f32 %v6705_v25, %v2456_v20  ;;  %v6016_v20 = vld [vmem:[%s7327_s5 + $0x180] sm:$0xff] }
 0x813   : > { %vm2383_vm12 = vcmp.ge.f32.partialorder %v2337_v18, 0.0  ;;  %v2426_v24 = vmul.f32 %v6700_v21, %v2337_v18  ;;  %v5542_v26 = vpop.f32.mrb[70].mxu1  ;;  %v2585_v27 = vsel %vm2503_vm13, %v2498_v19, 0.0 }
 0x814   : > { %v2352_v28 = vadd.f32 %v5542_v26, %v6697_v16  ;;  %2586 = vadd.xlane.f32.xlu0 %v2585_v27  ;;  %v2346_v29 = vpop.f32.mrb[71].mxu1  ;;  %v2582_v30 = vsel %vm2503_vm13, %v2497_v23, 0.0  ;;  %v2459_v31 = vsel %vm2384_vm11, %v2342_v11, %v2427_v22  ;;  %v6017_v23 = vld [vmem:[%s7327_s5 + $0x108] sm:$0xff] }
 0x815   : > { %v2347_v32 = vadd.f32 %v6697_v16, %v2346_v29  ;;  %2583 = vadd.xlane.f32.xlu1 %v2582_v30  ;;  %v2500_v33 = vmul.f32 %v6705_v25, %v2459_v31  ;;  %v2458_v34 = vsel %vm2383_vm12, %v2337_v18, %v2426_v24  ;;  %v6018_v29 = vld [vmem:[%s7327_s5 + $0x110] sm:$0xff]  ;;  %v6019_v31 = vld [vmem:[%s7327_s5 + $0x198] sm:$0xff] }
 0x816   : > { %vm2386_vm14 = vcmp.ge.f32.partialorder %v2352_v28, 0.0  ;;  %v2429_v35 = vmul.f32 %v6700_v21, %v2352_v28  ;;  %v2499_v36 = vmul.f32 %v6705_v25, %v2458_v34  ;;  %v6020_v34 = vld [vmem:[%s7327_s5 + $0x190] sm:$0xff] }
 0x817   : > { %vm2385_vm15 = vcmp.ge.f32.partialorder %v2347_v32, 0.0  ;;  %v2428_v37 = vmul.f32 %v6700_v21, %v2347_v32  ;;  %v2591_v39 = vsel %vm2503_vm13, %v2500_v33, 0.0  ;;  %v634_v21 = vlaneseq }
 0x818   : > { %2592 = vadd.xlane.f32.xlu0 %v2591_v39  ;;  %v2588_v40 = vsel %vm2503_vm13, %v2499_v36, 0.0  ;;  %v2461_v41 = vsel %vm2386_vm14, %v2352_v28, %v2429_v35  ;;  %v6021_v36 = vld [vmem:[%s7327_s5 + $0x118] sm:$0xff] }
 0x819   : > { %2589 = vadd.xlane.f32.xlu1 %v2588_v40  ;;  %v2502_v16 = vmul.f32 %v6705_v25, %v2461_v41  ;;  %v2460_v42 = vsel %vm2385_vm15, %v2347_v32, %v2428_v37  ;;  %v6847_v46 = vshrl.u32 %v634_v21, 7  ;;  %v6850_v48 = vand.u32 127, %v634_v21  ;;  %v6024_v21 = vld [vmem:[%s7327_s5 + $0x1a0] sm:$0xff] }
 0x81a   : > { %v2501_v43 = vmul.f32 %v6705_v25, %v2460_v42 }
 0x81b   : > { %v2597_v17 = vsel %vm2503_vm13, %v2502_v16, 0.0  ;;  %v2601_v49 = vmul.u32 16, %v6847_v46  ;;  %v6854_v25 = vadd.s32 128, %v6850_v48  ;;  %v6022_v16 = vld [vmem:[%s7327_s5 + $0x120] sm:$0xff]  ;;  %vm639_vm12 = vcmp.eq.s32.totalorder %v6847_v46, %v6850_v48 }
 0x81c   : > { %2598 = vadd.xlane.f32.xlu0 %v2597_v17  ;;  %v2594_v45 = vsel %vm2503_vm13, %v2501_v43, 0.0  ;;  %v6023_v43 = vld [vmem:[%s7327_s5 + $0x1a8] sm:$0xff] }
 0x81d   : > { %2595 = vadd.xlane.f32.xlu1 %v2594_v45  ;;  %v2607_v50 = vadd.s32 16, %v2601_v49  ;;  %vm2603_vm13 = vcmp.ge.s32.totalorder %v6850_v48, %v2601_v49  ;;  %vm2604_vm0 = vcmp.ge.s32.totalorder %v6854_v25, %v2601_v49  ;;  %v6025_v49 = vld [vmem:[%s7327_s5 + $0x128] sm:$0xff] }
 0x81f   : > { %vm2609_vm1 = vcmp.lt.s32.totalorder %v6850_v48, %v2607_v50  ;;  %vm2610_vm2 = vcmp.lt.s32.totalorder %v6854_v25, %v2607_v50 }
 0x820   : > { %2550 = vadd.xlane.f32.xlu0 %v6779_v8  ;;  %vm2614_vm3 = vmand %vm2604_vm0, %vm2610_vm2  ;;  %v6089_v8 = vmov 1.0  }
 0x821   : > { %2547 = vadd.xlane.f32.xlu1 %v6783_v12  ;;  %4954 = vmatprep.mubr.msk.f32.mxu0 %vm2614_vm3, %v6089_v8  ;;  %vm6864_vm4 = vmand %vm2603_vm13, %vm2609_vm1  ;;  %v5774_v12 = vld [vmem:[%s6597_s0 + $0x120] ss:$8 sps:$4 sm:$0xff]  }
 0x832   : > { %2665 = vperm.xlu1 %5671, %v4953_v47  }
 0x836   : > { %3513 = vperm.xlu1 %5671, %v2793_v52  }
 0x83a   : > { %3527 = vperm.xlu1 %5671, %v4960_v53  }
 0x83e   : > { %3532 = vperm.xlu1 %5671, %v4961_v54  }
 0x842   : > { %3545 = vperm.xlu1 %5671, %v4962_v55   ;;  %v6026_v55 = vld [vmem:[%s7327_s5 + $0x130] sm:$0xff] }
 0x846   : > { %3550 = vperm.xlu1 %5671, %v4963_v56  }
 0x857   : > { %v6880_v57 = vpop.f32.mrb[72].mxu1 }
 0x858   : > { %v6882_v58 = vpop.f32.mrb[73].mxu1 }
 0x859   : > { %v6884_v60 = vpop.f32.mrb[74].mxu1 }
 0x85a   : > { %v6886_v61 = vpop.f32.mrb[75].mxu1 }
 0x86d   : > { %v2509_v62 = vpop.xlane.xlu1 %2508 }
 0x86e   : > { %v2626_v24 = vmul.f32 %v6017_v23, %v2509_v62  ;;  %v6027_v62 = vld [vmem:[%s7327_s5 + $0x1b8] sm:$0xff]  ;;  %v6032_v23 = vld [vmem:[%s7327_s5 + $0x1c0] sm:$0xff] }
 0x871   : > { %v2515_v63 = vpop.xlane.xlu0 %2514  ;;  %v2506_v0 = vpop.xlane.xlu1 %2505 }
 0x872   : > { %v2625_v14 = vmul.f32 %v6014_v13, %v2506_v0  ;;  %v2628_v37 = vmul.f32 %v6021_v36, %v2515_v63 }
 0x874   : > { %v5591_v28 = vpack.c.bf16 %v2626_v24, %v2625_v14  ;;  %v6033_v24 = vld [vmem:[%s7327_s5 + $0x148] sm:$0xff] }
 0x875   : > { %v2521_v1 = vpop.xlane.xlu0 %2520  ;;  %v2512_v2 = vpop.xlane.xlu1 %2511 }
 0x876   : > { %v2627_v30 = vmul.f32 %v6018_v29, %v2512_v2  ;;  %v2630_v50 = vmul.f32 %v6025_v49, %v2521_v1  ;;  %v6028_v2 = vld [vmem:[%s7327_s5 + $0x1b0] sm:$0xff] }
 0x877   : > { %v6034_v29 = vld [vmem:[%s7327_s5 + $0x150] sm:$0xff] }
 0x878   : > { %v5595_v41 = vpack.c.bf16 %v2628_v37, %v2627_v30 }
 0x879   : > { %v2527_v3 = vpop.xlane.xlu0 %2526  ;;  %v2518_v4 = vpop.xlane.xlu1 %2517 }
 0x87a   : > { %v2629_v42 = vmul.f32 %v6022_v16, %v2518_v4  ;;  %v6029_v4 = vld [vmem:[%s7327_s5 + $0x138] sm:$0xff] }
 0x87c   : > { %v5599_v54 = vpack.c.bf16 %v2630_v50, %v2629_v42  ;;  %v6039_v42 = vld [vmem:[%s7327_s5 + $0x1e8] sm:$0xff] }
 0x87d   : > { %v6888_v5 = vpop.xlane.xlu0 %2532  ;;  %v2524_v6 = vpop.xlane.xlu1 %2523 }
 0x87e   : > { %v2631_v56 = vmul.f32 %v6026_v55, %v2524_v6 }
 0x881   : > { %v2530_v44 = vpop.xlane.xlu1 %2529  ;;  %v6890_v7 = vpop.xlane.xlu0 %2538 }
 0x885   : > { %v6892_v51 = vpop.xlane.xlu1 %2535  ;;  %v6894_v9 = vpop.xlane.xlu0 %2544 }
 0x886   : > { %v2635_v30 = vmul.f32 %v6034_v29, %v6892_v51  ;;  %v5788_v29 = vld [vmem:[%s6597_s0 + $0x164] ss:$8 sps:$4 sm:$0xff]  }
 0x889   : > { %v6896_v10 = vpop.xlane.xlu1 %2541 }
 0x88d   : > { %v2557_v11 = vpop.xlane.xlu0 %2556 }
 0x88e   : > { %v2642_v18 = vmul.f32 %v6015_v15, %v2557_v11  ;;  %v2554_v19 = vpop.xlane.xlu1 %2553  ;;  %v2632_v11 = vmul.f32 %v6029_v4, %v2527_v3  ;;  %v6030_v15 = vld [vmem:[%s7327_s5 + $0x140] sm:$0xff] }
 0x88f   : > { %v2641_v22 = vmul.f32 %v6016_v20, %v2554_v19  ;;  %v6031_v19 = vld [vmem:[%s7327_s5 + $0x1c8] sm:$0xff] }
 0x890   : > { %v5603_v14 = vpack.c.bf16 %v2632_v11, %v2631_v56  ;;  %v6043_v56 = vld [vmem:[%s7327_s5 + $0x1f0] sm:$0xff] }
 0x891   : > { %v5589_v26 = vpack.c.bf16 %v2642_v18, %v2641_v22  ;;  %v2563_v27 = vpop.xlane.xlu0 %2562  ;;  %v2633_v18 = vmul.f32 %v6030_v15, %v2530_v44  ;;  %v6045_v11 = vld [vmem:[%s7327_s5 + $0x170] sm:$0xff] }
 0x892   : > { %v2644_v32 = vmul.f32 %v6019_v31, %v2563_v27  ;;  %v2560_v33 = vpop.xlane.xlu1 %2559  ;;  %v6035_v31 = vld [vmem:[%s7327_s5 + $0x1d8] sm:$0xff] }
 0x893   : > { %v2643_v35 = vmul.f32 %v6020_v34, %v2560_v33  ;;  %5590 = vmatprep.subr.bf16.mxu0 %v5589_v26  ;;  %v2634_v26 = vmul.f32 %v6033_v24, %v6888_v5  ;;  %v6036_v5 = vld [vmem:[%s7327_s5 + $0x1d0] sm:$0xff]  ;;  %v5780_v24 = vld [vmem:[%s6597_s0 + $0x140] ss:$8 sps:$4 sm:$0xff]  }
 0x894   : > { %5592 = vmatpush3.bf16.msra.mxu0 %v5591_v28  ;;  %v5773_v15 = vld [vmem:[%s6597_s0 + $0x114] ss:$8 sps:$4 sm:$0xff]  }
 0x895   : > { %v5593_v39 = vpack.c.bf16 %v2644_v32, %v2643_v35  ;;  %v2569_v40 = vpop.xlane.xlu0 %2568  ;;  %v5607_v28 = vpack.c.bf16 %v2634_v26, %v2633_v18  ;;  %v6037_v35 = vld [vmem:[%s7327_s5 + $0x158] sm:$0xff] }
 0x896   : > { %v2646_v17 = vmul.f32 %v6023_v43, %v2569_v40  ;;  %v2566_v45 = vpop.xlane.xlu1 %2565  ;;  %v2636_v36 = vmul.f32 %v6037_v35, %v6890_v7  ;;  %v6040_v7 = vld [vmem:[%s7327_s5 + $0x1e0] sm:$0xff]  ;;  %v5771_v18 = vld [vmem:[%s6597_s0 + $0x110] ss:$8 sps:$4 sm:$0xff]  }
 0x897   : > { %v2645_v47 = vmul.f32 %v6024_v21, %v2566_v45  ;;  %5594 = vmatprep.subr.bf16.mxu0 %v5593_v39  ;;  %v6974_v39 = vadd.s32 8, %v6847_v46  ;;  %v6041_v21 = vld [vmem:[%s7327_s5 + $0x168] sm:$0xff]  ;;  %v5795_v35 = vld [vmem:[%s6597_s0 + $0x190] ss:$8 sps:$4 sm:$0xff]  }
 0x898   : > { %5596 = vmatpush3.bf16.msra.mxu0 %v5595_v41  ;;  %v5611_v40 = vpack.c.bf16 %v2636_v36, %v2635_v30  ;;  %v6038_v41 = vld [vmem:[%s7327_s5 + $0x160] sm:$0xff] }
 0x899   : > { %v5597_v52 = vpack.c.bf16 %v2646_v17, %v2645_v47  ;;  %v2575_v53 = vpop.xlane.xlu0 %2574  ;;  %v2637_v16 = vmul.f32 %v6038_v41, %v6896_v10  ;;  %v2638_v47 = vmul.f32 %v6041_v21, %v6894_v9  ;;  %v2602_v50 = vmul.u32 16, %v6974_v39  ;;  %v5786_v30 = vld [vmem:[%s6597_s0 + $0x160] ss:$8 sps:$4 sm:$0xff]   ;;  %v5800_v36 = vld [vmem:[%s6597_s0 + $0x1a4] ss:$8 sps:$4 sm:$0xff]  }
 0x89a   : > { %v2648_v63 = vmul.f32 %v6027_v62, %v2575_v53  ;;  %v2572_v0 = vpop.xlane.xlu1 %2571  ;;  %v6042_v53 = vld [vmem:[%s7327_s5 + $0x1f8] sm:$0xff]  ;;  %v5806_v41 = vld [vmem:[%s6597_s0 + $0x1c4] ss:$8 sps:$4 sm:$0xff]   ;;  %vm640_vm14 = vcmp.eq.s32.totalorder %v6974_v39, %v6850_v48 }
 0x89b   : > { %v2647_v1 = vmul.f32 %v6028_v2, %v2572_v0  ;;  %5598 = vmatprep.subr.bf16.mxu0 %v5597_v52  ;;  %v5615_v52 = vpack.c.bf16 %v2638_v47, %v2637_v16  ;;  %v2608_v0 = vadd.s32 16, %v2602_v50  ;;  %v6044_v2 = vld [vmem:[%s7327_s5 + $0x178] sm:$0xff]  ;;  %vm2606_vm6 = vcmp.ge.s32.totalorder %v6854_v25, %v2602_v50  ;;  %v5804_v16 = vld [vmem:[%s6597_s0 + $0x1c0] ss:$8 sps:$4 sm:$0xff]  }
 0x89c   : > { %5600 = vmatpush3.bf16.msra.mxu0 %v5599_v54  ;;  %vm2605_vm9 = vcmp.ge.s32.totalorder %v6850_v48, %v2602_v50  ;;  %v5813_v21 = vld [vmem:[%s6597_s0 + $0x1f0] ss:$8 sps:$4 sm:$0xff]   ;;  %v6090_v47 = vmov 0.0  }
 0x89d   : > { %v5601_v13 = vpack.c.bf16 %v2648_v63, %v2647_v1  ;;  %v2581_v6 = vpop.xlane.xlu0 %2580  ;;  %vm2612_vm7 = vcmp.lt.s32.totalorder %v6854_v25, %v2608_v0  ;;  %vm2611_vm10 = vcmp.lt.s32.totalorder %v6850_v48, %v2608_v0  ;;  %v5768_v25 = vld [vmem:[%s6597_s0 + $0x100] ss:$8 sps:$4 sm:$0xff]  }
 0x89e   : > { %v2650_v20 = vmul.f32 %v6031_v19, %v2581_v6  ;;  %v2578_v22 = vpop.xlane.xlu1 %2577  ;;  %v5770_v6 = vld [vmem:[%s6597_s0 + $0x104] ss:$8 sps:$4 sm:$0xff]   ;;  %vm2616_vm8 = vmand %vm2606_vm6, %vm2612_vm7 }
 0x89f   : > { %v2649_v3 = vmul.f32 %v6032_v23, %v2578_v22  ;;  %5602 = vmatprep.subr.bf16.mxu0 %v5601_v13  ;;  %vm2615_vm11 = vmand %vm2605_vm9, %vm2611_vm10  ;;  %v5776_v19 = vld [vmem:[%s6597_s0 + $0x124] ss:$8 sps:$4 sm:$0xff]   ;;  %v5777_v22 = vld [vmem:[%s6597_s0 + $0x130] ss:$8 sps:$4 sm:$0xff]  }
 0x8a0   : > { %5604 = vmatpush3.bf16.msra.mxu0 %v5603_v14  ;;  %v5782_v23 = vld [vmem:[%s6597_s0 + $0x144] ss:$8 sps:$4 sm:$0xff]  }
 0x8a1   : > { %v5605_v44 = vpack.c.bf16 %v2650_v20, %v2649_v3  ;;  %v2587_v27 = vpop.xlane.xlu0 %2586  ;;  %v5779_v20 = vld [vmem:[%s6597_s0 + $0x134] ss:$8 sps:$4 sm:$0xff]  }
 0x8a2   : > { %v2652_v32 = vmul.f32 %v6035_v31, %v2587_v27  ;;  %v2584_v33 = vpop.xlane.xlu1 %2583  ;;  %v5791_v31 = vld [vmem:[%s6597_s0 + $0x174] ss:$8 sps:$4 sm:$0xff]  }
 0x8a3   : > { %v2651_v34 = vmul.f32 %v6036_v5, %v2584_v33  ;;  %5606 = vmatprep.subr.bf16.mxu0 %v5605_v44  ;;  %v5785_v44 = vld [vmem:[%s6597_s0 + $0x154] ss:$8 sps:$4 sm:$0xff]   ;;  %v5794_v33 = vld [vmem:[%s6597_s0 + $0x184] ss:$8 sps:$4 sm:$0xff]   ;;  %v5792_v5 = vld [vmem:[%s6597_s0 + $0x180] ss:$8 sps:$4 sm:$0xff]  }
 0x8a4   : > { %5608 = vmatpush3.bf16.msra.mxu0 %v5607_v28  ;;  %v5783_v28 = vld [vmem:[%s6597_s0 + $0x150] ss:$8 sps:$4 sm:$0xff]  }
 0x8a5   : > { %v5609_v51 = vpack.c.bf16 %v2652_v32, %v2651_v34  ;;  %v2593_v37 = vpop.xlane.xlu0 %2592  ;;  %v5789_v32 = vld [vmem:[%s6597_s0 + $0x170] ss:$8 sps:$4 sm:$0xff]   ;;  %v5797_v34 = vld [vmem:[%s6597_s0 + $0x194] ss:$8 sps:$4 sm:$0xff]  }
 0x8a6   : > { %v2654_v43 = vmul.f32 %v6039_v42, %v2593_v37  ;;  %v2590_v17 = vpop.xlane.xlu1 %2589  ;;  %v5803_v37 = vld [vmem:[%s6597_s0 + $0x1b4] ss:$8 sps:$4 sm:$0xff]  }
 0x8a7   : > { %v2653_v45 = vmul.f32 %v6040_v7, %v2590_v17  ;;  %5610 = vmatprep.subr.bf16.mxu0 %v5609_v51  ;;  %v5798_v51 = vld [vmem:[%s6597_s0 + $0x1a0] ss:$8 sps:$4 sm:$0xff]   ;;  %v5809_v42 = vld [vmem:[%s6597_s0 + $0x1d4] ss:$8 sps:$4 sm:$0xff]   ;;  %v5812_v17 = vld [vmem:[%s6597_s0 + $0x1e4] ss:$8 sps:$4 sm:$0xff]  }
 0x8a8   : > { %5612 = vmatpush3.bf16.msra.mxu0 %v5611_v40  ;;  %v5801_v40 = vld [vmem:[%s6597_s0 + $0x1b0] ss:$8 sps:$4 sm:$0xff]   ;;  %v5810_v7 = vld [vmem:[%s6597_s0 + $0x1e0] ss:$8 sps:$4 sm:$0xff]  }
 0x8a9   : > { %v5613_v10 = vpack.c.bf16 %v2654_v43, %v2653_v45  ;;  %v2599_v49 = vpop.xlane.xlu0 %2598  ;;  %v5807_v43 = vld [vmem:[%s6597_s0 + $0x1d0] ss:$8 sps:$4 sm:$0xff]   ;;  %v5815_v45 = vld [vmem:[%s6597_s0 + $0x1f4] ss:$8 sps:$4 sm:$0xff]  }
 0x8aa   : > { %v2656_v54 = vmul.f32 %v6042_v53, %v2599_v49  ;;  %v2596_v55 = vpop.xlane.xlu1 %2595 }
 0x8ab   : > { %v2655_v62 = vmul.f32 %v6043_v56, %v2596_v55  ;;  %5614 = vmatprep.subr.bf16.mxu0 %v5613_v10 }
 0x8ac   : > { %5616 = vmatpush3.bf16.msra.mxu0 %v5615_v52 }
 0x8ad   : > { %v5617_v9 = vpack.c.bf16 %v2656_v54, %v2655_v62  ;;  %v2551_v63 = vpop.xlane.xlu0 %2550 }
 0x8ae   : > { %v2640_v1 = vmul.f32 %v6044_v2, %v2551_v63  ;;  %v2548_v4 = vpop.xlane.xlu1 %2547 }
 0x8af   : > { %v2639_v13 = vmul.f32 %v6045_v11, %v2548_v4  ;;  %5618 = vmatprep.subr.bf16.mxu0 %v5617_v9  ;;  %v4780_v11 = vsel %vm640_vm14, 1.0, %v6090_v47 }
 0x8b1   : > { %v5619_v14 = vpack.c.bf16 %v2640_v1, %v2639_v13  ;;  %v4779_v1 = vsel %vm639_vm12, 1.0, %v6090_v47 }
 0x8b2   : > { %v2666_v52 = vpop.permute.xlu1 %2665  ;;  %v2757_v4 = vsub.f32 1.0, %v4779_v1 }
 0x8b3   : > { %5620 = vmatpush3.bf16.msra.mxu0 %v5619_v14  ;;  %v2758_v14 = vsub.f32 1.0, %v4780_v11 }
 0x8b4   : > { %3425 = vmatprep.subr.bf16.mxu0 %v5770_v6 }
 0x8b6   : > { %4955 = vmatmul.mubr.msk.f32.vlgmr.msra.gmra.mrb[34].mxu0 %vm6864_vm4, %v6089_v8  ;;  %v7069_v39 = vpop.permute.xlu1 %3513 }
 0x8b7   : > { %4956 = vmatprep.mubr.msk.f32.mxu0 %vm2616_vm8, %v6089_v8 }
 0x8ba   : > { %4957 = vmatmul.mubr.msk.f32.gmra.mrb[36].mxu0 %vm2615_vm11, %v6089_v8 }
 0x8bb   : > { %3457 = vmatprep.mubr.bf16.mxu0 %v6646_v38 }
 0x8bc   : > { %3426 = vmatpush1.bf16.xpose.msra.mxu0 %v5768_v25 }
 0x8bd   : > { %3427 = vmatprep.subr.bf16.mxu0 %v5773_v15 }
 0x8c4   : > { %3428 = vmatpush1.bf16.xpose.msra.mxu0 %v5771_v18 }
 0x8c5   : > { %3429 = vmatprep.subr.bf16.mxu0 %v5776_v19 }
 0x8cc   : > { %3430 = vmatpush1.bf16.xpose.msra.mxu0 %v5774_v12 }
 0x8cd   : > { %3431 = vmatprep.subr.bf16.mxu0 %v5779_v20 }
 0x8d4   : > { %3432 = vmatpush1.bf16.xpose.msra.mxu0 %v5777_v22  ;;  %v7071_v22 = vpop.permute.xlu1 %3527 }
 0x8d5   : > { %3433 = vmatprep.subr.bf16.mxu0 %v5782_v23 }
 0x8d7   : > { %v7022_v8 = vpop.f32.mrb[76].mxu1 }
 0x8d8   : > { %v7024_v3 = vpop.f32.mrb[77].mxu1  ;;  %v7073_v23 = vpop.permute.xlu1 %3532 }
 0x8d9   : > { %v7027_v26 = vpop.f32.mrb[78].mxu1 }
 0x8da   : > { %v7030_v27 = vpop.f32.mrb[79].mxu1 }
 0x8dc   : > { %3434 = vmatpush1.bf16.xpose.msra.mxu0 %v5780_v24 }
 0x8dd   : > { %3435 = vmatprep.subr.bf16.mxu0 %v5785_v44  ;;  %v3521_v44 = vmul.f32 %v7069_v39, %v6880_v57 }
 0x8e4   : > { %3436 = vmatpush1.bf16.xpose.msra.mxu0 %v5783_v28 }
 0x8e5   : > { %3437 = vmatprep.subr.bf16.mxu0 %v5788_v29 }
 0x8ec   : > { %3438 = vmatpush1.bf16.xpose.msra.mxu0 %v5786_v30  ;;  %v7078_v30 = vpop.permute.xlu1 %3545 }
 0x8ed   : > { %3439 = vmatprep.subr.bf16.mxu0 %v5791_v31  ;;  %v3522_v31 = vmul.f32 %v7069_v39, %v6882_v58  ;;  %v3554_v57 = vmul.f32 %v7078_v30, %v7024_v3 }
 0x8f4   : > { %3440 = vmatpush1.bf16.xpose.msra.mxu0 %v5789_v32 }
 0x8f5   : > { %3441 = vmatprep.subr.bf16.mxu0 %v5794_v33 }
 0x8fc   : > { %3442 = vmatpush1.bf16.xpose.msra.mxu0 %v5792_v5  ;;  %v3553_v5 = vmul.f32 %v7078_v30, %v7022_v8  ;;  %v6046_v8 = vld [vmem:[%s7325_s3] sm:$0xff] }
 0x8fd   : > { %3443 = vmatprep.subr.bf16.mxu0 %v5797_v34 }
 0x904   : > { %3444 = vmatpush1.bf16.xpose.msra.mxu0 %v5795_v35 }
 0x905   : > { %3445 = vmatprep.subr.bf16.mxu0 %v5800_v36 }
 0x90c   : > { %3446 = vmatpush1.bf16.xpose.msra.mxu0 %v5798_v51 }
 0x90d   : > { %3447 = vmatprep.subr.bf16.mxu0 %v5803_v37 }
 0x914   : > { %3448 = vmatpush1.bf16.xpose.msra.mxu0 %v5801_v40 }
 0x915   : > { %3449 = vmatprep.subr.bf16.mxu0 %v5806_v41 }
 0x91c   : > { %3450 = vmatpush1.bf16.xpose.msra.mxu0 %v5804_v16 }
 0x91d   : > { %3451 = vmatprep.subr.bf16.mxu0 %v5809_v42 }
 0x924   : > { %3452 = vmatpush1.bf16.xpose.msra.mxu0 %v5807_v43 }
 0x925   : > { %3453 = vmatprep.subr.bf16.mxu0 %v5812_v17 }
 0x92c   : > { %3454 = vmatpush1.bf16.xpose.msra.mxu0 %v5810_v7 }
 0x92d   : > { %3455 = vmatprep.subr.bf16.mxu0 %v5815_v45  ;;  %v6047_v45 = vld [vmem:[%s7325_s3 + $0x8] sm:$0xff] }
 0x934   : > { %3456 = vmatpush1.bf16.xpose.msra.mxu0 %v5813_v21 }
 0x935   : > { %5622 = vmatprep.subr.bf16.mxu0 %v6646_v38 }
 0x93b   : > { %3458 = vmatmul.mubr.bf16.vlgmr.msra.gmra.mrb[40].mxu0 %v6667_v59 }
 0x93c   : > { %5624 = vmatpush1.bf16.msra.mxu0 %v6667_v59  ;;  %3642 = vmatprep.mubr.f32.mxu0 %v6090_v47 }
 0x989   : > { %v5349_v10 = vpop.f32.mrb[34].mxu0 }
 0x98a   : > { %v5350_v49 = vpop.f32.mrb[35].mxu0 }
 0x98b   : > { %v5351_v50 = vadd.f32 %v5350_v49, %v5349_v10 }
 0x98d   : > { %v2735_v53 = vadd.f32 %v5351_v50, %v2666_v52  ;;  %v5352_v54 = vpop.f32.mrb[36].mxu0 }
 0x98e   : > { %v5353_v55 = vpop.f32.mrb[37].mxu0 }
 0x98f   : > { %v4958_v56 = vmul.f32 -1.442695, %v2735_v53  ;;  %v5354_v62 = vadd.f32 %v5353_v55, %v5352_v54  ;;  %v2794_v53 = vld [vmem:[%s7363_s8 + $0x8] sm:$0xff] }
 0x990   : > { %v5818_v54 = vld [vmem:[%s7117_s9 + $0x4] ss:$8 sps:$4 sm:$0xff]   ;;  %v5819_v55 = vld [vmem:[%s7117_s9 + $0x100] ss:$8 sps:$4 sm:$0xff]  }
 0x991   : > { %5982 = vpow2.f32 %v4958_v56  ;;  %v2740_v9 = vadd.f32 %v5354_v62, %v2666_v52  ;;  %v5821_v56 = vld [vmem:[%s7117_s9 + $0x104] ss:$8 sps:$4 sm:$0xff]   ;;  %4235 = vmatprep.subr.bf16.mxu0 %v5818_v54  ;;  %v5827_v62 = vld [vmem:[%s7117_s9 + $0x114] ss:$8 sps:$4 sm:$0xff]   ;;  %v5834_v54 = vld [vmem:[%s7117_s9 + $0x30] ss:$8 sps:$4 sm:$0xff]  }
 0x992   : > { %4278 = vmatprep.subr.bf16.mxu1 %v5821_v56  ;;  %v5848_v56 = vld [vmem:[%s7117_s9 + $0x54] ss:$8 sps:$4 sm:$0xff]  }
 0x993   : > { %v4959_v38 = vmul.f32 -1.442695, %v2740_v9  ;;  %4279 = vmatpush1.bf16.xpose.msra.mxu1 %v5819_v55  ;;  %v5825_v9 = vld [vmem:[%s7117_s9 + $0x110] ss:$8 sps:$4 sm:$0xff]   ;;  %v5842_v55 = vld [vmem:[%s7117_s9 + $0x44] ss:$8 sps:$4 sm:$0xff]  }
 0x994   : > { %4280 = vmatprep.subr.bf16.mxu1 %v5827_v62  ;;  %v5846_v62 = vld [vmem:[%s7117_s9 + $0x50] ss:$8 sps:$4 sm:$0xff]  }
 0x995   : > { %5984 = vpow2.f32 %v4959_v38  ;;  %v5833_v38 = vld [vmem:[%s7117_s9 + $0x124] ss:$8 sps:$4 sm:$0xff]  }
 0x99b   : > { %v5983_v63 = vpop.eup %5982  ;;  %4281 = vmatpush1.bf16.xpose.msra.mxu1 %v5825_v9  ;;  %v5854_v9 = vld [vmem:[%s7117_s9 + $0x64] ss:$8 sps:$4 sm:$0xff]  }
 0x99c   : > { %v2749_v0 = vadd.f32 1.0, %v5983_v63  ;;  %4282 = vmatprep.subr.bf16.mxu1 %v5833_v38  ;;  %v5831_v63 = vld [vmem:[%s7117_s9 + $0x120] ss:$8 sps:$4 sm:$0xff]  }
 0x99d   : > { %v5852_v38 = vld [vmem:[%s7117_s9 + $0x60] ss:$8 sps:$4 sm:$0xff]  }
 0x99e   : > { %5986 = vrcp.f32 %v2749_v0  ;;  %v5839_v0 = vld [vmem:[%s7117_s9 + $0x134] ss:$8 sps:$4 sm:$0xff]  }
 0x99f   : > { %v5985_v59 = vpop.eup %5984 }
 0x9a0   : > { %v2750_v2 = vadd.f32 1.0, %v5985_v59  ;;  %v5837_v59 = vld [vmem:[%s7117_s9 + $0x130] ss:$8 sps:$4 sm:$0xff]  }
 0x9a2   : > { %5988 = vrcp.f32 %v2750_v2  ;;  %v5845_v2 = vld [vmem:[%s7117_s9 + $0x144] ss:$8 sps:$4 sm:$0xff]  }
 0x9a3   : > { %4283 = vmatpush1.bf16.xpose.msra.mxu1 %v5831_v63  ;;  %v5860_v63 = vld [vmem:[%s7117_s9 + $0x74] ss:$8 sps:$4 sm:$0xff]  }
 0x9a4   : > { %4284 = vmatprep.subr.bf16.mxu1 %v5839_v0  ;;  %v5858_v0 = vld [vmem:[%s7117_s9 + $0x70] ss:$8 sps:$4 sm:$0xff]  }
 0x9a8   : > { %v5987_v13 = vpop.eup %5986 }
 0x9a9   : > { %2755 = vst.msk [vmem:[%s6229_s17] sm:$0xff] %vm758_vm5, %v5987_v13  ;;  %v2759_v6 = vmul.f32 %v5987_v13, %v2757_v4  ;;  %v5857_v13 = vld [vmem:[%s7117_s9 + $0x164] ss:$8 sps:$4 sm:$0xff]  }
 0x9ab   : > { %v2761_v25 = vadd.f32 %v4779_v1, %v2759_v6  ;;  %4285 = vmatpush1.bf16.xpose.msra.mxu1 %v5837_v59  ;;  %v5843_v1 = vld [vmem:[%s7117_s9 + $0x140] ss:$8 sps:$4 sm:$0xff]   ;;  %v5866_v59 = vld [vmem:[%s7117_s9 + $0x84] ss:$8 sps:$4 sm:$0xff]  }
 0x9ac   : > { %v5989_v15 = vpop.eup %5988  ;;  %4286 = vmatprep.subr.bf16.mxu1 %v5845_v2  ;;  %v5855_v6 = vld [vmem:[%s7117_s9 + $0x160] ss:$8 sps:$4 sm:$0xff]  }
 0x9ad   : > { %2756 = vst.msk [vmem:[%s6229_s17 + $0x8] sm:$0xff] %vm758_vm5, %v5989_v15  ;;  %v2763_v46 = vadd.f32 1e-06, %v2761_v25  ;;  %v2760_v18 = vmul.f32 %v5989_v15, %v2758_v14  ;;  %v5861_v25 = vld [vmem:[%s7117_s9 + $0x170] ss:$8 sps:$4 sm:$0xff]  }
 0x9ae   : > { %v5869_v15 = vld [vmem:[%s7117_s9 + $0x184] ss:$8 sps:$4 sm:$0xff]   ;;  %v5864_v2 = vld [vmem:[%s7117_s9 + $0x80] ss:$8 sps:$4 sm:$0xff]  }
 0x9af   : > { %v2765_v19 = vsel %vm758_vm5, %v2763_v46, 0.0  ;;  %v2762_v12 = vadd.f32 %v4780_v11, %v2760_v18  ;;  %v5849_v11 = vld [vmem:[%s7117_s9 + $0x150] ss:$8 sps:$4 sm:$0xff]   ;;  %v5875_v18 = vld [vmem:[%s7117_s9 + $0x194] ss:$8 sps:$4 sm:$0xff]  }
 0x9b0   : > { %2766 = vadd.xlane.f32.xlu0 %v2765_v19  ;;  %v5873_v19 = vld [vmem:[%s7117_s9 + $0x190] ss:$8 sps:$4 sm:$0xff]  }
 0x9b1   : > { %v2764_v20 = vadd.f32 1e-06, %v2762_v12  ;;  %v5881_v12 = vld [vmem:[%s7117_s9 + $0x1a4] ss:$8 sps:$4 sm:$0xff]  }
 0x9b3   : > { %v2768_v48 = vsel %vm758_vm5, %v2764_v20, 0.0  ;;  %4287 = vmatpush1.bf16.xpose.msra.mxu1 %v5843_v1  ;;  %v5872_v1 = vld [vmem:[%s7117_s9 + $0x94] ss:$8 sps:$4 sm:$0xff]  }
 0x9b4   : > { %2769 = vadd.xlane.f32.xlu0 %v2768_v48  ;;  %v5887_v48 = vld [vmem:[%s7117_s9 + $0x1b4] ss:$8 sps:$4 sm:$0xff]  }
 0xa0e   : > { %v3459_v24 = vpop.f32.mrb[40].mxu0 }
 0xa0f   : > { %v3535_v28 = vmul.f32 %v7071_v22, %v3459_v24  ;;  %v3461_v29 = vpop.f32.mrb[41].mxu0  ;;  %v5885_v24 = vld [vmem:[%s7117_s9 + $0x1b0] ss:$8 sps:$4 sm:$0xff]  }
 0xa10   : > { %v3536_v32 = vmul.f32 %v7071_v22, %v3461_v29  ;;  %v7083_v33 = vpop.f32.mrb[42].mxu0  ;;  %v5899_v29 = vld [vmem:[%s7117_s9 + $0x1d4] ss:$8 sps:$4 sm:$0xff]  }
 0xa11   : > { %v3539_v34 = vadd.f32 %v3535_v28, %v3521_v44  ;;  %v7087_v35 = vpop.f32.mrb[43].mxu0  ;;  %v5893_v44 = vld [vmem:[%s7117_s9 + $0x1c4] ss:$8 sps:$4 sm:$0xff]   ;;  %v5891_v28 = vld [vmem:[%s7117_s9 + $0x1c0] ss:$8 sps:$4 sm:$0xff]  }
 0xa12   : > { %v3540_v36 = vadd.f32 %v3536_v32, %v3522_v31  ;;  %v5897_v31 = vld [vmem:[%s7117_s9 + $0x1d0] ss:$8 sps:$4 sm:$0xff]  }
 0xa13   : > { %v7091_v51 = vadd.f32 %v3553_v5, %v3539_v34  ;;  %v5905_v34 = vld [vmem:[%s7117_s9 + $0x1e4] ss:$8 sps:$4 sm:$0xff]  }
 0xa14   : > { %v7093_v37 = vadd.f32 %v3554_v57, %v3540_v36 }
 0xa3d   : > { %v2767_v40 = vpop.xlane.xlu0 %2766 }
 0xa3e   : > { %5990 = vrcp.f32 %v2767_v40  ;;  %v5903_v40 = vld [vmem:[%s7117_s9 + $0x1e0] ss:$8 sps:$4 sm:$0xff]  }
 0xa41   : > { %v2770_v58 = vpop.xlane.xlu0 %2769 }
 0xa42   : > { %5992 = vrcp.f32 %v2770_v58 }
 0xa48   : > { %v5991_v41 = vpop.eup %5990 }
 0xa49   : > { %v2772_v16 = vmul.f32 %v5991_v41, %v2763_v46  ;;  %v5867_v46 = vld [vmem:[%s7117_s9 + $0x180] ss:$8 sps:$4 sm:$0xff]  }
 0xa4b   : > { %v2775_v42 = vmul.f32 %v6046_v8, %v2772_v16  ;;  %v3537_v16 = vmul.f32 %v7073_v23, %v7083_v33  ;;  %v3538_v8 = vmul.f32 %v7073_v23, %v7087_v35 }
 0xa4c   : > { %v5993_v43 = vpop.eup %5992 }
 0xa4d   : > { %v7098_v17 = vmul.f32 %v2775_v42, %v2757_v4  ;;  %v2774_v3 = vmul.f32 %v5993_v43, %v2764_v20  ;;  %v5851_v4 = vld [vmem:[%s7117_s9 + $0x154] ss:$8 sps:$4 sm:$0xff]   ;;  %v5879_v20 = vld [vmem:[%s7117_s9 + $0x1a0] ss:$8 sps:$4 sm:$0xff]  }
 0xa4e   : > { %4288 = vmatprep.subr.bf16.mxu1 %v5851_v4  ;;  %v5870_v4 = vld [vmem:[%s7117_s9 + $0x90] ss:$8 sps:$4 sm:$0xff]  }
 0xa4f   : > { %v2779_v7 = vand.u32 2147483647, %v7098_v17  ;;  %v2776_v21 = vmul.f32 %v6047_v45, %v2774_v3  ;;  %4289 = vmatpush1.bf16.xpose.msra.mxu1 %v5849_v11  ;;  %v5816_v3 = vld [vmem:[%s7117_s9] ss:$8 sps:$4 sm:$0xff]   ;;  %v5878_v11 = vld [vmem:[%s7117_s9 + $0xa4] ss:$8 sps:$4 sm:$0xff]  }
 0xa50   : > { %4290 = vmatprep.subr.bf16.mxu1 %v5857_v13  ;;  %v5876_v13 = vld [vmem:[%s7117_s9 + $0xa0] ss:$8 sps:$4 sm:$0xff]  }
 0xa51   : > { %v2781_v10 = vsel %vm758_vm5, %v2779_v7, 0.0  ;;  %v7105_v49 = vmul.f32 %v2776_v21, %v2758_v14  ;;  %v5863_v14 = vld [vmem:[%s7117_s9 + $0x174] ss:$8 sps:$4 sm:$0xff]   ;;  %v7161_v7 = vpop.permute.xlu1 %3550 }
 0xa52   : > { %2782 = vadd.xlane.f32.xlu0 %v2781_v10  ;;  %v5824_v21 = vld [vmem:[%s7117_s9 + $0x14] ss:$8 sps:$4 sm:$0xff]   ;;  %v3555_v33 = vmul.f32 %v7161_v7, %v7027_v26  ;;  %v3556_v35 = vmul.f32 %v7161_v7, %v7030_v27  ;;  %v5822_v27 = vld [vmem:[%s7117_s9 + $0x10] ss:$8 sps:$4 sm:$0xff]  }
 0xa53   : > { %v2780_v50 = vand.u32 2147483647, %v7105_v49 }
 0xa55   : > { %v2784_v52 = vsel %vm758_vm5, %v2780_v50, 0.0 }
 0xa56   : > { %2785 = vadd.xlane.f32.xlu0 %v2784_v52  ;;  %v5830_v52 = vld [vmem:[%s7117_s9 + $0x24] ss:$8 sps:$4 sm:$0xff]  }
 0xa57   : > { %4291 = vmatpush1.bf16.xpose.msra.mxu1 %v5855_v6  ;;  %v5884_v6 = vld [vmem:[%s7117_s9 + $0xb4] ss:$8 sps:$4 sm:$0xff]  }
 0xa58   : > { %4292 = vmatprep.subr.bf16.mxu1 %v5863_v14  ;;  %v5911_v14 = vld [vmem:[%s7117_s9 + $0x1f4] ss:$8 sps:$4 sm:$0xff]  }
 0xa5f   : > { %4293 = vmatpush1.bf16.xpose.msra.mxu1 %v5861_v25  ;;  %v5909_v25 = vld [vmem:[%s7117_s9 + $0x1f0] ss:$8 sps:$4 sm:$0xff]  }
 0xa60   : > { %4294 = vmatprep.subr.bf16.mxu1 %v5869_v15  ;;  %v5882_v15 = vld [vmem:[%s7117_s9 + $0xb0] ss:$8 sps:$4 sm:$0xff]  }
 0xa67   : > { %4295 = vmatpush1.bf16.xpose.msra.mxu1 %v5867_v46  ;;  %v5890_v46 = vld [vmem:[%s7117_s9 + $0xc4] ss:$8 sps:$4 sm:$0xff]  }
 0xa68   : > { %4296 = vmatprep.subr.bf16.mxu1 %v5875_v18  ;;  %v5888_v18 = vld [vmem:[%s7117_s9 + $0xc0] ss:$8 sps:$4 sm:$0xff]  }
 0xa6c   : > { %3518 = vperm.xlu0 %5670, %v2794_v53   ;;  %v5836_v53 = vld [vmem:[%s7117_s9 + $0x34] ss:$8 sps:$4 sm:$0xff]  }
 0xa6f   : > { %4297 = vmatpush1.bf16.xpose.msra.mxu1 %v5873_v19  ;;  %v5896_v19 = vld [vmem:[%s7117_s9 + $0xd4] ss:$8 sps:$4 sm:$0xff]  }
 0xa70   : > { %4298 = vmatprep.subr.bf16.mxu1 %v5881_v12  ;;  %v5894_v12 = vld [vmem:[%s7117_s9 + $0xd0] ss:$8 sps:$4 sm:$0xff]  }
 0xa77   : > { %4299 = vmatpush1.bf16.xpose.msra.mxu1 %v5879_v20  ;;  %v5902_v20 = vld [vmem:[%s7117_s9 + $0xe4] ss:$8 sps:$4 sm:$0xff]  }
 0xa78   : > { %4300 = vmatprep.subr.bf16.mxu1 %v5887_v48  ;;  %v5900_v48 = vld [vmem:[%s7117_s9 + $0xe0] ss:$8 sps:$4 sm:$0xff]  }
 0xa7f   : > { %4301 = vmatpush1.bf16.xpose.msra.mxu1 %v5885_v24  ;;  %v5908_v24 = vld [vmem:[%s7117_s9 + $0xf4] ss:$8 sps:$4 sm:$0xff]  }
 0xa80   : > { %4302 = vmatprep.subr.bf16.mxu1 %v5893_v44  ;;  %v5906_v44 = vld [vmem:[%s7117_s9 + $0xf0] ss:$8 sps:$4 sm:$0xff]  }
 0xa87   : > { %4303 = vmatpush1.bf16.xpose.msra.mxu1 %v5891_v28  ;;  %v5914_v28 = vld [vmem:[%s7117_s9 + $0x204] ss:$8 sps:$4 sm:$0xff]  }
 0xa88   : > { %4304 = vmatprep.subr.bf16.mxu1 %v5899_v29 }
 0xa8f   : > { %4305 = vmatpush1.bf16.xpose.msra.mxu1 %v5897_v31 }
 0xa90   : > { %4306 = vmatprep.subr.bf16.mxu1 %v5905_v34 }
 0xa97   : > { %4307 = vmatpush1.bf16.xpose.msra.mxu1 %v5903_v40  ;;  %v5917_v40 = vld [vmem:[%s7117_s9 + $0x214] ss:$8 sps:$4 sm:$0xff]  }
 0xa98   : > { %4308 = vmatprep.subr.bf16.mxu1 %v5911_v14 }
 0xa9f   : > { %4309 = vmatpush1.bf16.xpose.msra.mxu1 %v5909_v25 }
 0xadf   : > { %v2783_v32 = vpop.xlane.xlu0 %2782 }
 0xae0   : > { %v2787_v5 = vmax.f32 %v2783_v32, 1e-12 }
 0xae2   : > { %5994 = vrcp.f32 %v2787_v5 }
 0xae3   : > { %v2786_v57 = vpop.xlane.xlu0 %2785 }
 0xae4   : > { %v2788_v36 = vmax.f32 %v2786_v57, 1e-12 }
 0xae6   : > { %5996 = vrcp.f32 %v2788_v36  ;;  %v5912_v36 = vld [vmem:[%s7117_s9 + $0x200] ss:$8 sps:$4 sm:$0xff]  }
 0xaeb   : > { %v7150_v58 = vpop.permute.xlu0 %3518 }
 0xaec   : > { %v5995_v41 = vpop.eup %5994  ;;  %v3523_v42 = vmul.f32 %v7150_v58, %v6884_v60  ;;  %v3524_v43 = vmul.f32 %v7150_v58, %v6886_v61 }
 0xaed   : > { %v2790_v45 = vmul.f32 %v5995_v41, %v7098_v17  ;;  %v5915_v41 = vld [vmem:[%s7117_s9 + $0x210] ss:$8 sps:$4 sm:$0xff]  }
 0xaee   : > { %v3541_v10 = vadd.f32 %v3537_v16, %v3523_v42  ;;  %v3542_v60 = vadd.f32 %v3538_v8, %v3524_v43  ;;  %v5920_v16 = vld [vmem:[%s7117_s9 + $0x224] ss:$8 sps:$4 sm:$0xff]   ;;  %v5918_v8 = vld [vmem:[%s7117_s9 + $0x220] ss:$8 sps:$4 sm:$0xff]   ;;  %v5923_v42 = vld [vmem:[%s7117_s9 + $0x234] ss:$8 sps:$4 sm:$0xff]  }
 0xaef   : > { %5062 = vmatmul.mubr.msk.f32.vlgmr.msra.gmra.mrb[38].mxu0 %vm758_vm5, %v2790_v45  ;;  %v5921_v43 = vld [vmem:[%s7117_s9 + $0x230] ss:$8 sps:$4 sm:$0xff]   ;;  %v5924_v45 = vld [vmem:[%s7117_s9 + $0x240] ss:$8 sps:$4 sm:$0xff]  }
 0xaf0   : > { %v5997_v61 = vpop.eup %5996  ;;  %3648 = vmatprep.mubr.f32.mxu0 %v6090_v47  ;;  %4236 = vmatpush1.bf16.xpose.msra.mxu0 %v5816_v3  ;;  %v7171_v17 = vadd.f32 %v3555_v33, %v3541_v10  ;;  %v7173_v50 = vadd.f32 %v3556_v35, %v3542_v60  ;;  %v5828_v47 = vld [vmem:[%s7117_s9 + $0x20] ss:$8 sps:$4 sm:$0xff]   ;;  %v5926_v3 = vld [vmem:[%s7117_s9 + $0x244] ss:$8 sps:$4 sm:$0xff]   ;;  %v5927_v33 = vld [vmem:[%s7117_s9 + $0x250] ss:$8 sps:$4 sm:$0xff]  }
 0xaf1   : > { %v2792_v26 = vmul.f32 %v5997_v61, %v7105_v49  ;;  %4237 = vmatprep.subr.bf16.mxu0 %v5824_v21  ;;  %v5840_v49 = vld [vmem:[%s7117_s9 + $0x40] ss:$8 sps:$4 sm:$0xff]   ;;  %v5929_v21 = vld [vmem:[%s7117_s9 + $0x254] ss:$8 sps:$4 sm:$0xff]   ;;  %v5932_v35 = vld [vmem:[%s7117_s9 + $0x264] ss:$8 sps:$4 sm:$0xff]  }
 0xaf2   : > { %v5930_v10 = vld [vmem:[%s7117_s9 + $0x260] ss:$8 sps:$4 sm:$0xff]   ;;  %v5935_v60 = vld [vmem:[%s7117_s9 + $0x274] ss:$8 sps:$4 sm:$0xff]   ;;  %v5933_v61 = vld [vmem:[%s7117_s9 + $0x270] ss:$8 sps:$4 sm:$0xff]  }
 0xaf3   : > { %5063 = vmatmul.mubr.msk.f32.gmra.mrb[44].mxu0 %vm758_vm5, %v2792_v26  ;;  %v5938_v26 = vld [vmem:[%s7117_s9 + $0x284] ss:$8 sps:$4 sm:$0xff]  }
 0xaf8   : > { %4238 = vmatpush1.bf16.xpose.msra.mxu0 %v5822_v27  ;;  %v5936_v27 = vld [vmem:[%s7117_s9 + $0x280] ss:$8 sps:$4 sm:$0xff]  }
 0xaf9   : > { %4239 = vmatprep.subr.bf16.mxu0 %v5830_v52  ;;  %v5941_v52 = vld [vmem:[%s7117_s9 + $0x294] ss:$8 sps:$4 sm:$0xff]  }
 0xb00   : > { %4240 = vmatpush1.bf16.xpose.msra.mxu0 %v5828_v47  ;;  %v5939_v47 = vld [vmem:[%s7117_s9 + $0x290] ss:$8 sps:$4 sm:$0xff]  }
 0xb01   : > { %4241 = vmatprep.subr.bf16.mxu0 %v5836_v53  ;;  %v5944_v53 = vld [vmem:[%s7117_s9 + $0x2a4] ss:$8 sps:$4 sm:$0xff]  }
 0xb08   : > { %4242 = vmatpush1.bf16.xpose.msra.mxu0 %v5834_v54  ;;  %v5942_v54 = vld [vmem:[%s7117_s9 + $0x2a0] ss:$8 sps:$4 sm:$0xff]  }
 0xb09   : > { %4243 = vmatprep.subr.bf16.mxu0 %v5842_v55  ;;  %v5947_v55 = vld [vmem:[%s7117_s9 + $0x2b4] ss:$8 sps:$4 sm:$0xff]  }
 0xb10   : > { %4244 = vmatpush1.bf16.xpose.msra.mxu0 %v5840_v49  ;;  %v5945_v49 = vld [vmem:[%s7117_s9 + $0x2b0] ss:$8 sps:$4 sm:$0xff]  }
 0xb11   : > { %4245 = vmatprep.subr.bf16.mxu0 %v5848_v56  ;;  %v5950_v56 = vld [vmem:[%s7117_s9 + $0x2c4] ss:$8 sps:$4 sm:$0xff]  }
 0xb18   : > { %4246 = vmatpush1.bf16.xpose.msra.mxu0 %v5846_v62  ;;  %v5948_v62 = vld [vmem:[%s7117_s9 + $0x2c0] ss:$8 sps:$4 sm:$0xff]  }
 0xb19   : > { %4247 = vmatprep.subr.bf16.mxu0 %v5854_v9  ;;  %v5953_v9 = vld [vmem:[%s7117_s9 + $0x2d4] ss:$8 sps:$4 sm:$0xff]  }
 0xb20   : > { %4248 = vmatpush1.bf16.xpose.msra.mxu0 %v5852_v38  ;;  %v5951_v38 = vld [vmem:[%s7117_s9 + $0x2d0] ss:$8 sps:$4 sm:$0xff]  }
 0xb21   : > { %4249 = vmatprep.subr.bf16.mxu0 %v5860_v63  ;;  %v5956_v63 = vld [vmem:[%s7117_s9 + $0x2e4] ss:$8 sps:$4 sm:$0xff]  }
 0xb28   : > { %4250 = vmatpush1.bf16.xpose.msra.mxu0 %v5858_v0  ;;  %v5954_v0 = vld [vmem:[%s7117_s9 + $0x2e0] ss:$8 sps:$4 sm:$0xff]  }
 0xb29   : > { %4251 = vmatprep.subr.bf16.mxu0 %v5866_v59  ;;  %v5959_v59 = vld [vmem:[%s7117_s9 + $0x2f4] ss:$8 sps:$4 sm:$0xff]  }
 0xb30   : > { %4252 = vmatpush1.bf16.xpose.msra.mxu0 %v5864_v2  ;;  %v5957_v2 = vld [vmem:[%s7117_s9 + $0x2f0] ss:$8 sps:$4 sm:$0xff]  }
 0xb31   : > { %4253 = vmatprep.subr.bf16.mxu0 %v5872_v1 }
 0xb38   : > { %4254 = vmatpush1.bf16.xpose.msra.mxu0 %v5870_v4 }
 0xb39   : > { %4255 = vmatprep.subr.bf16.mxu0 %v5878_v11 }
 0xb40   : > { %4256 = vmatpush1.bf16.xpose.msra.mxu0 %v5876_v13 }
 0xb41   : > { %4257 = vmatprep.subr.bf16.mxu0 %v5884_v6 }
 0xb48   : > { %4258 = vmatpush1.bf16.xpose.msra.mxu0 %v5882_v15 }
 0xb49   : > { %4259 = vmatprep.subr.bf16.mxu0 %v5890_v46 }
 0xb50   : > { %4260 = vmatpush1.bf16.xpose.msra.mxu0 %v5888_v18 }
 0xb51   : > { %4261 = vmatprep.subr.bf16.mxu0 %v5896_v19 }
 0xb58   : > { %4262 = vmatpush1.bf16.xpose.msra.mxu0 %v5894_v12 }
 0xb59   : > { %4263 = vmatprep.subr.bf16.mxu0 %v5902_v20 }
 0xb60   : > { %4264 = vmatpush1.bf16.xpose.msra.mxu0 %v5900_v48 }
 0xb61   : > { %4265 = vmatprep.subr.bf16.mxu0 %v5908_v24 }
 0xb68   : > { %4266 = vmatpush1.bf16.xpose.msra.mxu0 %v5906_v44 }
 0xb69   : > { %4321 = vmatprep.subr.bf16.mxu0 %v5914_v28 }
 0xbc2   : > { %v3644_v29 = vpop.f32.mrb[38].mxu0 }
 0xbc3   : > { %v3646_v31 = vpop.f32.mrb[39].mxu0 }
 0xbc6   : > { %v3650_v32 = vpop.f32.mrb[44].mxu0 }
 0xbc7   : > { %v7209_v5 = vpack.c.bf16 %v3650_v32, %v3644_v29  ;;  %v3652_v34 = vpop.f32.mrb[45].mxu0 }
 0xbc8   : > { %v3656_v57 = vpack.c.bf16 %v3652_v34, %v3646_v31  ;;  %v5162_v34 = vld [vmem:[%s7257_s14 + $0x20] sm:$0xff] }
 0xbca   : > { %4267 = vmatprep.mubr.bf16.mxu0 %v3656_v57  ;;  %4310 = vmatprep.mubr.bf16.mxu1 %v3656_v57 }
 0xbcb   : > { %4268 = vmatmul.mubr.bf16.vlgmr.msra.gmra.mrb[48].mxu0 %v7209_v5  ;;  %4311 = vmatmul.mubr.bf16.vlgmr.msra.gmra.mrb[80].mxu1 %v7209_v5 }
 0xbcc   : > { %4322 = vmatpush1.bf16.xpose.msra.mxu0 %v5912_v36  ;;  %4353 = vmatprep.mubr.bf16.mxu0 %v3656_v57 }
 0xbcd   : > { %4323 = vmatprep.subr.bf16.mxu0 %v5917_v40  ;;  %v3566_v40 = vld [vmem:[%s7257_s14 + $0x10] sm:$0xff] }
 0xbd4   : > { %4324 = vmatpush1.bf16.xpose.msra.mxu0 %v5915_v41 }
 0xbd5   : > { %4325 = vmatprep.subr.bf16.mxu0 %v5920_v16 }
 0xbdc   : > { %4326 = vmatpush1.bf16.xpose.msra.mxu0 %v5918_v8  ;;  %v5163_v8 = vld [vmem:[%s7257_s14 + $0x28] sm:$0xff] }
 0xbdd   : > { %4327 = vmatprep.subr.bf16.mxu0 %v5923_v42 }
 0xbe4   : > { %4328 = vmatpush1.bf16.xpose.msra.mxu0 %v5921_v43 }
 0xbe5   : > { %4329 = vmatprep.subr.bf16.mxu0 %v5926_v3  ;;  %v3567_v3 = vld [vmem:[%s7257_s14 + $0x18] sm:$0xff] }
 0xbec   : > { %4330 = vmatpush1.bf16.xpose.msra.mxu0 %v5924_v45 }
 0xbed   : > { %4331 = vmatprep.subr.bf16.mxu0 %v5929_v21  ;;  %v5164_v21 = vld [vmem:[%s7257_s14 + $0x30] sm:$0xff] }
 0xbf4   : > { %4332 = vmatpush1.bf16.xpose.msra.mxu0 %v5927_v33 }
 0xbf5   : > { %4333 = vmatprep.subr.bf16.mxu0 %v5932_v35  ;;  %v5167_v35 = vld [vmem:[%s7257_s14 + $0x40] sm:$0xff] }
 0xbfc   : > { %4334 = vmatpush1.bf16.xpose.msra.mxu0 %v5930_v10 }
 0xbfd   : > { %4335 = vmatprep.subr.bf16.mxu0 %v5935_v60 }
 0xc04   : > { %4336 = vmatpush1.bf16.xpose.msra.mxu0 %v5933_v61  ;;  %v5165_v61 = vld [vmem:[%s7257_s14 + $0x38] sm:$0xff] }
 0xc05   : > { %4337 = vmatprep.subr.bf16.mxu0 %v5938_v26  ;;  %v5168_v26 = vld [vmem:[%s7257_s14 + $0x48] sm:$0xff] }
 0xc0c   : > { %4338 = vmatpush1.bf16.xpose.msra.mxu0 %v5936_v27  ;;  %v5173_v27 = vld [vmem:[%s7257_s14 + $0x68] sm:$0xff] }
 0xc0d   : > { %4339 = vmatprep.subr.bf16.mxu0 %v5941_v52  ;;  %v3570_v52 = vadd.f32 %v3566_v40, %v7171_v17 }
 0xc14   : > { %4340 = vmatpush1.bf16.xpose.msra.mxu0 %v5939_v47 }
 0xc15   : > { %4341 = vmatprep.subr.bf16.mxu0 %v5944_v53  ;;  %v3571_v53 = vadd.f32 %v3567_v3, %v7173_v50 }
 0xc1c   : > { %4342 = vmatpush1.bf16.xpose.msra.mxu0 %v5942_v54  ;;  %v5169_v54 = vld [vmem:[%s7257_s14 + $0x50] sm:$0xff] }
 0xc1d   : > { %4343 = vmatprep.subr.bf16.mxu0 %v5947_v55  ;;  %v5174_v55 = vld [vmem:[%s7257_s14 + $0x70] sm:$0xff]  ;;  %v4404_v17 = vmul.f32 %v5169_v54, %v3570_v52 }
 0xc24   : > { %4344 = vmatpush1.bf16.xpose.msra.mxu0 %v5945_v49 }
 0xc25   : > { %4345 = vmatprep.subr.bf16.mxu0 %v5950_v56 }
 0xc2c   : > { %4346 = vmatpush1.bf16.xpose.msra.mxu0 %v5948_v62  ;;  %v5170_v62 = vld [vmem:[%s7257_s14 + $0x58] sm:$0xff] }
 0xc2d   : > { %4347 = vmatprep.subr.bf16.mxu0 %v5953_v9  ;;  %v5175_v9 = vld [vmem:[%s7257_s14 + $0x78] sm:$0xff] }
 0xc34   : > { %4348 = vmatpush1.bf16.xpose.msra.mxu0 %v5951_v38 }
 0xc35   : > { %4349 = vmatprep.subr.bf16.mxu0 %v5956_v63 }
 0xc3c   : > { %4350 = vmatpush1.bf16.xpose.msra.mxu0 %v5954_v0 }
 0xc3d   : > { %4351 = vmatprep.subr.bf16.mxu0 %v5959_v59 }
 0xc44   : > { %4352 = vmatpush1.bf16.xpose.msra.mxu0 %v5957_v2 }
 0xc4b   : > { %4354 = vmatmul.mubr.bf16.vlgmr.msra.gmra.mrb[52].mxu0 %v7209_v5 }
 0xc9e   : > { %v4269_v1 = vpop.f32.mrb[48].mxu0  ;;  %v4312_v4 = vpop.f32.mrb[80].mxu1 }
 0xc9f   : > { %v4364_v11 = vmul.f32 %v4269_v1, %v7069_v39  ;;  %v4368_v13 = vmul.f32 %v4312_v4, %v7071_v22  ;;  %v4271_v6 = vpop.f32.mrb[49].mxu0  ;;  %v4314_v14 = vpop.f32.mrb[81].mxu1  ;;  %v4405_v4 = vmul.f32 %v5170_v62, %v3571_v53 }
 0xca0   : > { %v4365_v25 = vmul.f32 %v4271_v6, %v7069_v39  ;;  %v4369_v15 = vmul.f32 %v4314_v14, %v7071_v22  ;;  %v4273_v46 = vpop.f32.mrb[50].mxu0  ;;  %v4316_v18 = vpop.f32.mrb[82].mxu1  ;;  %v3564_v39 = vld [vmem:[%s7257_s14] sm:$0xff] }
 0xca1   : > { %v4372_v19 = vadd.f32 %v4368_v13, %v4364_v11  ;;  %v4366_v12 = vmul.f32 %v4273_v46, %v7150_v58  ;;  %v4370_v20 = vmul.f32 %v4316_v18, %v7073_v23  ;;  %v4275_v48 = vpop.f32.mrb[51].mxu0  ;;  %v4318_v24 = vpop.f32.mrb[83].mxu1  ;;  %v7266_v41 = vadd.f32 %v3564_v39, %v7091_v51  ;;  %v5172_v51 = vld [vmem:[%s7257_s14 + $0x60] sm:$0xff]  ;;  %v4430_v46 = vld [vmem:[%s4428_s26 + $0x8] sm:$0xff] }
 0xca2   : > { %v4373_v44 = vadd.f32 %v4369_v15, %v4365_v25  ;;  %v4367_v28 = vmul.f32 %v4275_v48, %v7150_v58  ;;  %v4371_v29 = vmul.f32 %v4318_v24, %v7073_v23  ;;  %v3565_v58 = vld [vmem:[%s7257_s14 + $0x8] sm:$0xff]  ;;  %v4429_v25 = vld [vmem:[%s4428_s26] sm:$0xff] }
 0xca3   : > { %v4374_v31 = vadd.f32 %v4370_v20, %v4366_v12  ;;  %v7272_v45 = vadd.f32 %v3565_v58, %v7093_v37 }
 0xca4   : > { %v4375_v32 = vadd.f32 %v4371_v29, %v4367_v28 }
 0xca5   : > { %v4403_v63 = vmul.f32 %v5168_v26, %v7272_v45 }
 0xd1e   : > { %v4355_v22 = vpop.f32.mrb[52].mxu0 }
 0xd1f   : > { %v4376_v23 = vmul.f32 %v4355_v22, %v7078_v30  ;;  %v4357_v5 = vpop.f32.mrb[53].mxu0 }
 0xd20   : > { %v4377_v57 = vmul.f32 %v4357_v5, %v7078_v30  ;;  %v4359_v36 = vpop.f32.mrb[54].mxu0 }
 0xd21   : > { %v4380_v16 = vadd.f32 %v4376_v23, %v4372_v19  ;;  %v4378_v42 = vmul.f32 %v4359_v36, %v7161_v7  ;;  %v4361_v43 = vpop.f32.mrb[55].mxu0 }
 0xd22   : > { %v4381_v30 = vadd.f32 %v4377_v57, %v4373_v44  ;;  %v4379_v33 = vmul.f32 %v4361_v43, %v7161_v7  ;;  %v4402_v7 = vmul.f32 %v5167_v35, %v7266_v41 }
 0xd23   : > { %v7278_v10 = vadd.f32 %v5162_v34, %v4380_v16  ;;  %v4382_v60 = vadd.f32 %v4378_v42, %v4374_v31 }
 0xd24   : > { %v4392_v47 = vadd.f32 %v5163_v8, %v4381_v30  ;;  %v4383_v37 = vadd.f32 %v4379_v33, %v4375_v32 }
 0xd25   : > { %v4393_v49 = vadd.f32 %v5164_v21, %v4382_v60  ;;  %v4413_v56 = vmul.f32 %v5172_v51, %v7278_v10 }
 0xd26   : > { %v4394_v38 = vadd.f32 %v5165_v61, %v4383_v37  ;;  %v4414_v0 = vmul.f32 %v5173_v27, %v4392_v47 }
 0xd27   : > { %v4417_v59 = vadd.f32 %v4413_v56, %v4402_v7  ;;  %v4415_v2 = vmul.f32 %v5174_v55, %v4393_v49 }
 0xd28   : > { %v4418_v1 = vadd.f32 %v4414_v0, %v4403_v63  ;;  %v4416_v50 = vmul.f32 %v5175_v9, %v4394_v38 }
 0xd29   : > { %v4419_v11 = vadd.f32 %v4415_v2, %v4404_v17  ;;  %v5182_v17 = vld [vmem:[%s7257_s14 + $0x90] sm:$0xff]  ;;  %v5183_v2 = vld [vmem:[%s7257_s14 + $0x98] sm:$0xff] }
 0xd2a   : > { %v4421_v13 = vadd.f32 %v4418_v1, %v4417_v59  ;;  %v4420_v6 = vadd.f32 %v4416_v50, %v4405_v4  ;;  %v5187_v1 = vld [vmem:[%s7257_s14 + $0xb0] sm:$0xff] }
 0xd2c   : > { %4422 = vadd.xlane.f32.xlu1 %v4421_v13  ;;  %v4424_v14 = vadd.f32 %v4420_v6, %v4419_v11  ;;  %v5188_v13 = vld [vmem:[%s7257_s14 + $0xb8] sm:$0xff]  ;;  %v5180_v6 = vld [vmem:[%s7257_s14 + $0x80] sm:$0xff] }
 0xd2e   : > { %4425 = vadd.xlane.f32.xlu0 %v4424_v14  ;;  %v5181_v14 = vld [vmem:[%s7257_s14 + $0x88] sm:$0xff] }
 0xdb9   : > { %v4423_v15 = vpop.xlane.xlu1 %4422 }
 0xdba   : > { %v4431_v18 = vadd.f32 %v4429_v25, %v4423_v15 }
 0xdbb   : > { %v4426_v19 = vpop.xlane.xlu0 %4425 }
 0xdbc   : > { %v5177_v12 = vmul.f32 -1.442695, %v4431_v18  ;;  %v4432_v20 = vadd.f32 %v4430_v46, %v4426_v19  ;;  %v5185_v19 = vld [vmem:[%s7257_s14 + $0xa0] sm:$0xff] }
 0xdbe   : > { %5998 = vpow2.f32 %v5177_v12  ;;  %v5178_v48 = vmul.f32 -1.442695, %v4432_v20  ;;  %v5186_v12 = vld [vmem:[%s7257_s14 + $0xa8] sm:$0xff] }
 0xdc0   : > { %6000 = vpow2.f32 %v5178_v48 }
 0xdc8   : > { %v5999_v24 = vpop.eup %5998 }
 0xdc9   : > { %v4439_v44 = vadd.f32 1.0, %v5999_v24 }
 0xdca   : > { %v6001_v28 = vpop.eup %6000 }
 0xdcb   : > { %6002 = vrcp.f32 %v4439_v44  ;;  %v4440_v29 = vadd.f32 1.0, %v6001_v28 }
 0xdcd   : > { %6004 = vrcp.f32 %v4440_v29 }
 0xdd5   : > { %v6003_v31 = vpop.eup %6002 }
 0xdd6   : > { %4447 = vperm.xlu0 %5670, %v6003_v31   ;;  %v4459_v22 = vsub.f32 1.0, %v6003_v31 }
 0xdd7   : > { %v6005_v32 = vpop.eup %6004 }
 0xdd8   : > { %4452 = vperm.xlu1 %5671, %v6005_v32   ;;  %v4460_v39 = vsub.f32 1.0, %v6005_v32 }
 0xdda   : > { %4468 = vperm.xlu0 %5670, %v4460_v39  }
 0xddc   : > { %4463 = vperm.xlu1 %5671, %v4459_v22  }
 0xe55   : > { %v4448_v58 = vpop.permute.xlu0 %4447 }
 0xe56   : > { %v4455_v16 = vmul.f32 %v4448_v58, %v7266_v41  ;;  %v4456_v8 = vmul.f32 %v4448_v58, %v7272_v45 }
 0xe57   : > { %v4453_v23 = vpop.permute.xlu1 %4452 }
 0xe58   : > { %v4457_v34 = vmul.f32 %v4453_v23, %v3570_v52  ;;  %v4458_v57 = vmul.f32 %v4453_v23, %v3571_v53 }
 0xe59   : > { %v4469_v5 = vpop.permute.xlu0 %4468 }
 0xe5a   : > { %v4473_v36 = vmul.f32 %v4469_v5, %v4393_v49  ;;  %v4474_v40 = vmul.f32 %v4469_v5, %v4394_v38 }
 0xe5b   : > { %v4464_v42 = vpop.permute.xlu1 %4463 }
 0xe5c   : > { %v4471_v43 = vmul.f32 %v4464_v42, %v7278_v10  ;;  %v4472_v3 = vmul.f32 %v4464_v42, %v4392_v47  ;;  %v4477_v30 = vadd.f32 %v4473_v36, %v4457_v34  ;;  %v4478_v21 = vadd.f32 %v4474_v40, %v4458_v57 }
 0xe5e   : > { %v4482_v33 = vadd.f32 %v4478_v21, %v4477_v30  ;;  %v4475_v35 = vadd.f32 %v4471_v43, %v4455_v16  ;;  %v4476_v51 = vadd.f32 %v4472_v3, %v4456_v8 }
 0xe60   : > { %4483 = vadd.xlane.f32.xlu0 %v4482_v33  ;;  %v4479_v60 = vadd.f32 %v4476_v51, %v4475_v35 }
 0xe62   : > { %4480 = vadd.xlane.f32.xlu1 %v4479_v60 }
 0xeed   : > { %v4484_v61 = vpop.xlane.xlu0 %4483 }
 0xeee   : > { %v4487_v26 = vmul.f32 0.00390625, %v4484_v61 }
 0xeef   : > { %v4481_v27 = vpop.xlane.xlu1 %4480 }
 0xef0   : > { %v4490_v52 = vsub.f32 %v4477_v30, %v4487_v26  ;;  %v4491_v37 = vsub.f32 %v4478_v21, %v4487_v26  ;;  %v4486_v41 = vmul.f32 0.00390625, %v4481_v27 }
 0xef2   : > { %v4488_v53 = vsub.f32 %v4475_v35, %v4486_v41  ;;  %v4489_v45 = vsub.f32 %v4476_v51, %v4486_v41  ;;  %v4494_v54 = vmul.f32 %v4490_v52, %v4490_v52  ;;  %v4495_v55 = vmul.f32 %v4491_v37, %v4491_v37 }
 0xef4   : > { %v4499_v10 = vadd.f32 %v4495_v55, %v4494_v54  ;;  %v4492_v47 = vmul.f32 %v4488_v53, %v4488_v53  ;;  %v4493_v49 = vmul.f32 %v4489_v45, %v4489_v45 }
 0xef6   : > { %4500 = vadd.xlane.f32.xlu1 %v4499_v10  ;;  %v4496_v7 = vadd.f32 %v4493_v49, %v4492_v47 }
 0xef8   : > { %4497 = vadd.xlane.f32.xlu0 %v4496_v7 }
 0xf83   : > { %v4501_v56 = vpop.xlane.xlu1 %4500 }
 0xf84   : > { %v4503_v62 = vmul.f32 0.00390625, %v4501_v56 }
 0xf85   : > { %v4498_v9 = vpop.xlane.xlu0 %4497 }
 0xf86   : > { %v4505_v38 = vadd.f32 1e-05, %v4503_v62  ;;  %v4502_v63 = vmul.f32 0.00390625, %v4498_v9 }
 0xf88   : > { %6006 = vrsqrt.f32 %v4505_v38  ;;  %v4504_v0 = vadd.f32 1e-05, %v4502_v63 }
 0xf8a   : > { %6008 = vrsqrt.f32 %v4504_v0 }
 0xf92   : > { %v6007_v59 = vpop.eup %6006 }
 0xf93   : > { %v4510_v4 = vmul.f32 %v6007_v59, %v4490_v52  ;;  %v4511_v50 = vmul.f32 %v6007_v59, %v4491_v37 }
 0xf94   : > { %v6009_v11 = vpop.eup %6008 }
 0xf95   : > { %v4521_v25 = vmul.f32 %v5182_v17, %v4510_v4  ;;  %v4522_v15 = vmul.f32 %v5183_v2, %v4511_v50  ;;  %v4508_v46 = vmul.f32 %v6009_v11, %v4488_v53  ;;  %v4509_v18 = vmul.f32 %v6009_v11, %v4489_v45 }
 0xf97   : > { %v4532_v20 = vadd.f32 %v5187_v1, %v4521_v25  ;;  %v4533_v48 = vadd.f32 %v5188_v13, %v4522_v15  ;;  %v4519_v24 = vmul.f32 %v5180_v6, %v4508_v46  ;;  %v4520_v44 = vmul.f32 %v5181_v14, %v4509_v18 }
 0xf99   : > { %v4536_v28 = vmax.f32 %v4532_v20, 0.0  ;;  %v4537_v29 = vmax.f32 %v4533_v48, 0.0  ;;  %v4530_v31 = vadd.f32 %v5185_v19, %v4519_v24  ;;  %v4531_v32 = vadd.f32 %v5186_v12, %v4520_v44 }
 0xf9b   : > { %4540 = vst [vmem:[#allocation2 + $0x10] sm:$0xff] %v4536_v28  ;;  %4541 = vst [vmem:[#allocation2 + $0x18] sm:$0xff] %v4537_v29  ;;  %v4534_v39 = vmax.f32 %v4530_v31, 0.0  ;;  %v4535_v22 = vmax.f32 %v4531_v32, 0.0 }
 0xf9d   : > { %4538 = vst [vmem:[#allocation2] sm:$0xff] %v4534_v39  ;;  %4539 = vst [vmem:[#allocation2 + $0x8] sm:$0xff] %v4535_v22 }
 0xf9e PF: > { %s7369_s21 = sld [smem:[#allocation6_spill]]  ;;  %s7371_s22 = sld [smem:[#allocation5_spill]] }
 0xf9f   : > { %s7372_s23 = sld [smem:[#allocation7_spill]]  ;;  %s7373_s24 = sld [smem:[#allocation8_spill]] }
 0xfa4   : > { %s27_s25 = sadd.s32 1, %s7369_s21   ;;  %s7370_s21 = sld [smem:[#allocation4_spill]] }
 0xfa5   : > { %p24_p8 = scmp.ge.s32.totalorder %s27_s25, 6  }
 0xfa7   :  { %26 = sbr.rel (!%p24_p8) target bundleno = 9 (0x9), region = 155 }

</bundles_post_ra>
